<compile_context>
chip_gen: v5e
topology: v5e:2x2
jax: 0.10.0
libtpu: 0.0.40
codegen_flags: <defaults>
</compile_context>

<pallas_src>
import math
from functools import partial

import jax
import jax.numpy as jnp
from jax.experimental import pallas as pl
from jax.experimental.pallas import tpu as pltpu


# ----------------------------------------------------------------------------
# Lagrange interpolation nodes (chebyshev-lobatto, scaled by length/2)
# ----------------------------------------------------------------------------
def chebyshev_lobatto(n: int, length: float = 2.0):
    if n == 1:
        return (0.0,)
    return tuple(
        (length / 2.0) * (-math.cos(math.pi * k / (n - 1))) for k in range(n)
    )


def _round_up(x: int, m: int) -> int:
    return ((x + m - 1) // m) * m


# ----------------------------------------------------------------------------
# Fused Pallas kernel: on-the-fly Lagrange expansion + ONE concatenated-K matmul
#   a_ref    : (TM, Kraw)   raw im2col tile, f32 (Kraw = C*K*K, unpadded)
#   w_ref    : (Kp, Coutp)  2-D weight, rows ordered (j, c, kh, kw); 1/denominator
#                           and rescale already folded in; zero pad rows/cols.
#   o_ref    : (TM, Coutp)  output tile (input dtype)
#   acat_ref : (TM, Kp)     f32 VMEM scratch: n basis slabs side by side + zeros
#
# out = [basis_0(a) | ... | basis_{n-1}(a) | 0] @ w
# where basis_j(x) = prod_{m != j} (x - node_m), built from shared prefix /
# running-suffix products (O(3n) VPU multiplies per element).
# ----------------------------------------------------------------------------
def fused_expand_conv_kernel(a_ref, w_ref, o_ref, acat_ref, *, nodes, mxu_dtype):
    n = len(nodes)
    x = a_ref[...].astype(jnp.float32)      # keep basis math in f32 (v5e VALU)
    tm, kraw = x.shape
    kp = acat_ref.shape[-1]

    # Zero the contraction-pad tail so uninitialized VMEM (possible NaN bit
    # patterns) can never leak through the zero weight rows as NaN * 0.
    if kp > n * kraw:
        acat_ref[:, n * kraw:] = jnp.zeros((tm, kp - n * kraw), jnp.float32)

    if n == 1:
        acat_ref[:, 0:kraw] = jnp.ones_like(x)
    else:
        # prefix[j] = prod_{m < j} (x - node_m)   (None means 1)
        prefix = [None] * n
        run = None
        for j in range(n):
            prefix[j] = run
            d = x - nodes[j]
            run = d if run is None else run * d

        # backward pass: single running suffix product; store basis j to VMEM
        # as soon as it is formed (keeps ~n+2 live (TM, Kraw) temporaries).
        run = None
        for j in range(n - 1, -1, -1):
            if run is None:
                b = prefix[j]
            elif prefix[j] is None:
                b = run
            else:
                b = prefix[j] * run
            acat_ref[:, j * kraw:(j + 1) * kraw] = b
            if j > 0:
                d = x - nodes[j]
                run = d if run is None else run * d

    # Single MXU contraction over the concatenated (j, c, kh, kw) axis.
    a_cat = acat_ref[...].astype(mxu_dtype)       # cast right before the dot
    o_ref[...] = jnp.dot(
        a_cat, w_ref[...], preferred_element_type=jnp.float32
    ).astype(o_ref.dtype)


# ----------------------------------------------------------------------------
# Wrapper: PolynomialConvolution2d.forward
# ----------------------------------------------------------------------------
def polynomial_convolution_2d(x, weight, *, n, length=2.0, rescale_output=False,
                              mxu_dtype=jnp.bfloat16, tile_m=None):
    B, C, H, W = x.shape
    Cout, Cexp, K, K2 = weight.shape
    assert K == K2 and Cexp == C * n
    nodes = chebyshev_lobatto(n, length)

    Ho, Wo = H - K + 1, W - K + 1
    M = B * Ho * Wo
    Kraw = C * K * K
    Kcat = n * Kraw

    # --- trace-time weight prep: fold Lagrange denominators + rescale (in f32,
    #     cast to the MXU ingest dtype only at the very end) --------------------
    inv_denom = []
    for j in range(n):
        dprod = 1.0
        for m in range(n):
            if m != j:
                dprod *= nodes[j] - nodes[m]
        inv_denom.append(1.0 / dprod)
    rescale = (1.0 / (C * K * K)) if rescale_output else 1.0

    # weight[cout, c*n + j, kh, kw] -> w2d[(j*Kraw + c*K*K + kh*K + kw), cout]
    w5 = weight.astype(jnp.float32).reshape(Cout, C, n, K, K)
    wst = jnp.transpose(w5, (2, 1, 3, 4, 0)).reshape(n, Kraw, Cout)
    wst = wst * (jnp.asarray(inv_denom, jnp.float32)[:, None, None] * rescale)
    w2d = wst.reshape(Kcat, Cout)

    # --- MXU-friendly padding (weight only; activation stays unpadded in HBM) --
    Kp = _round_up(Kcat, 128)        # concatenated contraction dim
    Coutp = _round_up(Cout, 128)     # lane-dense output (unmasked stores)
    w2d = jnp.pad(w2d, ((0, Kp - Kcat), (0, Coutp - Cout))).astype(mxu_dtype)

    # --- raw-channel im2col (plain-JAX glue; only K*K x input bytes; the n-fold
    #     Lagrange expansion and its concatenated layout live purely in VMEM) ---
    cols = jnp.stack(
        [x[:, :, kh:kh + Ho, kw:kw + Wo] for kh in range(K) for kw in range(K)],
        axis=2,
    )  # (B, C, K*K, Ho, Wo)
    a = cols.transpose(0, 3, 4, 1, 2).reshape(M, Kraw).astype(jnp.float32)

    # --- row tiling: big tiles amortize the ~0.35us per-grid-step overhead -----
    if tile_m is None:
        tile_m = max(256, min(1024, _round_up(M, 256)))
    TM = tile_m
    Mp = _round_up(M, TM)
    a = jnp.pad(a, ((0, Mp - M), (0, 0)))

    # Padded activation rows (zeros) produce finite basis values; those rows are
    # sliced off below.  Padded weight rows/cols are exactly zero.
    out = pl.pallas_call(
        partial(fused_expand_conv_kernel, nodes=nodes, mxu_dtype=mxu_dtype),
        out_shape=jax.ShapeDtypeStruct((Mp, Coutp), x.dtype),
        grid_spec=pltpu.PrefetchScalarGridSpec(
            num_scalar_prefetch=0,
            grid=(Mp // TM,),
            in_specs=[
                # last dim == full array dim (36) -> legal and unpadded in HBM
                pl.BlockSpec((TM, Kraw), lambda i: (i, 0)),
                # resident weight block (constant index_map); tiny at these sizes
                pl.BlockSpec((Kp, Coutp), lambda i: (0, 0)),
            ],
            out_specs=pl.BlockSpec((TM, Coutp), lambda i: (i, 0)),
            scratch_shapes=[pltpu.VMEM((TM, Kp), jnp.float32)],
        ),
        compiler_params=pltpu.CompilerParams(
            dimension_semantics=("parallel",),
            vmem_limit_bytes=48 * 1024 * 1024,
        ),
    )(a, w2d)

    out = out[:M, :Cout].reshape(B, Ho, Wo, Cout).transpose(0, 3, 1, 2)  # NCHW
    return out.astype(x.dtype)


# ----------------------------------------------------------------------------
# Pure-JAX reference (mirrors the PyTorch module exactly)
# ----------------------------------------------------------------------------
def reference(x, weight, *, n, length=2.0, rescale_output=False):
    nodes = chebyshev_lobatto(n, length)
    basis = []
    for j in range(n):
        acc = jnp.ones_like(x)
        for m in range(n):
            if m != j:
                acc = acc * (x - nodes[m]) / (nodes[j] - nodes[m])
        basis.append(acc)
    res = jnp.stack(basis)                       # (n, B, C, H, W)
    res = jnp.transpose(res, (1, 3, 4, 2, 0))    # (B, H, W, C, n)
    res = res.reshape(res.shape[0], res.shape[1], res.shape[2], -1)
    res = jnp.transpose(res, (0, 3, 1, 2))       # (B, C*n, H, W)
    out = jax.lax.conv_general_dilated(
        res, weight, (1, 1), "VALID", dimension_numbers=("NCHW", "OIHW", "NCHW")
    )
    rescale = (1.0 / (x.shape[1] * weight.shape[2] * weight.shape[3])
               if rescale_output else 1.0)
    return out * rescale


if __name__ == "__main__":
    # Module hyper-parameters
    n = 5                  # number of Lagrange nodes (polynomial order n-1)
    in_channels = 4
    out_channels = 8
    kernel_size = 3
    length = 2.0
    rescale_output = False

    B, H, W = 2, 16, 16
    Cexp = n * in_channels                       # expanded channels fed to the conv

    key = jax.random.PRNGKey(0)
    kx, kw = jax.random.split(key)
    x = jax.random.uniform(kx, (B, in_channels, H, W), jnp.float32, -1.0, 1.0)

    # conv2d_wrapper init: uniform(-wm/in_features, wm/in_features),
    # in_features = (n*in_channels) * k * k, weight_magnitude = 1.0
    in_features = Cexp * kernel_size * kernel_size
    weight = jax.random.uniform(
        kw, (out_channels, Cexp, kernel_size, kernel_size), jnp.float32,
        -1.0 / in_features, 1.0 / in_features,
    )

    out = polynomial_convolution_2d(
        x, weight, n=n, length=length, rescale_output=rescale_output
    )
    out = jax.block_until_ready(out)

    ref = reference(x, weight, n=n, length=length, rescale_output=rescale_output)
    assert out.shape == ref.shape == (B, out_channels, H - kernel_size + 1,
                                      W - kernel_size + 1)
    # bf16 MXU ingest (f32 accumulation): tolerance comfortably above the
    # expected ~1e-4 rounding level for these magnitudes.
    err = float(jnp.max(jnp.abs(out - ref)))
    assert jnp.allclose(out, ref, rtol=1e-2, atol=5e-3), err
    print("KERNEL_OK")
</pallas_src>

<mosaic_0001>
module attributes {stable_mosaic.version = 11 : i64} {
  func.func @fused_expand_conv_kernel(%arg0: i32, %arg1: memref<512x36xf32, #tpu.memory_space<vmem>>, %arg2: memref<256x128xbf16, #tpu.memory_space<vmem>>, %arg3: memref<512x128xf32, #tpu.memory_space<vmem>>, %arg4: memref<512x256xf32, #tpu.memory_space<vmem>>) attributes {dimension_semantics = [#tpu.dimension_semantics<parallel>], iteration_bounds = array<i64: 1>, scalar_prefetch = 0 : i64, scratch_operands = 1 : i64, tpu.core_type = #tpu.core_type<tc>, window_params = [{transform_indices = @transform_0, window_bounds = array<i64: 512, 36>}, {pipeline_mode = #tpu.pipeline_mode<synchronous>, transform_indices = @transform_1, window_bounds = array<i64: 256, 128>}, {transform_indices = @transform_2, window_bounds = array<i64: 512, 128>}]} {
    %c0 = arith.constant 0 : index
    %c0_0 = arith.constant 0 : index
    %0 = vector.load %arg1[%c0, %c0_0] : memref<512x36xf32, #tpu.memory_space<vmem>>, vector<512x36xf32>
    %cst = arith.constant 0.000000e+00 : f32
    %1 = vector.broadcast %cst : f32 to vector<512x76xf32>
    %c0_1 = arith.constant 0 : index
    %c180 = arith.constant 180 : index
    %2 = vector.load %arg4[%c0_1, %c180] : memref<512x256xf32, #tpu.memory_space<vmem>>, vector<512x76xf32>
    tpu.vector_store %arg4[%c0_1, %c180], %1 {strides = array<i32>} : memref<512x256xf32, #tpu.memory_space<vmem>>, vector<512x76xf32>,
    %cst_2 = arith.constant -1.000000e+00 : f32
    %3 = vector.broadcast %cst_2 : f32 to vector<512x36xf32>
    %4 = arith.subf %0, %3 : vector<512x36xf32>
    %cst_3 = arith.constant -0.707106769 : f32
    %5 = vector.broadcast %cst_3 : f32 to vector<512x36xf32>
    %6 = arith.subf %0, %5 : vector<512x36xf32>
    %7 = arith.mulf %4, %6 : vector<512x36xf32>
    %cst_4 = arith.constant -6.12323426E-17 : f32
    %8 = vector.broadcast %cst_4 : f32 to vector<512x36xf32>
    %9 = arith.subf %0, %8 : vector<512x36xf32>
    %10 = arith.mulf %7, %9 : vector<512x36xf32>
    %cst_5 = arith.constant 0.707106769 : f32
    %11 = vector.broadcast %cst_5 : f32 to vector<512x36xf32>
    %12 = arith.subf %0, %11 : vector<512x36xf32>
    %13 = arith.mulf %10, %12 : vector<512x36xf32>
    %c0_6 = arith.constant 0 : index
    %c144 = arith.constant 144 : index
    %14 = vector.load %arg4[%c0_6, %c144] : memref<512x256xf32, #tpu.memory_space<vmem>>, vector<512x36xf32>
    tpu.vector_store %arg4[%c0_6, %c144], %13 {strides = array<i32>} : memref<512x256xf32, #tpu.memory_space<vmem>>, vector<512x36xf32>,
    %cst_7 = arith.constant 1.000000e+00 : f32
    %15 = vector.broadcast %cst_7 : f32 to vector<512x36xf32>
    %16 = arith.subf %0, %15 : vector<512x36xf32>
    %17 = arith.mulf %10, %16 : vector<512x36xf32>
    %c0_8 = arith.constant 0 : index
    %c108 = arith.constant 108 : index
    %18 = vector.load %arg4[%c0_8, %c108] : memref<512x256xf32, #tpu.memory_space<vmem>>, vector<512x36xf32>
    tpu.vector_store %arg4[%c0_8, %c108], %17 {strides = array<i32>} : memref<512x256xf32, #tpu.memory_space<vmem>>, vector<512x36xf32>,
    %cst_9 = arith.constant 0.707106769 : f32
    %19 = vector.broadcast %cst_9 : f32 to vector<512x36xf32>
    %20 = arith.subf %0, %19 : vector<512x36xf32>
    %21 = arith.mulf %16, %20 : vector<512x36xf32>
    %22 = arith.mulf %7, %21 : vector<512x36xf32>
    %c0_10 = arith.constant 0 : index
    %c72 = arith.constant 72 : index
    %23 = vector.load %arg4[%c0_10, %c72] : memref<512x256xf32, #tpu.memory_space<vmem>>, vector<512x36xf32>
    tpu.vector_store %arg4[%c0_10, %c72], %22 {strides = array<i32>} : memref<512x256xf32, #tpu.memory_space<vmem>>, vector<512x36xf32>,
    %cst_11 = arith.constant -6.12323426E-17 : f32
    %24 = vector.broadcast %cst_11 : f32 to vector<512x36xf32>
    %25 = arith.subf %0, %24 : vector<512x36xf32>
    %26 = arith.mulf %21, %25 : vector<512x36xf32>
    %27 = arith.mulf %4, %26 : vector<512x36xf32>
    %c0_12 = arith.constant 0 : index
    %c36 = arith.constant 36 : index
    %28 = vector.load %arg4[%c0_12, %c36] : memref<512x256xf32, #tpu.memory_space<vmem>>, vector<512x36xf32>
    tpu.vector_store %arg4[%c0_12, %c36], %27 {strides = array<i32>} : memref<512x256xf32, #tpu.memory_space<vmem>>, vector<512x36xf32>,
    %cst_13 = arith.constant -0.707106769 : f32
    %29 = vector.broadcast %cst_13 : f32 to vector<512x36xf32>
    %30 = arith.subf %0, %29 : vector<512x36xf32>
    %31 = arith.mulf %26, %30 : vector<512x36xf32>
    %c0_14 = arith.constant 0 : index
    %c0_15 = arith.constant 0 : index
    %32 = vector.load %arg4[%c0_14, %c0_15] : memref<512x256xf32, #tpu.memory_space<vmem>>, vector<512x36xf32>
    tpu.vector_store %arg4[%c0_14, %c0_15], %31 {strides = array<i32>} : memref<512x256xf32, #tpu.memory_space<vmem>>, vector<512x36xf32>,
    %c0_16 = arith.constant 0 : index
    %c0_17 = arith.constant 0 : index
    %33 = vector.load %arg4[%c0_16, %c0_17] : memref<512x256xf32, #tpu.memory_space<vmem>>, vector<512x256xf32>
    %34 = arith.truncf %33 : vector<512x256xf32> to vector<512x256xbf16>
    %c0_18 = arith.constant 0 : index
    %c0_19 = arith.constant 0 : index
    %35 = vector.load %arg2[%c0_18, %c0_19] : memref<256x128xbf16, #tpu.memory_space<vmem>>, vector<256x128xbf16>
    %cst_20 = arith.constant dense<0.000000e+00> : vector<512x128xf32>
    %36 = tpu.matmul %34, %35, %cst_20 {dimension_numbers = #tpu.dot_dimension_numbers<[1], [0], [0], [1], [0, 0, 1, 1], [], []>} : vector<512x256xbf16>, vector<256x128xbf16>, vector<512x128xf32> -> vector<512x128xf32>
    %c0_21 = arith.constant 0 : index
    %c0_22 = arith.constant 0 : index
    %37 = vector.load %arg3[%c0_21, %c0_22] : memref<512x128xf32, #tpu.memory_space<vmem>>, vector<512x128xf32>
    tpu.vector_store %arg3[%c0_21, %c0_22], %36 {strides = array<i32>} : memref<512x128xf32, #tpu.memory_space<vmem>>, vector<512x128xf32>,
    return
  }
  func.func @transform_0(%arg0: i32) -> (i32, i32) {
    %c0_i32 = arith.constant 0 : i32
    %c0_i32_0 = arith.constant 0 : i32
    return %arg0, %c0_i32 : i32, i32
  }
  func.func @transform_1(%arg0: i32) -> (i32, i32) {
    %c0_i32 = arith.constant 0 : i32
    %c0_i32_0 = arith.constant 0 : i32
    %c0_i32_1 = arith.constant 0 : i32
    return %c0_i32, %c0_i32_0 : i32, i32
  }
  func.func @transform_2(%arg0: i32) -> (i32, i32) {
    %c0_i32 = arith.constant 0 : i32
    %c0_i32_0 = arith.constant 0 : i32
    return %arg0, %c0_i32 : i32, i32
  }
}

</mosaic_0001>

<bundles_post_ra>
// kernel: tpu_custom_call.1
= control target key start
LH: loop header
LB: loop body
LE: loop exit
PB: predicated region body
PF: predicated region fallthrough
CT: control target
= control target key end

     0   :  { %s7084_s0 = inlined_call_operand.vmem [shape: f32[512,36], index: 0, kind: input, shape index: {}]   ;;  %s7085_s1 = inlined_call_operand.vmem [shape: bf16[256,128], index: 1, kind: input, shape index: {}]   ;;  %s7086_s2 = inlined_call_operand.hbm [shape: f32[512,128], index: 2, kind: output, shape index: {}]  }
   0x1   :  { %v14_v0 = vld [vmem:[%s7084_s0 + $0x10] sm:$0xff]  ;;  %v12_v1 = vld [vmem:[%s7084_s0] sm:$0xff]  ;;  %v15_v2 = vld [vmem:[%s7084_s0 + $0x18] sm:$0xff] }
   0x2   :  { %v3717_v3 = vadd.f32 1.0, %v14_v0  ;;  %v3719_v4 = vadd.f32 0.70710677, %v14_v0  ;;  %v3721_v5 = vadd.f32 6.123234e-17, %v14_v0  ;;  %v3723_v6 = vadd.f32 1.0, %v12_v1 }
   0x3   :  { %v3725_v7 = vadd.f32 0.70710677, %v12_v1  ;;  %v3731_v9 = vadd.f32 -0.70710677, %v14_v0  ;;  %v3733_v10 = vadd.f32 6.123234e-17, %v12_v1 }
   0x4   :  { %7463 = vst [vmem:[#allocation6_spill] sm:$0xff] %v3717_v3  ;;  %v3729_v8 = vmul.f32 %v3719_v4, %v3717_v3  ;;  %v3735_v11 = vadd.f32 1.0, %v15_v2  ;;  %v13_v12 = vld [vmem:[%s7084_s0 + $0x8] sm:$0xff]  ;;  %v3744_v14 = vadd.f32 -0.70710677, %v12_v1  ;;  %v19_v19 = vld [vmem:[%s7084_s0 + $0x38] sm:$0xff] }
   0x5   :  { %7464 = vst [vmem:[#allocation7_spill] sm:$0xff] %v3719_v4  ;;  %v3742_v13 = vmul.f32 %v3725_v7, %v3723_v6  ;;  %v3746_v15 = vadd.f32 0.70710677, %v15_v2  ;;  %v3752_v17 = vadd.f32 6.123234e-17, %v15_v2  ;;  %v3754_v18 = vadd.f32 1.0, %v13_v12 }
   0x6   :  { %7465 = vst [vmem:[#allocation8_spill] sm:$0xff] %v3721_v5  ;;  %v3750_v16 = vmul.f32 %v3721_v5, %v3729_v8  ;;  %v3767_v22 = vadd.f32 0.70710677, %v13_v12  ;;  %v3769_v23 = vadd.f32 6.123234e-17, %v13_v12  ;;  %v18_v24 = vld [vmem:[%s7084_s0 + $0x30] sm:$0xff] }
   0x7   :  { %7466 = vst [vmem:[#allocation9_spill] sm:$0xff] %v3723_v6  ;;  %v3761_v20 = vmul.f32 %v3733_v10, %v3742_v13  ;;  %v3765_v21 = vmul.f32 %v3746_v15, %v3735_v11  ;;  %v3782_v28 = vadd.f32 1.0, %v19_v19  ;;  %v3784_v29 = vadd.f32 0.70710677, %v19_v19  ;;  %v16_v30 = vld [vmem:[%s7084_s0 + $0x20] sm:$0xff] }
   0x8   :  { %7467 = vst [vmem:[#allocation10_spill] sm:$0xff] %v3725_v7  ;;  %v527_v25 = vmul.f32 %v3731_v9, %v3750_v16  ;;  %v3780_v27 = vmul.f32 %v3767_v22, %v3754_v18 }
   0x9   :  { %7468 = vst [vmem:[#allocation11_spill] sm:$0xff] %v3729_v8  ;;  %v525_v26 = vmul.f32 %v3744_v14, %v3761_v20 }
   0xa   :  { %7469 = vst [vmem:[#allocation12_spill] sm:$0xff] %v3731_v9 }
   0xb   :  { %7470 = vst [vmem:[#allocation13_spill] sm:$0xff] %v3733_v10 }
   0xc   :  { %7471 = vst [vmem:[#allocation14_spill] sm:$0xff] %v3735_v11 }
   0xd   :  { %7472 = vst [vmem:[#allocation15_spill] sm:$0xff] %v3742_v13 }
   0xe   :  { %7473 = vst [vmem:[#allocation16_spill] sm:$0xff] %v3744_v14 }
   0xf   :  { %7474 = vst [vmem:[#allocation17_spill] sm:$0xff] %v3746_v15 }
  0x10   :  { %7475 = vst [vmem:[#allocation18_spill] sm:$0xff] %v3752_v17 }
  0x11   :  { %7476 = vst [vmem:[#allocation19_spill] sm:$0xff] %v3754_v18 }
  0x12   :  { %7477 = vst [vmem:[#allocation20_spill] sm:$0xff] %v3765_v21 }
  0x13   :  { %7478 = vst [vmem:[#allocation21_spill] sm:$0xff] %v3767_v22 }
  0x14   :  { %7479 = vst [vmem:[#allocation22_spill] sm:$0xff] %v3769_v23 }
  0x15   :  { %7480 = vst [vmem:[#allocation23_spill] sm:$0xff] %v3780_v27 }
  0x16   :  { %7481 = vst [vmem:[#allocation24_spill] sm:$0xff] %v3782_v28 }
  0x17   :  { %7482 = vst [vmem:[#allocation25_spill] sm:$0xff] %v3784_v29 }
  0x18   :  { %7 = vsyncpa [#allocation4], 0  ;;  %s3685_s23 = smov 16   ;;  %v3792_v31 = vmul.f32 %v3752_v17, %v3765_v21  ;;  %v3794_v32 = vadd.f32 -0.70710677, %v15_v2  ;;  %v3796_v33 = vadd.f32 1.0, %v18_v24  ;;  %v3803_v35 = vmul.f32 %v3769_v23, %v3780_v27 }
  0x19   :  { %657 = vrot.lane.b32.xlu1 %v527_v25, %s3685_s23  ;;  %v3798_v34 = vadd.f32 0.70710677, %v18_v24  ;;  %653 = vrot.lane.b32.xlu0 %v525_v26, %s3685_s23  ;;  %v3805_v36 = vadd.f32 -0.70710677, %v13_v12  ;;  %v3807_v37 = vadd.f32 6.123234e-17, %v19_v19  ;;  %v3815_v40 = vmul.f32 %v3784_v29, %v3782_v28 }
  0x1a   :  { %7483 = vst [vmem:[#allocation26_spill] sm:$0xff] %v3794_v32  ;;  %v3809_v38 = vadd.f32 1.0, %v16_v30  ;;  %v3811_v39 = vadd.f32 0.70710677, %v16_v30  ;;  %v3821_v42 = vadd.f32 6.123234e-17, %v18_v24  ;;  %v528_v44 = vmul.f32 %v3794_v32, %v3792_v31 }
  0x1b   :  { %7484 = vst [vmem:[#allocation27_spill] sm:$0xff] %v3796_v33  ;;  %v3819_v41 = vmul.f32 %v3798_v34, %v3796_v33  ;;  %v3823_v43 = vadd.f32 6.123234e-17, %v16_v30  ;;  %v3831_v46 = vadd.f32 -0.70710677, %v16_v30  ;;  %v22_v47 = vld [vmem:[%s7084_s0 + $0x50] sm:$0xff]  ;;  %v526_v49 = vmul.f32 %v3805_v36, %v3803_v35 }
  0x1c   :  { %7485 = vst [vmem:[#allocation28_spill] sm:$0xff] %v3798_v34  ;;  %v3829_v45 = vmul.f32 %v3811_v39, %v3809_v38  ;;  %v17_v48 = vld [vmem:[%s7084_s0 + $0x28] sm:$0xff]  ;;  %v3841_v50 = vadd.f32 -0.70710677, %v19_v19  ;;  %v3843_v51 = vadd.f32 -0.70710677, %v18_v24  ;;  %v3854_v54 = vmul.f32 %v3807_v37, %v3815_v40 }
  0x1d   :  { %7486 = vst [vmem:[#allocation29_spill] sm:$0xff] %v3805_v36  ;;  %v21_v53 = vld [vmem:[%s7084_s0 + $0x48] sm:$0xff]  ;;  %v3858_v55 = vmul.f32 %v3821_v42, %v3819_v41  ;;  %v3860_v56 = vadd.f32 1.0, %v22_v47  ;;  %v3862_v57 = vadd.f32 1.0, %v17_v48  ;;  %v3867_v59 = vadd.f32 0.70710677, %v22_v47 }
  0x1e   :  { %7487 = vst [vmem:[#allocation30_spill] sm:$0xff] %v3807_v37  ;;  %v3847_v52 = vmul.f32 %v3823_v43, %v3829_v45  ;;  %v3869_v60 = vadd.f32 0.70710677, %v17_v48  ;;  %v3871_v61 = vadd.f32 6.123234e-17, %v17_v48  ;;  %v3874_v62 = vadd.f32 1.0, %v21_v53 }
  0x1f   :  { %7488 = vst [vmem:[#allocation31_spill] sm:$0xff] %v3809_v38  ;;  %v3876_v63 = vadd.f32 0.70710677, %v21_v53  ;;  %v3883_v1 = vadd.f32 -0.70710677, %v17_v48  ;;  %v20_v2 = vld [vmem:[%s7084_s0 + $0x40] sm:$0xff]  ;;  %v532_v12 = vmul.f32 %v3841_v50, %v3854_v54  ;;  %v531_v19 = vmul.f32 %v3843_v51, %v3858_v55 }
  0x20   :  { %7489 = vst [vmem:[#allocation32_spill] sm:$0xff] %v3811_v39  ;;  %v529_v58 = vmul.f32 %v3831_v46, %v3847_v52  ;;  %v3881_v0 = vmul.f32 %v3869_v60, %v3862_v57  ;;  %v3894_v24 = vmul.f32 %v3867_v59, %v3860_v56  ;;  %v3896_v25 = vadd.f32 6.123234e-17, %v22_v47  ;;  %v25_v48 = vld [vmem:[%s7084_s0 + $0x68] sm:$0xff]  ;;  %v24_v29 = vld [vmem:[%s7084_s0 + $0x60] sm:$0xff]  ;;  %v47_v5 = vld [vmem:[%s7084_s0 + $0x118] sm:$0xff] }
  0x21   :  { %7490 = vst [vmem:[#allocation33_spill] sm:$0xff] %v3815_v40  ;;  %659 = vrot.lane.b32.xlu1 %v528_v44, %s3685_s23  ;;  %655 = vrot.lane.b32.xlu0 %v526_v49, %s3685_s23  ;;  %v3904_v30 = vmul.f32 %v3876_v63, %v3874_v62  ;;  %v3906_v44 = vadd.f32 6.123234e-17, %v21_v53  ;;  %v3911_v49 = vadd.f32 1.0, %v20_v2  ;;  %v3920_v34 = vadd.f32 6.123234e-17, %v20_v2 }
  0x22   :  { %7491 = vst [vmem:[#allocation34_spill] sm:$0xff] %v3819_v41  ;;  %661 = vrot.lane.b32.xlu2 %v529_v58, %s3685_s23  ;;  %v3900_v26 = vmul.f32 %v3871_v61, %v3881_v0  ;;  %v3913_v58 = vadd.f32 0.70710677, %v20_v2  ;;  %v3932_v39 = vmul.f32 %v3896_v25, %v3894_v24  ;;  %v3934_v4 = vadd.f32 -0.70710677, %v22_v47  ;;  %v28_v28 = vld [vmem:[%s7084_s0 + $0x80] sm:$0xff] }
  0x23   :  { %7492 = vst [vmem:[#allocation35_spill] sm:$0xff] %v3821_v42  ;;  %v3936_v15 = vadd.f32 1.0, %v25_v48  ;;  %v3945_v22 = vadd.f32 -0.70710677, %v21_v53  ;;  %v3947_v7 = vadd.f32 1.0, %v24_v29  ;;  %v4002_v37 = vadd.f32 1.0, %v28_v28 }
  0x24   :  { %7493 = vst [vmem:[#allocation36_spill] sm:$0xff] %v3823_v43  ;;  %v535_v53 = vmul.f32 %v3934_v4, %v3932_v39  ;;  %vm76_vm0 = vcmask 1047968   ;;  %v4486_v32 = vadd.f32 1.0, %v47_v5  ;;  %v4488_v8 = vadd.f32 0.70710677, %v47_v5  ;;  %s3687_s4 = smov 108  }
  0x25   :  { %7494 = vst [vmem:[#allocation37_spill] sm:$0xff] %v3829_v45  ;;  %v7301_v13 = vmov 0.0   ;;  %vm845_vm1 = vcmask 425088   ;;  %vm1294_vm2 = vcmask 1048416   ;;  %vm1296_vm3 = vcmask 130048   ;;  %s3688_s24 = smov 72  }
  0x26   :  { %7495 = vst [vmem:[#allocation38_spill] sm:$0xff] %v3831_v46  ;;  %s3689_s27 = smov 36   ;;  %vm1808_vm4 = vcmask 884288   ;;  %vm2257_vm5 = vcmask 589088   ;;  %vm2386_vm6 = vcmask 293888   ;;  %s3179_s17 = sshll.u32 %s7086_s2, 4  ;;  %s3180_s17 = int_to_ptr.hbm [resolvable:$true] %s3179_s17 }
  0x27   :  { %7496 = vst [vmem:[#allocation39_spill] sm:$0xff] %v3841_v50  ;;  %s3691_s18 = smov 128   ;;  %s3692_s19 = smov 8  }
  0x28   :  { %7497 = vst [vmem:[#allocation40_spill] sm:$0xff] %v3843_v51 }
  0x29   :  { %7498 = vst [vmem:[#allocation41_spill] sm:$0xff] %v3860_v56  ;;  %667 = vrot.lane.b32.xlu1 %v532_v12, %s3685_s23  ;;  %v3938_v56 = vadd.f32 0.70710677, %v25_v48  ;;  %665 = vrot.lane.b32.xlu0 %v531_v19, %s3685_s23  ;;  %v3949_v12 = vadd.f32 0.70710677, %v24_v29 }
  0x2a   :  { %7499 = vst [vmem:[#allocation42_spill] sm:$0xff] %v3862_v57 }
  0x2b   :  { %7500 = vst [vmem:[#allocation43_spill] sm:$0xff] %v3867_v59  ;;  %v530_v59 = vmul.f32 %v3883_v1, %v3900_v26 }
  0x2c   :  { %7501 = vst [vmem:[#allocation44_spill] sm:$0xff] %v3869_v60  ;;  %v23_v60 = vld [vmem:[%s7084_s0 + $0x58] sm:$0xff] }
  0x2d   :  { %7502 = vst [vmem:[#allocation45_spill] sm:$0xff] %v3871_v61  ;;  %663 = vrot.lane.b32.xlu2 %v530_v59, %s3685_s23  ;;  %v3960_v19 = vadd.f32 0.70710677, %v23_v60 }
  0x2e   :  { %7503 = vst [vmem:[#allocation46_spill] sm:$0xff] %v3874_v62  ;;  %v3976_v62 = vadd.f32 6.123234e-17, %v24_v29 }
  0x2f   :  { %7504 = vst [vmem:[#allocation47_spill] sm:$0xff] %v3876_v63  ;;  %v3924_v63 = vmul.f32 %v3913_v58, %v3911_v49 }
  0x30   :  { %7505 = vst [vmem:[#allocation48_spill] sm:$0xff] %v3881_v0 }
  0x31   :  { %7506 = vst [vmem:[#allocation49_spill] sm:$0xff] %v3883_v1  ;;  %v3954_v47 = vmul.f32 %v3920_v34, %v3924_v63  ;;  %673 = vrot.lane.b32.xlu1 %v535_v53, %s3685_s23 }
  0x32   :  { %7507 = vst [vmem:[#allocation50_spill] sm:$0xff] %v3894_v24  ;;  %v3958_v24 = vadd.f32 1.0, %v23_v60 }
  0x33   :  { %7508 = vst [vmem:[#allocation51_spill] sm:$0xff] %v3896_v25  ;;  %v3956_v25 = vadd.f32 -0.70710677, %v20_v2  ;;  %v3974_v2 = vmul.f32 %v3949_v12, %v3947_v7 }
  0x34   :  { %7509 = vst [vmem:[#allocation52_spill] sm:$0xff] %v3904_v30 }
  0x35   :  { %7510 = vst [vmem:[#allocation53_spill] sm:$0xff] %v3906_v44 }
  0x36   :  { %7511 = vst [vmem:[#allocation54_spill] sm:$0xff] %v3911_v49  ;;  %v3968_v49 = vadd.f32 6.123234e-17, %v25_v48 }
  0x37   :  { %7512 = vst [vmem:[#allocation55_spill] sm:$0xff] %v3913_v58  ;;  %v3943_v58 = vmul.f32 %v3906_v44, %v3904_v30  ;;  %v3966_v30 = vmul.f32 %v3938_v56, %v3936_v15  ;;  %v4000_v44 = vadd.f32 -0.70710677, %v25_v48 }
  0x38   :  { %7513 = vst [vmem:[#allocation56_spill] sm:$0xff] %v3920_v34  ;;  %v3990_v34 = vadd.f32 6.123234e-17, %v23_v60 }
  0x39   :  { %7514 = vst [vmem:[#allocation57_spill] sm:$0xff] %v3924_v63  ;;  %v534_v59 = vmul.f32 %v3945_v22, %v3943_v58  ;;  %v4004_v63 = vadd.f32 0.70710677, %v28_v28 }
  0x3a   :  { %7515 = vst [vmem:[#allocation58_spill] sm:$0xff] %v3934_v4  ;;  %v533_v4 = vmul.f32 %v3956_v25, %v3954_v47 }
  0x3b   :  { %7516 = vst [vmem:[#allocation59_spill] sm:$0xff] %v3936_v15  ;;  %v3988_v15 = vmul.f32 %v3960_v19, %v3958_v24  ;;  %671 = vrot.lane.b32.xlu0 %v534_v59, %s3685_s23 }
  0x3c   :  { %7517 = vst [vmem:[#allocation60_spill] sm:$0xff] %v3938_v56  ;;  %v27_v56 = vld [vmem:[%s7084_s0 + $0x78] sm:$0xff]  ;;  %669 = vrot.lane.b32.xlu2 %v533_v4, %s3685_s23 }
  0x3d   :  { %7518 = vst [vmem:[#allocation61_spill] sm:$0xff] %v3945_v22  ;;  %v4013_v22 = vadd.f32 1.0, %v27_v56  ;;  %v4015_v53 = vadd.f32 0.70710677, %v27_v56  ;;  %v4020_v48 = vmul.f32 %v3990_v34, %v3988_v15 }
  0x3e   :  { %7519 = vst [vmem:[#allocation62_spill] sm:$0xff] %v3947_v7  ;;  %v3998_v7 = vmul.f32 %v3968_v49, %v3966_v30 }
  0x3f   :  { %7520 = vst [vmem:[#allocation63_spill] sm:$0xff] %v3949_v12  ;;  %v26_v12 = vld [vmem:[%s7084_s0 + $0x70] sm:$0xff] }
  0x40   :  { %7521 = vst [vmem:[#allocation64_spill] sm:$0xff] %v3956_v25  ;;  %v4026_v59 = vadd.f32 0.70710677, %v26_v12 }
  0x41   :  { %7522 = vst [vmem:[#allocation65_spill] sm:$0xff] %v3958_v24  ;;  %v4011_v24 = vadd.f32 -0.70710677, %v24_v29  ;;  %v538_v29 = vmul.f32 %v4000_v44, %v3998_v7 }
  0x42   :  { %7523 = vst [vmem:[#allocation66_spill] sm:$0xff] %v3960_v19  ;;  %v4009_v19 = vmul.f32 %v3976_v62, %v3974_v2 }
  0x43   :  { %7524 = vst [vmem:[#allocation67_spill] sm:$0xff] %v3966_v30  ;;  %v4024_v30 = vadd.f32 1.0, %v26_v12  ;;  %679 = vrot.lane.b32.xlu1 %v538_v29, %s3685_s23 }
  0x44   :  { %7525 = vst [vmem:[#allocation68_spill] sm:$0xff] %v3968_v49  ;;  %v4022_v49 = vadd.f32 -0.70710677, %v23_v60  ;;  %v537_v4 = vmul.f32 %v4011_v24, %v4009_v19  ;;  %v4040_v60 = vmul.f32 %v4015_v53, %v4013_v22 }
  0x45   :  { %7526 = vst [vmem:[#allocation69_spill] sm:$0xff] %v3974_v2  ;;  %v4032_v2 = vmul.f32 %v4004_v63, %v4002_v37 }
  0x46   :  { %7527 = vst [vmem:[#allocation70_spill] sm:$0xff] %v3976_v62  ;;  %v4034_v62 = vadd.f32 6.123234e-17, %v28_v28  ;;  %677 = vrot.lane.b32.xlu0 %v537_v4, %s3685_s23 }
  0x47   :  { %7528 = vst [vmem:[#allocation71_spill] sm:$0xff] %v3988_v15  ;;  %v31_v15 = vld [vmem:[%s7084_s0 + $0x98] sm:$0xff] }
  0x48   :  { %7529 = vst [vmem:[#allocation72_spill] sm:$0xff] %v3990_v34  ;;  %v4042_v34 = vadd.f32 6.123234e-17, %v27_v56  ;;  %v4068_v41 = vadd.f32 1.0, %v31_v15  ;;  %v4070_v25 = vadd.f32 0.70710677, %v31_v15 }
  0x49   :  { %7530 = vst [vmem:[#allocation73_spill] sm:$0xff] %v4000_v44  ;;  %v536_v44 = vmul.f32 %v4022_v49, %v4020_v48 }
  0x4a   :  { %7531 = vst [vmem:[#allocation74_spill] sm:$0xff] %v4002_v37  ;;  %v4054_v37 = vmul.f32 %v4026_v59, %v4024_v30 }
  0x4b   :  { %7532 = vst [vmem:[#allocation75_spill] sm:$0xff] %v4004_v63  ;;  %v30_v63 = vld [vmem:[%s7084_s0 + $0x90] sm:$0xff]  ;;  %675 = vrot.lane.b32.xlu2 %v536_v44, %s3685_s23 }
  0x4c   :  { %7533 = vst [vmem:[#allocation76_spill] sm:$0xff] %v4011_v24  ;;  %v4056_v24 = vadd.f32 6.123234e-17, %v26_v12  ;;  %v4079_v40 = vadd.f32 1.0, %v30_v63  ;;  %v4081_v29 = vadd.f32 0.70710677, %v30_v63 }
  0x4d   :  { %7534 = vst [vmem:[#allocation77_spill] sm:$0xff] %v4013_v22  ;;  %v4064_v22 = vmul.f32 %v4034_v62, %v4032_v2 }
  0x4e   :  { %7535 = vst [vmem:[#allocation78_spill] sm:$0xff] %v4015_v53  ;;  %v29_v53 = vld [vmem:[%s7084_s0 + $0x88] sm:$0xff] }
  0x4f   :  { %7536 = vst [vmem:[#allocation79_spill] sm:$0xff] %v4022_v49  ;;  %v4066_v49 = vadd.f32 -0.70710677, %v28_v28  ;;  %v4086_v28 = vmul.f32 %v4056_v24, %v4054_v37  ;;  %v4092_v4 = vadd.f32 0.70710677, %v29_v53 }
  0x50   :  { %7537 = vst [vmem:[#allocation80_spill] sm:$0xff] %v4024_v30  ;;  %v4077_v30 = vadd.f32 -0.70710677, %v27_v56 }
  0x51   :  { %7538 = vst [vmem:[#allocation81_spill] sm:$0xff] %v4026_v59  ;;  %v4075_v59 = vmul.f32 %v4042_v34, %v4040_v60  ;;  %v541_v56 = vmul.f32 %v4066_v49, %v4064_v22 }
  0x52   :  { %7539 = vst [vmem:[#allocation82_spill] sm:$0xff] %v4032_v2  ;;  %v4088_v2 = vadd.f32 -0.70710677, %v26_v12  ;;  %v4106_v12 = vmul.f32 %v4081_v29, %v4079_v40 }
  0x53   :  { %7540 = vst [vmem:[#allocation83_spill] sm:$0xff] %v4034_v62  ;;  %v4090_v62 = vadd.f32 1.0, %v29_v53  ;;  %v540_v44 = vmul.f32 %v4077_v30, %v4075_v59  ;;  %685 = vrot.lane.b32.xlu1 %v541_v56, %s3685_s23 }
  0x54   :  { %7541 = vst [vmem:[#allocation84_spill] sm:$0xff] %v4040_v60  ;;  %v4098_v60 = vmul.f32 %v4070_v25, %v4068_v41 }
  0x55   :  { %7542 = vst [vmem:[#allocation85_spill] sm:$0xff] %v4042_v34  ;;  %v4100_v34 = vadd.f32 6.123234e-17, %v31_v15  ;;  %683 = vrot.lane.b32.xlu0 %v540_v44, %s3685_s23 }
  0x56   :  { %7543 = vst [vmem:[#allocation86_spill] sm:$0xff] %v4054_v37  ;;  %v34_v37 = vld [vmem:[%s7084_s0 + $0xb0] sm:$0xff] }
  0x57   :  { %7544 = vst [vmem:[#allocation87_spill] sm:$0xff] %v4056_v24  ;;  %v4108_v24 = vadd.f32 6.123234e-17, %v30_v63  ;;  %v4134_v33 = vadd.f32 1.0, %v34_v37  ;;  %v4136_v38 = vadd.f32 0.70710677, %v34_v37 }
  0x58   :  { %7545 = vst [vmem:[#allocation88_spill] sm:$0xff] %v4066_v49  ;;  %v539_v49 = vmul.f32 %v4088_v2, %v4086_v28 }
  0x59   :  { %7546 = vst [vmem:[#allocation89_spill] sm:$0xff] %v4068_v41  ;;  %v4120_v41 = vmul.f32 %v4092_v4, %v4090_v62 }
  0x5a   :  { %7547 = vst [vmem:[#allocation90_spill] sm:$0xff] %v4070_v25  ;;  %v33_v25 = vld [vmem:[%s7084_s0 + $0xa8] sm:$0xff]  ;;  %681 = vrot.lane.b32.xlu2 %v539_v49, %s3685_s23 }
  0x5b   :  { %7548 = vst [vmem:[#allocation91_spill] sm:$0xff] %v4077_v30  ;;  %v4122_v30 = vadd.f32 6.123234e-17, %v29_v53  ;;  %v4145_v50 = vadd.f32 1.0, %v33_v25  ;;  %v4147_v56 = vadd.f32 0.70710677, %v33_v25 }
  0x5c   :  { %7549 = vst [vmem:[#allocation92_spill] sm:$0xff] %v4079_v40  ;;  %v4130_v40 = vmul.f32 %v4100_v34, %v4098_v60 }
  0x5d   :  { %7550 = vst [vmem:[#allocation93_spill] sm:$0xff] %v4081_v29  ;;  %v32_v29 = vld [vmem:[%s7084_s0 + $0xa0] sm:$0xff] }
  0x5e   :  { %7551 = vst [vmem:[#allocation94_spill] sm:$0xff] %v4088_v2  ;;  %v4132_v2 = vadd.f32 -0.70710677, %v31_v15  ;;  %v4152_v15 = vmul.f32 %v4122_v30, %v4120_v41  ;;  %v4158_v44 = vadd.f32 0.70710677, %v32_v29 }
  0x5f   :  { %7552 = vst [vmem:[#allocation95_spill] sm:$0xff] %v4090_v62  ;;  %v4143_v62 = vadd.f32 -0.70710677, %v30_v63 }
  0x60   :  { %7553 = vst [vmem:[#allocation96_spill] sm:$0xff] %v4092_v4  ;;  %v4141_v4 = vmul.f32 %v4108_v24, %v4106_v12  ;;  %v544_v63 = vmul.f32 %v4132_v2, %v4130_v40 }
  0x61   :  { %7554 = vst [vmem:[#allocation97_spill] sm:$0xff] %v4098_v60  ;;  %v4156_v60 = vadd.f32 1.0, %v32_v29 }
  0x62   :  { %7555 = vst [vmem:[#allocation98_spill] sm:$0xff] %v4100_v34  ;;  %v4154_v34 = vadd.f32 -0.70710677, %v29_v53  ;;  %v543_v49 = vmul.f32 %v4143_v62, %v4141_v4  ;;  %v4172_v53 = vmul.f32 %v4147_v56, %v4145_v50  ;;  %691 = vrot.lane.b32.xlu1 %v544_v63, %s3685_s23 }
  0x63   :  { %7556 = vst [vmem:[#allocation99_spill] sm:$0xff] %v4106_v12  ;;  %v4166_v12 = vadd.f32 6.123234e-17, %v34_v37 }
  0x64   :  { %7557 = vst [vmem:[#allocation100_spill] sm:$0xff] %v4108_v24  ;;  %v4164_v24 = vmul.f32 %v4136_v38, %v4134_v33  ;;  %689 = vrot.lane.b32.xlu0 %v543_v49, %s3685_s23 }
  0x65   :  { %7558 = vst [vmem:[#allocation101_spill] sm:$0xff] %v4120_v41  ;;  %v37_v41 = vld [vmem:[%s7084_s0 + $0xc8] sm:$0xff] }
  0x66   :  { %7559 = vst [vmem:[#allocation102_spill] sm:$0xff] %v4122_v30  ;;  %v4174_v30 = vadd.f32 6.123234e-17, %v33_v25  ;;  %v4200_v42 = vadd.f32 1.0, %v37_v41  ;;  %v4202_v43 = vadd.f32 0.70710677, %v37_v41 }
  0x67   :  { %7560 = vst [vmem:[#allocation103_spill] sm:$0xff] %v4132_v2  ;;  %v542_v2 = vmul.f32 %v4154_v34, %v4152_v15 }
  0x68   :  { %7561 = vst [vmem:[#allocation104_spill] sm:$0xff] %v4134_v33  ;;  %v4186_v33 = vmul.f32 %v4158_v44, %v4156_v60 }
  0x69   :  { %7562 = vst [vmem:[#allocation105_spill] sm:$0xff] %v4136_v38  ;;  %v36_v38 = vld [vmem:[%s7084_s0 + $0xc0] sm:$0xff]  ;;  %687 = vrot.lane.b32.xlu2 %v542_v2, %s3685_s23 }
  0x6a   :  { %7563 = vst [vmem:[#allocation106_spill] sm:$0xff] %v4143_v62  ;;  %v4188_v62 = vadd.f32 6.123234e-17, %v32_v29  ;;  %v4211_v51 = vadd.f32 1.0, %v36_v38  ;;  %v4213_v63 = vadd.f32 0.70710677, %v36_v38 }
  0x6b   :  { %7564 = vst [vmem:[#allocation107_spill] sm:$0xff] %v4145_v50  ;;  %v4196_v50 = vmul.f32 %v4166_v12, %v4164_v24 }
  0x6c   :  { %7565 = vst [vmem:[#allocation108_spill] sm:$0xff] %v4147_v56  ;;  %v35_v56 = vld [vmem:[%s7084_s0 + $0xb8] sm:$0xff] }
  0x6d   :  { %7566 = vst [vmem:[#allocation109_spill] sm:$0xff] %v4154_v34  ;;  %v4198_v34 = vadd.f32 -0.70710677, %v34_v37  ;;  %v4218_v37 = vmul.f32 %v4188_v62, %v4186_v33  ;;  %v4224_v49 = vadd.f32 0.70710677, %v35_v56 }
  0x6e   :  { %7567 = vst [vmem:[#allocation110_spill] sm:$0xff] %v4156_v60  ;;  %v4209_v60 = vadd.f32 -0.70710677, %v33_v25 }
  0x6f   :  { %7568 = vst [vmem:[#allocation111_spill] sm:$0xff] %v4158_v44  ;;  %v4207_v44 = vmul.f32 %v4174_v30, %v4172_v53  ;;  %v547_v25 = vmul.f32 %v4198_v34, %v4196_v50 }
  0x70   :  { %7569 = vst [vmem:[#allocation112_spill] sm:$0xff] %v4164_v24  ;;  %v4220_v24 = vadd.f32 -0.70710677, %v32_v29  ;;  %v4238_v29 = vmul.f32 %v4213_v63, %v4211_v51 }
  0x71   :  { %7570 = vst [vmem:[#allocation113_spill] sm:$0xff] %v4166_v12  ;;  %v4222_v12 = vadd.f32 1.0, %v35_v56  ;;  %v546_v2 = vmul.f32 %v4209_v60, %v4207_v44  ;;  %697 = vrot.lane.b32.xlu1 %v547_v25, %s3685_s23 }
  0x72   :  { %7571 = vst [vmem:[#allocation114_spill] sm:$0xff] %v4172_v53  ;;  %v4230_v53 = vmul.f32 %v4202_v43, %v4200_v42 }
  0x73   :  { %7572 = vst [vmem:[#allocation115_spill] sm:$0xff] %v4174_v30  ;;  %v4232_v30 = vadd.f32 6.123234e-17, %v37_v41  ;;  %695 = vrot.lane.b32.xlu0 %v546_v2, %s3685_s23 }
  0x74   :  { %7573 = vst [vmem:[#allocation116_spill] sm:$0xff] %v4186_v33  ;;  %v40_v33 = vld [vmem:[%s7084_s0 + $0xe0] sm:$0xff] }
  0x75   :  { %7574 = vst [vmem:[#allocation117_spill] sm:$0xff] %v4188_v62  ;;  %v4240_v62 = vadd.f32 6.123234e-17, %v36_v38  ;;  %v4266_v57 = vadd.f32 1.0, %v40_v33  ;;  %v4268_v61 = vadd.f32 0.70710677, %v40_v33 }
  0x76   :  { %7575 = vst [vmem:[#allocation118_spill] sm:$0xff] %v4198_v34  ;;  %v545_v34 = vmul.f32 %v4220_v24, %v4218_v37 }
  0x77   :  { %7576 = vst [vmem:[#allocation119_spill] sm:$0xff] %v4200_v42  ;;  %v4252_v42 = vmul.f32 %v4224_v49, %v4222_v12 }
  0x78   :  { %7577 = vst [vmem:[#allocation120_spill] sm:$0xff] %v4202_v43  ;;  %v39_v43 = vld [vmem:[%s7084_s0 + $0xd8] sm:$0xff]  ;;  %693 = vrot.lane.b32.xlu2 %v545_v34, %s3685_s23 }
  0x79   :  { %7578 = vst [vmem:[#allocation121_spill] sm:$0xff] %v4209_v60  ;;  %v4254_v60 = vadd.f32 6.123234e-17, %v35_v56  ;;  %v4277_v45 = vadd.f32 1.0, %v39_v43  ;;  %v4279_v25 = vadd.f32 0.70710677, %v39_v43 }
  0x7a   :  { %7579 = vst [vmem:[#allocation122_spill] sm:$0xff] %v4211_v51  ;;  %v4262_v51 = vmul.f32 %v4232_v30, %v4230_v53  ;;  %v43_v34 = vld [vmem:[%s7084_s0 + $0xf8] sm:$0xff] }
  0x7b   :  { %7580 = vst [vmem:[#allocation123_spill] sm:$0xff] %v4213_v63  ;;  %v38_v63 = vld [vmem:[%s7084_s0 + $0xd0] sm:$0xff]  ;;  %v4324_v21 = vadd.f32 0.70710677, %v43_v34 }
  0x7c   :  { %7581 = vst [vmem:[#allocation124_spill] sm:$0xff] %v4220_v24  ;;  %v4264_v24 = vadd.f32 -0.70710677, %v37_v41  ;;  %v4284_v41 = vmul.f32 %v4254_v60, %v4252_v42  ;;  %v4290_v2 = vadd.f32 0.70710677, %v38_v63 }
  0x7d   :  { %7582 = vst [vmem:[#allocation125_spill] sm:$0xff] %v4222_v12  ;;  %v4275_v12 = vadd.f32 -0.70710677, %v36_v38  ;;  %v4320_v0 = vadd.f32 6.123234e-17, %v38_v63 }
  0x7e   :  { %7583 = vst [vmem:[#allocation126_spill] sm:$0xff] %v4224_v49  ;;  %v4273_v49 = vmul.f32 %v4240_v62, %v4238_v29  ;;  %v550_v38 = vmul.f32 %v4264_v24, %v4262_v51 }
  0x7f   :  { %7584 = vst [vmem:[#allocation127_spill] sm:$0xff] %v4230_v53  ;;  %v4288_v53 = vadd.f32 1.0, %v38_v63 }
  0x80   :  { %7585 = vst [vmem:[#allocation128_spill] sm:$0xff] %v4232_v30  ;;  %v4286_v30 = vadd.f32 -0.70710677, %v35_v56  ;;  %v549_v56 = vmul.f32 %v4275_v12, %v4273_v49  ;;  %703 = vrot.lane.b32.xlu1 %v550_v38, %s3685_s23 }
  0x81   :  { %7586 = vst [vmem:[#allocation129_spill] sm:$0xff] %v4238_v29  ;;  %v4298_v29 = vadd.f32 6.123234e-17, %v40_v33 }
  0x82   :  { %7587 = vst [vmem:[#allocation130_spill] sm:$0xff] %v4240_v62  ;;  %v4296_v62 = vmul.f32 %v4268_v61, %v4266_v57  ;;  %701 = vrot.lane.b32.xlu0 %v549_v56, %s3685_s23 }
  0x83   :  { %7588 = vst [vmem:[#allocation131_spill] sm:$0xff] %v4252_v42  ;;  %v4309_v42 = vadd.f32 6.123234e-17, %v39_v43 }
  0x84   :  { %7589 = vst [vmem:[#allocation132_spill] sm:$0xff] %v4254_v60  ;;  %v4307_v60 = vmul.f32 %v4279_v25, %v4277_v45 }
  0x85   :  { %7590 = vst [vmem:[#allocation133_spill] sm:$0xff] %v4264_v24  ;;  %v548_v24 = vmul.f32 %v4286_v30, %v4284_v41 }
  0x86   :  { %7591 = vst [vmem:[#allocation134_spill] sm:$0xff] %v4266_v57  ;;  %v4318_v57 = vmul.f32 %v4290_v2, %v4288_v53 }
  0x87   :  { %7592 = vst [vmem:[#allocation135_spill] sm:$0xff] %v4268_v61  ;;  %v42_v61 = vld [vmem:[%s7084_s0 + $0xf0] sm:$0xff]  ;;  %699 = vrot.lane.b32.xlu2 %v548_v24, %s3685_s23 }
  0x88   :  { %7593 = vst [vmem:[#allocation136_spill] sm:$0xff] %v4275_v12  ;;  %v4322_v12 = vadd.f32 1.0, %v43_v34  ;;  %v4343_v46 = vadd.f32 1.0, %v42_v61  ;;  %v4345_v1 = vadd.f32 0.70710677, %v42_v61  ;;  %v4350_v38 = vmul.f32 %v4320_v0, %v4318_v57 }
  0x89   :  { %7594 = vst [vmem:[#allocation137_spill] sm:$0xff] %v4277_v45  ;;  %v4332_v45 = vmul.f32 %v4298_v29, %v4296_v62 }
  0x8a   :  { %7595 = vst [vmem:[#allocation138_spill] sm:$0xff] %v4279_v25  ;;  %v41_v25 = vld [vmem:[%s7084_s0 + $0xe8] sm:$0xff] }
  0x8b   :  { %7596 = vst [vmem:[#allocation139_spill] sm:$0xff] %v4286_v30  ;;  %v4334_v30 = vadd.f32 -0.70710677, %v40_v33  ;;  %v4352_v33 = vadd.f32 -0.70710677, %v38_v63  ;;  %v4370_v63 = vmul.f32 %v4345_v1, %v4343_v46 }
  0x8c   :  { %7597 = vst [vmem:[#allocation140_spill] sm:$0xff] %v4288_v53  ;;  %v4341_v53 = vadd.f32 -0.70710677, %v39_v43  ;;  %v4356_v56 = vadd.f32 0.70710677, %v41_v25  ;;  %v4360_v43 = vmul.f32 %v4324_v21, %v4322_v12 }
  0x8d   :  { %7598 = vst [vmem:[#allocation141_spill] sm:$0xff] %v4290_v2  ;;  %v4339_v2 = vmul.f32 %v4309_v42, %v4307_v60 }
  0x8e   :  { %7599 = vst [vmem:[#allocation142_spill] sm:$0xff] %v4296_v62  ;;  %v4354_v62 = vadd.f32 1.0, %v41_v25 }
  0x8f   :  { %7600 = vst [vmem:[#allocation143_spill] sm:$0xff] %v4298_v29  ;;  %v4362_v29 = vadd.f32 6.123234e-17, %v43_v34  ;;  %v552_v24 = vmul.f32 %v4341_v53, %v4339_v2 }
  0x90   :  { %7601 = vst [vmem:[#allocation144_spill] sm:$0xff] %v4307_v60  ;;  %v553_v60 = vmul.f32 %v4334_v30, %v4332_v45 }
  0x91   :  { %7602 = vst [vmem:[#allocation145_spill] sm:$0xff] %v4309_v42  ;;  %v46_v42 = vld [vmem:[%s7084_s0 + $0x110] sm:$0xff]  ;;  %707 = vrot.lane.b32.xlu0 %v552_v24, %s3685_s23 }
  0x92   :  { %7603 = vst [vmem:[#allocation146_spill] sm:$0xff] %v4318_v57  ;;  %v4386_v57 = vadd.f32 6.123234e-17, %v41_v25  ;;  %709 = vrot.lane.b32.xlu1 %v553_v60, %s3685_s23  ;;  %v4398_v3 = vadd.f32 1.0, %v46_v42 }
  0x93   :  { %7604 = vst [vmem:[#allocation147_spill] sm:$0xff] %v4320_v0  ;;  %v4372_v0 = vadd.f32 6.123234e-17, %v42_v61 }
  0x94   :  { %7605 = vst [vmem:[#allocation148_spill] sm:$0xff] %v4322_v12  ;;  %v551_v12 = vmul.f32 %v4352_v33, %v4350_v38 }
  0x95   :  { %7606 = vst [vmem:[#allocation149_spill] sm:$0xff] %v4324_v21  ;;  %v45_v21 = vld [vmem:[%s7084_s0 + $0x108] sm:$0xff] }
  0x96   :  { %7607 = vst [vmem:[#allocation150_spill] sm:$0xff] %v4332_v45  ;;  %705 = vrot.lane.b32.xlu2 %v551_v12, %s3685_s23 }
  0x97   :  { %7608 = vst [vmem:[#allocation151_spill] sm:$0xff] %v4334_v30  ;;  %v4384_v30 = vmul.f32 %v4356_v56, %v4354_v62 }
  0x98   :  { %7609 = vst [vmem:[#allocation152_spill] sm:$0xff] %v4341_v53  ;;  %v44_v53 = vld [vmem:[%s7084_s0 + $0x100] sm:$0xff] }
  0x99   :  { %7610 = vst [vmem:[#allocation153_spill] sm:$0xff] %v4343_v46  ;;  %v4392_v46 = vadd.f32 -0.70710677, %v43_v34  ;;  %v4409_v34 = vmul.f32 %v4372_v0, %v4370_v63  ;;  %v4416_v60 = vmul.f32 %v4386_v57, %v4384_v30  ;;  %v4420_v11 = vadd.f32 1.0, %v44_v53 }
  0x9a   :  { %7611 = vst [vmem:[#allocation154_spill] sm:$0xff] %v4345_v1  ;;  %v4390_v1 = vmul.f32 %v4362_v29, %v4360_v43  ;;  %v4422_v18 = vadd.f32 0.70710677, %v44_v53 }
  0x9b   :  { %7612 = vst [vmem:[#allocation155_spill] sm:$0xff] %v4352_v33  ;;  %v4400_v33 = vadd.f32 0.70710677, %v46_v42 }
  0x9c   :  { %7613 = vst [vmem:[#allocation156_spill] sm:$0xff] %v4354_v62  ;;  %v4404_v62 = vadd.f32 0.70710677, %v45_v21  ;;  %v556_v24 = vmul.f32 %v4392_v46, %v4390_v1 }
  0x9d   :  { %7614 = vst [vmem:[#allocation157_spill] sm:$0xff] %v4356_v56  ;;  %v4402_v56 = vadd.f32 1.0, %v45_v21 }
  0x9e   :  { %7615 = vst [vmem:[#allocation158_spill] sm:$0xff] %v4360_v43  ;;  %v4418_v43 = vadd.f32 -0.70710677, %v41_v25  ;;  %715 = vrot.lane.b32.xlu1 %v556_v24, %s3685_s23 }
  0x9f   :  { %7616 = vst [vmem:[#allocation159_spill] sm:$0xff] %v4362_v29  ;;  %v4411_v29 = vadd.f32 -0.70710677, %v42_v61  ;;  %v4430_v61 = vadd.f32 6.123234e-17, %v46_v42  ;;  %v4434_v12 = vmul.f32 %v4404_v62, %v4402_v56 }
  0xa0   :  { %7617 = vst [vmem:[#allocation160_spill] sm:$0xff] %v4370_v63  ;;  %v4436_v63 = vadd.f32 6.123234e-17, %v45_v21 }
  0xa1   :  { %7618 = vst [vmem:[#allocation161_spill] sm:$0xff] %v4372_v0  ;;  %v4428_v0 = vmul.f32 %v4400_v33, %v4398_v3  ;;  %v555_v25 = vmul.f32 %v4411_v29, %v4409_v34 }
  0xa2   :  { %7619 = vst [vmem:[#allocation162_spill] sm:$0xff] %v4384_v30  ;;  %v48_v30 = vld [vmem:[%s7084_s0 + $0x120] sm:$0xff] }
  0xa3   :  { %7620 = vst [vmem:[#allocation163_spill] sm:$0xff] %v4386_v57  ;;  %v49_v57 = vld [vmem:[%s7084_s0 + $0x128] sm:$0xff]  ;;  %713 = vrot.lane.b32.xlu0 %v555_v25, %s3685_s23  ;;  %v4477_v23 = vadd.f32 0.70710677, %v48_v30 }
  0xa4   :  { %7621 = vst [vmem:[#allocation164_spill] sm:$0xff] %v4390_v1  ;;  %v4470_v17 = vadd.f32 1.0, %v49_v57  ;;  %v4537_v6 = vadd.f32 -0.70710677, %v49_v57 }
  0xa5   :  { %7622 = vst [vmem:[#allocation165_spill] sm:$0xff] %v4392_v46  ;;  %v554_v46 = vmul.f32 %v4418_v43, %v4416_v60 }
  0xa6   :  { %7623 = vst [vmem:[#allocation166_spill] sm:$0xff] %v4398_v3  ;;  %v4454_v3 = vadd.f32 -0.70710677, %v46_v42  ;;  %v4472_v42 = vadd.f32 0.70710677, %v49_v57 }
  0xa7   :  { %7624 = vst [vmem:[#allocation167_spill] sm:$0xff] %v4400_v33  ;;  %v4450_v33 = vmul.f32 %v4422_v18, %v4420_v11  ;;  %711 = vrot.lane.b32.xlu2 %v554_v46, %s3685_s23 }
  0xa8   :  { %7625 = vst [vmem:[#allocation168_spill] sm:$0xff] %v4402_v56  ;;  %v4498_v25 = vmul.f32 %v4472_v42, %v4470_v17 }
  0xa9   :  { %7626 = vst [vmem:[#allocation169_spill] sm:$0xff] %v4404_v62  ;;  %v4452_v62 = vadd.f32 6.123234e-17, %v44_v53 }
  0xaa   :  { %7627 = vst [vmem:[#allocation170_spill] sm:$0xff] %v4411_v29  ;;  %v4456_v29 = vadd.f32 -0.70710677, %v45_v21  ;;  %v4475_v21 = vadd.f32 1.0, %v48_v30 }
  0xab   :  { %7628 = vst [vmem:[#allocation171_spill] sm:$0xff] %v4418_v43  ;;  %v4464_v43 = vmul.f32 %v4430_v61, %v4428_v0  ;;  %v4482_v24 = vmul.f32 %v4452_v62, %v4450_v33 }
  0xac   :  { %7629 = vst [vmem:[#allocation172_spill] sm:$0xff] %v4420_v11 }
  0xad   :  { %7630 = vst [vmem:[#allocation173_spill] sm:$0xff] %v4422_v18  ;;  %v4468_v18 = vmul.f32 %v4436_v63, %v4434_v12  ;;  %v559_v46 = vmul.f32 %v4454_v3, %v4464_v43 }
  0xae   :  { %7631 = vst [vmem:[#allocation174_spill] sm:$0xff] %v4428_v0  ;;  %v4508_v0 = vmul.f32 %v4477_v23, %v4475_v21 }
  0xaf   :  { %7632 = vst [vmem:[#allocation175_spill] sm:$0xff] %v4430_v61  ;;  %v4484_v61 = vadd.f32 -0.70710677, %v44_v53  ;;  %v4500_v53 = vadd.f32 6.123234e-17, %v49_v57  ;;  %v558_v9 = vmul.f32 %v4456_v29, %v4468_v18  ;;  %721 = vrot.lane.b32.xlu1 %v559_v46, %s3685_s23 }
  0xb0   :  { %7633 = vst [vmem:[#allocation176_spill] sm:$0xff] %v4434_v12  ;;  %v4510_v12 = vadd.f32 6.123234e-17, %v48_v30  ;;  %v4550_v46 = vadd.f32 -0.70710677, %v48_v30 }
  0xb1   :  { %7634 = vst [vmem:[#allocation177_spill] sm:$0xff] %v4436_v63  ;;  %v4535_v27 = vmul.f32 %v4500_v53, %v4498_v25  ;;  %719 = vrot.lane.b32.xlu0 %v558_v9, %s3685_s23  ;;  %v4563_v9 = vadd.f32 -0.70710677, %v47_v5 }
  0xb2   :  { %7635 = vst [vmem:[#allocation178_spill] sm:$0xff] %v4450_v33 }
  0xb3   :  { %7636 = vst [vmem:[#allocation179_spill] sm:$0xff] %v4452_v62  ;;  %v562_v30 = vmul.f32 %v4537_v6, %v4535_v27 }
  0xb4   :  { %7637 = vst [vmem:[#allocation180_spill] sm:$0xff] %v4454_v3  ;;  %v52_v3 = vld [vmem:[%s7084_s0 + $0x140] sm:$0xff] }
  0xb5   :  { %7638 = vst [vmem:[#allocation181_spill] sm:$0xff] %v4456_v29  ;;  %v4539_v36 = vadd.f32 1.0, %v52_v3 }
  0xb6   :  { %7639 = vst [vmem:[#allocation182_spill] sm:$0xff] %v4464_v43  ;;  %v64_v43 = vld [vmem:[%s7084_s0 + $0x1a0] sm:$0xff] }
  0xb7   :  { %7640 = vst [vmem:[#allocation183_spill] sm:$0xff] %v4468_v18  ;;  %727 = vrot.lane.b32.xlu1 %v562_v30, %s3685_s23 }
  0xb8   :  { %7641 = vst [vmem:[#allocation184_spill] sm:$0xff] %v4470_v17  ;;  %v51_v17 = vld [vmem:[%s7084_s0 + $0x138] sm:$0xff] }
  0xb9   :  { %7642 = vst [vmem:[#allocation185_spill] sm:$0xff] %v4472_v42  ;;  %v557_v42 = vmul.f32 %v4484_v61, %v4482_v24  ;;  %v4552_v10 = vadd.f32 1.0, %v51_v17  ;;  %v4619_v30 = vadd.f32 -0.70710677, %v51_v17 }
  0xba   :  { %7643 = vst [vmem:[#allocation186_spill] sm:$0xff] %v4475_v21  ;;  %v4526_v21 = vadd.f32 6.123234e-17, %v47_v5 }
  0xbb   :  { %7644 = vst [vmem:[#allocation187_spill] sm:$0xff] %v4477_v23  ;;  %v4524_v23 = vmul.f32 %v4488_v8, %v4486_v32  ;;  %717 = vrot.lane.b32.xlu2 %v557_v42, %s3685_s23  ;;  %v4575_v42 = vadd.f32 6.123234e-17, %v52_v3 }
  0xbc   :  { %7645 = vst [vmem:[#allocation188_spill] sm:$0xff] %v4482_v24 }
  0xbd   :  { %7646 = vst [vmem:[#allocation189_spill] sm:$0xff] %v4484_v61  ;;  %v4561_v57 = vmul.f32 %v4526_v21, %v4524_v23 }
  0xbe   :  { %7647 = vst [vmem:[#allocation190_spill] sm:$0xff] %v4486_v32  ;;  %v4548_v32 = vmul.f32 %v4510_v12, %v4508_v0 }
  0xbf   :  { %7648 = vst [vmem:[#allocation191_spill] sm:$0xff] %v4488_v8  ;;  %v4541_v8 = vadd.f32 0.70710677, %v52_v3 }
  0xc0   :  { %81 = vst.msk [vmem:[#allocation2 + $0x48] sm:$0xff] %vm76_vm0, %v7301_v13  ;;  %v561_v5 = vmul.f32 %v4550_v46, %v4548_v32 }
  0xc1   :  { %77 = vst.msk [vmem:[#allocation2 + $0x8] sm:$0xff] %vm76_vm0, %v7301_v13 }
  0xc2   :  { %7649 = vst [vmem:[#allocation192_spill] sm:$0xff] %v4498_v25  ;;  %725 = vrot.lane.b32.xlu0 %v561_v5, %s3685_s23 }
  0xc3   :  { %7650 = vst [vmem:[#allocation193_spill] sm:$0xff] %v4500_v53  ;;  %v4554_v53 = vadd.f32 0.70710677, %v51_v17 }
  0xc4   :  { %78 = vst.msk [vmem:[#allocation2 + $0x18] sm:$0xff] %vm76_vm0, %v7301_v13 }
  0xc5   :  { %7651 = vst [vmem:[#allocation194_spill] sm:$0xff] %v4508_v0  ;;  %v4573_v0 = vmul.f32 %v4541_v8, %v4539_v36  ;;  %v4583_v25 = vmul.f32 %v4554_v53, %v4552_v10 }
  0xc6   :  { %7652 = vst [vmem:[#allocation195_spill] sm:$0xff] %v4510_v12  ;;  %v4585_v12 = vadd.f32 6.123234e-17, %v51_v17 }
  0xc7   :  { %79 = vst.msk [vmem:[#allocation2 + $0x28] sm:$0xff] %vm76_vm0, %v7301_v13 }
  0xc8   :  { %7653 = vst [vmem:[#allocation196_spill] sm:$0xff] %v4524_v23  ;;  %v4617_v23 = vmul.f32 %v4585_v12, %v4583_v25 }
  0xc9   :  { %7654 = vst [vmem:[#allocation197_spill] sm:$0xff] %v4526_v21 }
  0xca   :  { %80 = vst.msk [vmem:[#allocation2 + $0x38] sm:$0xff] %vm76_vm0, %v7301_v13 }
  0xcb   :  { %82 = vst.msk [vmem:[#allocation2 + $0x58] sm:$0xff] %vm76_vm0, %v7301_v13 }
  0xcc   :  { %7655 = vst [vmem:[#allocation198_spill] sm:$0xff] %v4535_v27 }
  0xcd   :  { %7656 = vst [vmem:[#allocation199_spill] sm:$0xff] %v4537_v6  ;;  %v55_v6 = vld [vmem:[%s7084_s0 + $0x158] sm:$0xff] }
  0xce   :  { %7657 = vst [vmem:[#allocation200_spill] sm:$0xff] %v4539_v36  ;;  %v54_v36 = vld [vmem:[%s7084_s0 + $0x150] sm:$0xff]  ;;  %v4610_v21 = vadd.f32 0.70710677, %v55_v6  ;;  %v4638_v5 = vadd.f32 6.123234e-17, %v55_v6 }
  0xcf   :  { %7658 = vst [vmem:[#allocation201_spill] sm:$0xff] %v4541_v8  ;;  %v560_v8 = vmul.f32 %v4563_v9, %v4561_v57 }
  0xd0   :  { %83 = vst.msk [vmem:[#allocation2 + $0x68] sm:$0xff] %vm76_vm0, %v7301_v13 }
  0xd1   :  { %7659 = vst [vmem:[#allocation202_spill] sm:$0xff] %v4548_v32  ;;  %723 = vrot.lane.b32.xlu2 %v560_v8, %s3685_s23  ;;  %v564_v8 = vmul.f32 %v4619_v30, %v4617_v23 }
  0xd2   :  { %7660 = vst [vmem:[#allocation203_spill] sm:$0xff] %v4550_v46  ;;  %v4608_v46 = vadd.f32 1.0, %v55_v6 }
  0xd3   :  { %7661 = vst [vmem:[#allocation204_spill] sm:$0xff] %v4552_v10  ;;  %v4606_v10 = vadd.f32 -0.70710677, %v52_v3  ;;  %731 = vrot.lane.b32.xlu0 %v564_v8, %s3685_s23  ;;  %v58_v8 = vld [vmem:[%s7084_s0 + $0x170] sm:$0xff] }
  0xd4   :  { %7662 = vst [vmem:[#allocation205_spill] sm:$0xff] %v4554_v53  ;;  %v4604_v53 = vmul.f32 %v4575_v42, %v4573_v0  ;;  %v4636_v17 = vmul.f32 %v4610_v21, %v4608_v46  ;;  %v4735_v11 = vadd.f32 6.123234e-17, %v58_v8 }
  0xd5   :  { %84 = vst.msk [vmem:[#allocation2 + $0x78] sm:$0xff] %vm76_vm0, %v7301_v13 }
  0xd6   :  { %7663 = vst [vmem:[#allocation206_spill] sm:$0xff] %v4561_v57  ;;  %v565_v3 = vmul.f32 %v4606_v10, %v4604_v53 }
  0xd7   :  { %7664 = vst [vmem:[#allocation207_spill] sm:$0xff] %v4563_v9  ;;  %v4621_v9 = vadd.f32 1.0, %v54_v36 }
  0xd8   :  { %85 = vst.msk [vmem:[#allocation2 + $0x88] sm:$0xff] %vm76_vm0, %v7301_v13  ;;  %733 = vrot.lane.b32.xlu1 %v565_v3, %s3685_s23 }
  0xd9   :  { %86 = vst.msk [vmem:[#allocation2 + $0x98] sm:$0xff] %vm76_vm0, %v7301_v13 }
  0xda   :  { %7665 = vst [vmem:[#allocation208_spill] sm:$0xff] %v4573_v0  ;;  %v662_v0 = vpop.permute.xlu2 %661 }
  0xdb   :  { %7666 = vst [vmem:[#allocation209_spill] sm:$0xff] %v4575_v42  ;;  %v4623_v42 = vadd.f32 0.70710677, %v54_v36 }
  0xdc   :  { %87 = vst.msk [vmem:[#allocation2 + $0xa8] sm:$0xff] %vm76_vm0, %v7301_v13 }
  0xdd   :  { %7667 = vst [vmem:[#allocation210_spill] sm:$0xff] %v4583_v25  ;;  %v4646_v25 = vmul.f32 %v4623_v42, %v4621_v9 }
  0xde   :  { %7668 = vst [vmem:[#allocation211_spill] sm:$0xff] %v4585_v12  ;;  %v4648_v12 = vadd.f32 6.123234e-17, %v54_v36 }
  0xdf   :  { %88 = vst.msk [vmem:[#allocation2 + $0xb8] sm:$0xff] %vm76_vm0, %v7301_v13 }
  0xe0   :  { %89 = vst.msk [vmem:[#allocation2 + $0xc8] sm:$0xff] %vm76_vm0, %v7301_v13 }
  0xe1   :  { %90 = vst.msk [vmem:[#allocation2 + $0xd8] sm:$0xff] %vm76_vm0, %v7301_v13 }
  0xe2   :  { %7669 = vst [vmem:[#allocation212_spill] sm:$0xff] %v4604_v53 }
  0xe3   :  { %7670 = vst [vmem:[#allocation213_spill] sm:$0xff] %v4606_v10 }
  0xe4   :  { %7671 = vst [vmem:[#allocation214_spill] sm:$0xff] %v4608_v46  ;;  %v4660_v46 = vadd.f32 -0.70710677, %v55_v6 }
  0xe5   :  { %7672 = vst [vmem:[#allocation215_spill] sm:$0xff] %v4610_v21  ;;  %v4658_v21 = vmul.f32 %v4638_v5, %v4636_v17 }
  0xe6   :  { %91 = vst.msk [vmem:[#allocation2 + $0xe8] sm:$0xff] %vm76_vm0, %v7301_v13 }
  0xe7   :  { %7673 = vst [vmem:[#allocation216_spill] sm:$0xff] %v4617_v23  ;;  %v568_v6 = vmul.f32 %v4660_v46, %v4658_v21 }
  0xe8   :  { %7674 = vst [vmem:[#allocation217_spill] sm:$0xff] %v4619_v30 }
  0xe9   :  { %7675 = vst [vmem:[#allocation218_spill] sm:$0xff] %v4621_v9  ;;  %739 = vrot.lane.b32.xlu1 %v568_v6, %s3685_s23 }
  0xea   :  { %7676 = vst [vmem:[#allocation219_spill] sm:$0xff] %v4623_v42  ;;  %v4669_v42 = vadd.f32 -0.70710677, %v54_v36  ;;  %v4695_v36 = vld [vmem:[%s7084_s0 + $0x130] sm:$0xff] }
  0xeb   :  { %92 = vst.msk [vmem:[#allocation2 + $0xf8] sm:$0xff] %vm76_vm0, %v7301_v13  ;;  %v4707_v6 = vadd.f32 1.0, %v4695_v36  ;;  %v4733_v30 = vadd.f32 6.123234e-17, %v4695_v36  ;;  %v4740_v56 = vadd.f32 -0.70710677, %v4695_v36 }
  0xec   :  { %93 = vst.msk [vmem:[#allocation2 + $0x108] sm:$0xff] %vm76_vm0, %v7301_v13 }
  0xed   :  { %94 = vst.msk [vmem:[#allocation2 + $0x118] sm:$0xff] %vm76_vm0, %v7301_v13 }
  0xee   :  { %7677 = vst [vmem:[#allocation220_spill] sm:$0xff] %v4636_v17  ;;  %v4712_v17 = vadd.f32 1.0, %v58_v8 }
  0xef   :  { %7678 = vst [vmem:[#allocation221_spill] sm:$0xff] %v4638_v5  ;;  %v57_v5 = vld [vmem:[%s7084_s0 + $0x168] sm:$0xff] }
  0xf0   :  { %95 = vst.msk [vmem:[#allocation2 + $0x128] sm:$0xff] %vm76_vm0, %v7301_v13  ;;  %v4714_v9 = vadd.f32 1.0, %v57_v5  ;;  %v4760_v63 = vadd.f32 6.123234e-17, %v57_v5  ;;  %v4762_v29 = vadd.f32 -0.70710677, %v57_v5 }
  0xf1   :  { %7679 = vst [vmem:[#allocation222_spill] sm:$0xff] %v4646_v25 }
  0xf2   :  { %7680 = vst [vmem:[#allocation223_spill] sm:$0xff] %v4648_v12 }
  0xf3   :  { %850 = vst.msk [vmem:[#allocation2 + $0x48] sm:$0xff] %vm845_vm1, %v662_v0  ;;  %v4667_v0 = vmul.f32 %v4648_v12, %v4646_v25  ;;  %v4710_v25 = vadd.f32 0.70710677, %v4695_v36  ;;  %v4720_v12 = vadd.f32 0.70710677, %v58_v8 }
  0xf4   :  { %96 = vst.msk [vmem:[#allocation2 + $0x138] sm:$0xff] %vm76_vm0, %v7301_v13 }
  0xf5   :  { %97 = vst.msk [vmem:[#allocation2 + $0x148] sm:$0xff] %vm76_vm0, %v7301_v13  ;;  %v567_v3 = vmul.f32 %v4669_v42, %v4667_v0  ;;  %v4730_v10 = vmul.f32 %v4710_v25, %v4707_v6  ;;  %v4744_v14 = vmul.f32 %v4720_v12, %v4712_v17 }
  0xf6   :  { %7681 = vst [vmem:[#allocation224_spill] sm:$0xff] %v4658_v21  ;;  %v4746_v21 = vadd.f32 -0.70710677, %v58_v8 }
  0xf7   :  { %7682 = vst [vmem:[#allocation225_spill] sm:$0xff] %v4660_v46  ;;  %737 = vrot.lane.b32.xlu0 %v567_v3, %s3685_s23  ;;  %v4718_v46 = vpop.permute.xlu1 %657  ;;  %v4722_v3 = vadd.f32 0.70710677, %v57_v5  ;;  %v4758_v62 = vmul.f32 %v4733_v30, %v4730_v10  ;;  %v4768_v8 = vmul.f32 %v4735_v11, %v4744_v14  ;;  %v4781_v5 = vld [vmem:[%s7084_s0 + $0x148] sm:$0xff] }
  0xf8   :  { %98 = vst.msk [vmem:[#allocation2 + $0x158] sm:$0xff] %vm76_vm0, %v7301_v13 }
  0xf9   :  { %7683 = vst [vmem:[#allocation226_spill] sm:$0xff] %v4667_v0 }
  0xfa   :  { %7684 = vst [vmem:[#allocation227_spill] sm:$0xff] %v4669_v42  ;;  %v4726_v42 = vpop.permute.xlu0 %653 }
  0xfb   :  { %99 = vst.msk [vmem:[#allocation2 + $0x168] sm:$0xff] %vm76_vm0, %v7301_v13 }
  0xfc   :  { %100 = vst.msk [vmem:[#allocation2 + $0x178] sm:$0xff] %vm76_vm0, %v7301_v13 }
  0xfd   :  { %101 = vst.msk [vmem:[#allocation2 + $0x188] sm:$0xff] %vm76_vm0, %v7301_v13 }
  0xfe   :  { %102 = vst.msk [vmem:[#allocation2 + $0x198] sm:$0xff] %vm76_vm0, %v7301_v13 }
  0xff   :  { %103 = vst.msk [vmem:[#allocation2 + $0x1a8] sm:$0xff] %vm76_vm0, %v7301_v13 }
 0x100   :  { %104 = vst.msk [vmem:[#allocation2 + $0x1b8] sm:$0xff] %vm76_vm0, %v7301_v13 }
 0x101   :  { %105 = vst.msk [vmem:[#allocation2 + $0x1c8] sm:$0xff] %vm76_vm0, %v7301_v13 }
 0x102   :  { %106 = vst.msk [vmem:[#allocation2 + $0x1d8] sm:$0xff] %vm76_vm0, %v7301_v13  ;;  %v4830_v61 = vpop.permute.xlu0 %655 }
 0x103   :  { %7685 = vst [vmem:[#allocation228_spill] sm:$0xff] %v4695_v36 }
 0x104   :  { %107 = vst.msk [vmem:[#allocation2 + $0x1e8] sm:$0xff] %vm76_vm0, %v7301_v13 }
 0x105   :  { %7686 = vst [vmem:[#allocation229_spill] sm:$0xff] %v4707_v6  ;;  %v4752_v6 = vpop.permute.xlu2 %663 }
 0x106   :  { %7687 = vst [vmem:[#allocation230_spill] sm:$0xff] %v4710_v25  ;;  %v4750_v25 = vmul.f32 %v4722_v3, %v4714_v9 }
 0x107   :  { %7688 = vst [vmem:[#allocation231_spill] sm:$0xff] %v4712_v17  ;;  %v61_v17 = vld [vmem:[%s7084_s0 + $0x188] sm:$0xff] }
 0x108   :  { %7689 = vst [vmem:[#allocation232_spill] sm:$0xff] %v4714_v9  ;;  %v4797_v9 = vadd.f32 0.70710677, %v4781_v5  ;;  %v4823_v33 = vadd.f32 6.123234e-17, %v61_v17  ;;  %v4825_v53 = vadd.f32 -1.0, %v61_v17 }
 0x109   :  { %108 = vst.msk [vmem:[#allocation2 + $0x1f8] sm:$0xff] %vm76_vm0, %v7301_v13 }
 0x10a   :  { %7690 = vst [vmem:[#allocation233_spill] sm:$0xff] %v4720_v12  ;;  %v563_v12 = vmul.f32 %v4740_v56, %v4758_v62 }
 0x10b   :  { %7691 = vst [vmem:[#allocation234_spill] sm:$0xff] %v4722_v3  ;;  %v4776_v3 = vmul.f32 %v4760_v63, %v4750_v25 }
 0x10c   :  { %109 = vst.msk [vmem:[#allocation2 + $0x208] sm:$0xff] %vm76_vm0, %v7301_v13  ;;  %729 = vrot.lane.b32.xlu2 %v563_v12, %s3685_s23 }
 0x10d   :  { %7692 = vst [vmem:[#allocation235_spill] sm:$0xff] %v4730_v10  ;;  %v4808_v10 = vadd.f32 -0.70710677, %v4781_v5 }
 0x10e   :  { %7693 = vst [vmem:[#allocation236_spill] sm:$0xff] %v4733_v30  ;;  %v570_v30 = vmul.f32 %v4762_v29, %v4776_v3 }
 0x10f   :  { %7694 = vst [vmem:[#allocation237_spill] sm:$0xff] %v4735_v11  ;;  %v7705_v11 = vmov 0.0  }
 0x110   :  { %110 = vst.msk [vmem:[#allocation2 + $0x218] sm:$0xff] %vm76_vm0, %v7301_v13  ;;  %743 = vrot.lane.b32.xlu0 %v570_v30, %s3685_s23 }
 0x111   :  { %7695 = vst [vmem:[#allocation238_spill] sm:$0xff] %v4740_v56  ;;  %v4812_v56 = vadd.f32 0.70710677, %v61_v17 }
 0x112   :  { %7696 = vst [vmem:[#allocation239_spill] sm:$0xff] %v4744_v14  ;;  %v571_v14 = vmul.f32 %v4746_v21, %v4768_v8 }
 0x113   :  { %7697 = vst [vmem:[#allocation240_spill] sm:$0xff] %v4746_v21  ;;  %v4810_v21 = vadd.f32 1.0, %v61_v17 }
 0x114   :  { %7698 = vst [vmem:[#allocation241_spill] sm:$0xff] %v4750_v25  ;;  %v4794_v25 = vadd.f32 1.0, %v4781_v5  ;;  %745 = vrot.lane.b32.xlu1 %v571_v14, %s3685_s23 }
 0x115   :  { %111 = vst.msk [vmem:[#allocation2 + $0x228] sm:$0xff] %vm76_vm0, %v7301_v13  ;;  %v4834_v14 = vmul.f32 %v4812_v56, %v4810_v21 }
 0x116   :  { %7699 = vst [vmem:[#allocation242_spill] sm:$0xff] %v4758_v62  ;;  %v4821_v12 = vmul.f32 %v4797_v9, %v4794_v25  ;;  %v67_v62 = vld [vmem:[%s7084_s0 + $0x1b8] sm:$0xff] }
 0x117   :  { %7700 = vst [vmem:[#allocation243_spill] sm:$0xff] %v4760_v63  ;;  %v4800_v63 = vadd.f32 6.123234e-17, %v4781_v5  ;;  %v3438_v57 = vadd.f32 -0.70710677, %v67_v62  ;;  %v5014_v32 = vadd.f32 -1.0, %v67_v62 }
 0x118   :  { %7701 = vst [vmem:[#allocation244_spill] sm:$0xff] %v4762_v29  ;;  %v3432_v29 = vadd.f32 -0.70710677, %v61_v17 }
 0x119   :  { %112 = vst.msk [vmem:[#allocation2 + $0x238] sm:$0xff] %vm76_vm0, %v7301_v13  ;;  %v4846_v17 = vmul.f32 %v4800_v63, %v4821_v12 }
 0x11a   :  { %7702 = vst [vmem:[#allocation245_spill] sm:$0xff] %v4768_v8  ;;  %v4817_v8 = vpop.permute.xlu1 %659  ;;  %v4849_v30 = vmul.f32 %v4825_v53, %v3432_v29 }
 0x11b   :  { %113 = vst.msk [vmem:[#allocation2 + $0x248] sm:$0xff] %vm76_vm0, %v7301_v13  ;;  %v60_v13 = vld [vmem:[%s7084_s0 + $0x180] sm:$0xff] }
 0x11c   :  { %7703 = vst [vmem:[#allocation246_spill] sm:$0xff] %v4776_v3  ;;  %v4836_v3 = vadd.f32 1.0, %v60_v13  ;;  %v3431_v27 = vadd.f32 -0.70710677, %v60_v13  ;;  %v4851_v0 = vadd.f32 -1.0, %v60_v13 }
 0x11d   :  { %7704 = vst [vmem:[#allocation247_spill] sm:$0xff] %v4781_v5 }
 0x11e   :  { %114 = vst.msk [vmem:[#allocation2 + $0x258] sm:$0xff] %vm76_vm0, %v7705_v11  ;;  %v4884_v5 = vmul.f32 %v4851_v0, %v3431_v27 }
 0x11f   :  { %7706 = vst [vmem:[#allocation248_spill] sm:$0xff] %v4794_v25  ;;  %v4840_v25 = vadd.f32 6.123234e-17, %v60_v13 }
 0x120   :  { %7707 = vst [vmem:[#allocation249_spill] sm:$0xff] %v4797_v9  ;;  %v4838_v9 = vadd.f32 0.70710677, %v60_v13 }
 0x121   :  { %7708 = vst [vmem:[#allocation250_spill] sm:$0xff] %v4800_v63 }
 0x122   :  { %115 = vst.msk [vmem:[#allocation2 + $0x268] sm:$0xff] %vm76_vm0, %v7705_v11  ;;  %v4871_v13 = vmul.f32 %v4838_v9, %v4836_v3  ;;  %v4937_v23 = vpop.permute.xlu1 %667 }
 0x123   :  { %7709 = vst [vmem:[#allocation251_spill] sm:$0xff] %v4808_v10 }
 0x124   :  { %7710 = vst [vmem:[#allocation252_spill] sm:$0xff] %v4810_v21  ;;  %v4858_v21 = vld [vmem:[%s7084_s0 + $0x160] sm:$0xff] }
 0x125   :  { %7711 = vst [vmem:[#allocation253_spill] sm:$0xff] %v4812_v56  ;;  %v4853_v56 = vpop.permute.xlu2 %669  ;;  %v4877_v63 = vadd.f32 0.70710677, %v4858_v21 }
 0x126   :  { %116 = vst.msk [vmem:[#allocation2 + $0x278] sm:$0xff] %vm76_vm0, %v7705_v11 }
 0x127   :  { %7712 = vst [vmem:[#allocation254_spill] sm:$0xff] %v4821_v12  ;;  %v566_v12 = vmul.f32 %v4808_v10, %v4846_v17  ;;  %v4900_v10 = vmul.f32 %v4840_v25, %v4871_v13 }
 0x128   :  { %7713 = vst [vmem:[#allocation255_spill] sm:$0xff] %v4823_v33 }
 0x129   :  { %7714 = vst [vmem:[#allocation256_spill] sm:$0xff] %v4825_v53  ;;  %v4874_v53 = vadd.f32 1.0, %v4858_v21  ;;  %735 = vrot.lane.b32.xlu2 %v566_v12, %s3685_s23 }
 0x12a   :  { %117 = vst.msk [vmem:[#allocation2 + $0x288] sm:$0xff] %vm76_vm0, %v7705_v11 }
 0x12b   :  { %7715 = vst [vmem:[#allocation257_spill] sm:$0xff] %v4834_v14 }
 0x12c   :  { %7716 = vst [vmem:[#allocation258_spill] sm:$0xff] %v4836_v3  ;;  %v63_v3 = vld [vmem:[%s7084_s0 + $0x198] sm:$0xff] }
 0x12d   :  { %7717 = vst [vmem:[#allocation259_spill] sm:$0xff] %v4838_v9  ;;  %v4890_v9 = vadd.f32 -0.70710677, %v4858_v21  ;;  %v4943_v12 = vadd.f32 0.70710677, %v63_v3  ;;  %v4972_v36 = vpop.permute.xlu2 %675 }
 0x12e   :  { %7718 = vst [vmem:[#allocation260_spill] sm:$0xff] %v4840_v25  ;;  %v4919_v25 = vadd.f32 -1.0, %v64_v43 }
 0x12f   :  { %118 = vst.msk [vmem:[#allocation2 + $0x298] sm:$0xff] %vm76_vm0, %v7705_v11 }
 0x130   :  { %7719 = vst [vmem:[#allocation261_spill] sm:$0xff] %v4846_v17  ;;  %v4915_v17 = vadd.f32 0.70710677, %v64_v43 }
 0x131   :  { %7720 = vst [vmem:[#allocation262_spill] sm:$0xff] %v4849_v30  ;;  %v4867_v30 = vmul.f32 %v4823_v33, %v4834_v14  ;;  %v4887_v14 = vadd.f32 6.123234e-17, %v4858_v21 }
 0x132   :  { %7721 = vst [vmem:[#allocation263_spill] sm:$0xff] %v4851_v0  ;;  %v4904_v0 = vmul.f32 %v4877_v63, %v4874_v53 }
 0x133   :  { %7722 = vst [vmem:[#allocation264_spill] sm:$0xff] %v4858_v21  ;;  %v574_v33 = vmul.f32 %v3432_v29, %v4867_v30  ;;  %v4911_v21 = vld [vmem:[%s7084_s0 + $0x178] sm:$0xff]  ;;  %v4917_v29 = vadd.f32 6.123234e-17, %v64_v43 }
 0x134   :  { %119 = vst.msk [vmem:[#allocation2 + $0x2a8] sm:$0xff] %vm76_vm0, %v7705_v11 }
 0x135   :  { %7723 = vst [vmem:[#allocation265_spill] sm:$0xff] %v4867_v30  ;;  %v4927_v30 = vmul.f32 %v4887_v14, %v4904_v0  ;;  %751 = vrot.lane.b32.xlu1 %v574_v33, %s3685_s23 }
 0x136   :  { %7724 = vst [vmem:[#allocation266_spill] sm:$0xff] %v4871_v13  ;;  %v3435_v13 = vadd.f32 -0.70710677, %v64_v43 }
 0x137   :  { %7725 = vst [vmem:[#allocation267_spill] sm:$0xff] %v4874_v53  ;;  %v4929_v53 = vadd.f32 1.0, %v63_v3  ;;  %v569_v33 = vmul.f32 %v4890_v9, %v4927_v30 }
 0x138   :  { %7726 = vst [vmem:[#allocation268_spill] sm:$0xff] %v4877_v63  ;;  %v573_v63 = vmul.f32 %v3431_v27, %v4900_v10 }
 0x139   :  { %120 = vst.msk [vmem:[#allocation2 + $0x2b8] sm:$0xff] %vm76_vm0, %v7705_v11  ;;  %741 = vrot.lane.b32.xlu2 %v569_v33, %s3685_s23  ;;  %v5050_v33 = vpop.permute.xlu1 %673 }
 0x13a   :  { %7727 = vst [vmem:[#allocation269_spill] sm:$0xff] %v4884_v5  ;;  %v4906_v5 = vadd.f32 1.0, %v64_v43  ;;  %v4945_v43 = vadd.f32 6.123234e-17, %v63_v3  ;;  %749 = vrot.lane.b32.xlu0 %v573_v63, %s3685_s23  ;;  %v4970_v63 = vmul.f32 %v4943_v12, %v4929_v53 }
 0x13b   :  { %7728 = vst [vmem:[#allocation270_spill] sm:$0xff] %v4887_v14  ;;  %v4952_v14 = vpop.permute.xlu0 %665 }
 0x13c   :  { %7729 = vst [vmem:[#allocation271_spill] sm:$0xff] %v4890_v9  ;;  %v4941_v27 = vmul.f32 %v4915_v17, %v4906_v5 }
 0x13d   :  { %121 = vst.msk [vmem:[#allocation2 + $0x2c8] sm:$0xff] %vm76_vm0, %v7705_v11 }
 0x13e   :  { %7730 = vst [vmem:[#allocation272_spill] sm:$0xff] %v4900_v10  ;;  %v4947_v10 = vadd.f32 -1.0, %v63_v3  ;;  %v4966_v1 = vmul.f32 %v4917_v29, %v4941_v27 }
 0x13f   :  { %7731 = vst [vmem:[#allocation273_spill] sm:$0xff] %v4904_v0  ;;  %v4957_v0 = vmul.f32 %v4919_v25, %v3435_v13 }
 0x140   :  { %7732 = vst [vmem:[#allocation274_spill] sm:$0xff] %v4906_v5  ;;  %v4960_v5 = vadd.f32 1.0, %v4911_v21  ;;  %v577_v9 = vmul.f32 %v3435_v13, %v4966_v1 }
 0x141   :  { %7733 = vst [vmem:[#allocation275_spill] sm:$0xff] %v4911_v21 }
 0x142   :  { %122 = vst.msk [vmem:[#allocation2 + $0x2d8] sm:$0xff] %vm76_vm0, %v7705_v11  ;;  %757 = vrot.lane.b32.xlu1 %v577_v9, %s3685_s23 }
 0x143   :  { %7734 = vst [vmem:[#allocation276_spill] sm:$0xff] %v4915_v17  ;;  %v3434_v17 = vadd.f32 -0.70710677, %v63_v3  ;;  %v4978_v3 = vadd.f32 6.123234e-17, %v4911_v21 }
 0x144   :  { %7735 = vst [vmem:[#allocation277_spill] sm:$0xff] %v4917_v29 }
 0x145   :  { %7736 = vst [vmem:[#allocation278_spill] sm:$0xff] %v4919_v25  ;;  %v4975_v25 = vadd.f32 0.70710677, %v4911_v21  ;;  %v4986_v29 = vmul.f32 %v4947_v10, %v3434_v17 }
 0x146   :  { %123 = vst.msk [vmem:[#allocation2 + $0x2e8] sm:$0xff] %vm76_vm0, %v7705_v11 }
 0x147   :  { %7737 = vst [vmem:[#allocation279_spill] sm:$0xff] %v4927_v30  ;;  %v5000_v30 = vmul.f32 %v4945_v43, %v4970_v63 }
 0x148   :  { %7738 = vst [vmem:[#allocation280_spill] sm:$0xff] %v4929_v53  ;;  %v4993_v53 = vadd.f32 0.70710677, %v67_v62 }
 0x149   :  { %124 = vst.msk [vmem:[#allocation2 + $0x2f8] sm:$0xff] %vm76_vm0, %v7705_v11 }
 0x14a   :  { %7739 = vst [vmem:[#allocation281_spill] sm:$0xff] %v4941_v27  ;;  %v4991_v27 = vadd.f32 1.0, %v67_v62 }
 0x14b   :  { %7740 = vst [vmem:[#allocation282_spill] sm:$0xff] %v4943_v12  ;;  %v4989_v12 = vadd.f32 -0.70710677, %v4911_v21 }
 0x14c   :  { %7741 = vst [vmem:[#allocation283_spill] sm:$0xff] %v4945_v43  ;;  %v5012_v21 = vmul.f32 %v4993_v53, %v4991_v27  ;;  %v62_v43 = vld [vmem:[%s7084_s0 + $0x190] sm:$0xff] }
 0x14d   :  { %7742 = vst [vmem:[#allocation284_spill] sm:$0xff] %v4947_v10  ;;  %v5004_v10 = vmul.f32 %v4975_v25, %v4960_v5 }
 0x14e   :  { %125 = vst.msk [vmem:[#allocation2 + $0x308] sm:$0xff] %vm76_vm0, %v7705_v11 }
 0x14f   :  { %7743 = vst [vmem:[#allocation285_spill] sm:$0xff] %v4957_v0  ;;  %v66_v0 = vld [vmem:[%s7084_s0 + $0x1b0] sm:$0xff] }
 0x150   :  { %7744 = vst [vmem:[#allocation286_spill] sm:$0xff] %v4960_v5  ;;  %v5016_v13 = vadd.f32 1.0, %v66_v0  ;;  %v70_v5 = vld [vmem:[%s7084_s0 + $0x1d0] sm:$0xff] }
 0x151   :  { %126 = vst.msk [vmem:[#allocation2 + $0x318] sm:$0xff] %vm76_vm0, %v7705_v11  ;;  %v5098_v45 = vadd.f32 -1.0, %v70_v5  ;;  %v3441_v24 = vadd.f32 -0.70710677, %v70_v5 }
 0x152   :  { %7745 = vst [vmem:[#allocation287_spill] sm:$0xff] %v4966_v1  ;;  %v5026_v1 = vmul.f32 %v4978_v3, %v5004_v10 }
 0x153   :  { %7746 = vst [vmem:[#allocation288_spill] sm:$0xff] %v4970_v63  ;;  %v5040_v63 = vmul.f32 %v5014_v32, %v3438_v57 }
 0x154   :  { %7747 = vst [vmem:[#allocation289_spill] sm:$0xff] %v4975_v25  ;;  %v576_v25 = vmul.f32 %v3434_v17, %v5000_v30  ;;  %v3437_v17 = vadd.f32 -0.70710677, %v66_v0  ;;  %v572_v9 = vmul.f32 %v4989_v12, %v5026_v1 }
 0x155   :  { %7748 = vst [vmem:[#allocation290_spill] sm:$0xff] %v4978_v3  ;;  %v5070_v3 = vadd.f32 6.123234e-17, %v62_v43 }
 0x156   :  { %127 = vst.msk [vmem:[#allocation2 + $0x328] sm:$0xff] %vm76_vm0, %v7705_v11  ;;  %755 = vrot.lane.b32.xlu0 %v576_v25, %s3685_s23  ;;  %747 = vrot.lane.b32.xlu2 %v572_v9, %s3685_s23 }
 0x157   :  { %7749 = vst [vmem:[#allocation291_spill] sm:$0xff] %v4986_v29  ;;  %v5006_v29 = vadd.f32 6.123234e-17, %v67_v62 }
 0x158   :  { %7750 = vst [vmem:[#allocation292_spill] sm:$0xff] %v4989_v12  ;;  %v5084_v12 = vadd.f32 -1.0, %v62_v43 }
 0x159   :  { %7751 = vst [vmem:[#allocation293_spill] sm:$0xff] %v4991_v27  ;;  %v5030_v27 = vadd.f32 6.123234e-17, %v66_v0  ;;  %v5037_v62 = vmul.f32 %v5006_v29, %v5012_v21 }
 0x15a   :  { %7752 = vst [vmem:[#allocation294_spill] sm:$0xff] %v4993_v53  ;;  %v5028_v53 = vadd.f32 0.70710677, %v66_v0 }
 0x15b   :  { %128 = vst.msk [vmem:[#allocation2 + $0x338] sm:$0xff] %vm76_vm0, %v7705_v11 }
 0x15c   :  { %7753 = vst [vmem:[#allocation295_spill] sm:$0xff] %v5000_v30  ;;  %v5042_v30 = vadd.f32 -1.0, %v66_v0  ;;  %v5063_v0 = vpop.permute.xlu0 %671 }
 0x15d   :  { %7754 = vst [vmem:[#allocation296_spill] sm:$0xff] %v5004_v10  ;;  %v5078_v10 = vpop.permute.xlu2 %681 }
 0x15e   :  { %7755 = vst [vmem:[#allocation297_spill] sm:$0xff] %v5006_v29  ;;  %v5056_v29 = vadd.f32 1.0, %v62_v43 }
 0x15f   :  { %129 = vst.msk [vmem:[#allocation2 + $0x348] sm:$0xff] %vm76_vm0, %v7705_v11 }
 0x160   :  { %7756 = vst [vmem:[#allocation298_spill] sm:$0xff] %v5012_v21  ;;  %v5054_v21 = vmul.f32 %v5028_v53, %v5016_v13 }
 0x161   :  { %7757 = vst [vmem:[#allocation299_spill] sm:$0xff] %v5014_v32  ;;  %v5068_v32 = vmul.f32 %v5042_v30, %v3437_v17 }
 0x162   :  { %7758 = vst [vmem:[#allocation300_spill] sm:$0xff] %v5016_v13  ;;  %v5076_v13 = vmul.f32 %v5030_v27, %v5054_v21 }
 0x163   :  { %130 = vst.msk [vmem:[#allocation2 + $0x358] sm:$0xff] %vm76_vm0, %v7705_v11 }
 0x164   :  { %7759 = vst [vmem:[#allocation301_spill] sm:$0xff] %v5026_v1  ;;  %v5096_v1 = vadd.f32 6.123234e-17, %v70_v5 }
 0x165   :  { %7760 = vst [vmem:[#allocation302_spill] sm:$0xff] %v5028_v53  ;;  %v3433_v53 = vadd.f32 -0.70710677, %v62_v43  ;;  %v5179_v18 = vpop.permute.xlu2 %687 }
 0x166   :  { %7761 = vst [vmem:[#allocation303_spill] sm:$0xff] %v5030_v27  ;;  %v580_v27 = vmul.f32 %v3438_v57, %v5037_v62  ;;  %v65_v57 = vld [vmem:[%s7084_s0 + $0x1a8] sm:$0xff] }
 0x167   :  { %131 = vst.msk [vmem:[#allocation2 + $0x368] sm:$0xff] %vm76_vm0, %v7705_v11 }
 0x168   :  { %7762 = vst [vmem:[#allocation304_spill] sm:$0xff] %v5037_v62  ;;  %763 = vrot.lane.b32.xlu1 %v580_v27, %s3685_s23 }
 0x169   :  { %7763 = vst [vmem:[#allocation305_spill] sm:$0xff] %v5040_v63  ;;  %v5058_v63 = vadd.f32 0.70710677, %v62_v43  ;;  %v579_v43 = vmul.f32 %v3437_v17, %v5076_v13 }
 0x16a   :  { %7764 = vst [vmem:[#allocation306_spill] sm:$0xff] %v5042_v30  ;;  %v5086_v30 = vadd.f32 1.0, %v70_v5 }
 0x16b   :  { %132 = vst.msk [vmem:[#allocation2 + $0x378] sm:$0xff] %vm76_vm0, %v7705_v11  ;;  %v5082_v25 = vmul.f32 %v5058_v63, %v5056_v29  ;;  %761 = vrot.lane.b32.xlu0 %v579_v43, %s3685_s23 }
 0x16c   :  { %7765 = vst [vmem:[#allocation307_spill] sm:$0xff] %v5054_v21  ;;  %v5094_v21 = vadd.f32 0.70710677, %v70_v5  ;;  %v5128_v5 = vmul.f32 %v5098_v45, %v3441_v24 }
 0x16d   :  { %7766 = vst [vmem:[#allocation308_spill] sm:$0xff] %v5056_v29  ;;  %v5108_v29 = vmul.f32 %v5084_v12, %v3433_v53 }
 0x16e   :  { %7767 = vst [vmem:[#allocation309_spill] sm:$0xff] %v5058_v63  ;;  %v5105_v63 = vmul.f32 %v5070_v3, %v5082_v25  ;;  %v5117_v62 = vmul.f32 %v5094_v21, %v5086_v30 }
 0x16f   :  { %133 = vst.msk [vmem:[#allocation2 + $0x388] sm:$0xff] %vm76_vm0, %v7705_v11 }
 0x170   :  { %7768 = vst [vmem:[#allocation310_spill] sm:$0xff] %v5068_v32  ;;  %v69_v32 = vld [vmem:[%s7084_s0 + $0x1c8] sm:$0xff]  ;;  %v575_v27 = vmul.f32 %v3433_v53, %v5105_v63 }
 0x171   :  { %7769 = vst [vmem:[#allocation311_spill] sm:$0xff] %v5070_v3  ;;  %v5119_v17 = vadd.f32 1.0, %v69_v32  ;;  %v3440_v3 = vadd.f32 -0.70710677, %v69_v32 }
 0x172   :  { %134 = vst.msk [vmem:[#allocation2 + $0x398] sm:$0xff] %vm76_vm0, %v7705_v11  ;;  %753 = vrot.lane.b32.xlu2 %v575_v27, %s3685_s23 }
 0x173   :  { %7770 = vst [vmem:[#allocation312_spill] sm:$0xff] %v5076_v13  ;;  %v5121_v13 = vadd.f32 0.70710677, %v69_v32 }
 0x174   :  { %7771 = vst [vmem:[#allocation313_spill] sm:$0xff] %v5082_v25  ;;  %v5123_v25 = vadd.f32 6.123234e-17, %v69_v32 }
 0x175   :  { %7772 = vst [vmem:[#allocation314_spill] sm:$0xff] %v5084_v12  ;;  %v5153_v12 = vpop.permute.xlu1 %679 }
 0x176   :  { %7773 = vst [vmem:[#allocation315_spill] sm:$0xff] %v5086_v30  ;;  %v5140_v30 = vmul.f32 %v5096_v1, %v5117_v62 }
 0x177   :  { %135 = vst.msk [vmem:[#allocation2 + $0x3a8] sm:$0xff] %vm76_vm0, %v7705_v11 }
 0x178   :  { %7774 = vst [vmem:[#allocation316_spill] sm:$0xff] %v5094_v21  ;;  %v73_v21 = vld [vmem:[%s7084_s0 + $0x1e8] sm:$0xff] }
 0x179   :  { %7775 = vst [vmem:[#allocation317_spill] sm:$0xff] %v5096_v1  ;;  %v3436_v1 = vadd.f32 -0.70710677, %v65_v57  ;;  %v5188_v53 = vadd.f32 0.70710677, %v73_v21 }
 0x17a   :  { %7776 = vst [vmem:[#allocation318_spill] sm:$0xff] %v5098_v45  ;;  %v5144_v45 = vmul.f32 %v5121_v13, %v5119_v17 }
 0x17b   :  { %136 = vst.msk [vmem:[#allocation2 + $0x3b8] sm:$0xff] %vm76_vm0, %v7705_v11 }
 0x17c   :  { %7777 = vst [vmem:[#allocation319_spill] sm:$0xff] %v5105_v63 }
 0x17d   :  { %7778 = vst [vmem:[#allocation320_spill] sm:$0xff] %v5108_v29  ;;  %v5130_v29 = vadd.f32 -1.0, %v69_v32  ;;  %v5148_v32 = vadd.f32 0.70710677, %v65_v57 }
 0x17e   :  { %137 = vst.msk [vmem:[#allocation2 + $0x3c8] sm:$0xff] %vm76_vm0, %v7705_v11 }
 0x17f   :  { %7779 = vst [vmem:[#allocation321_spill] sm:$0xff] %v5117_v62  ;;  %v5156_v9 = vmul.f32 %v5130_v29, %v3440_v3  ;;  %v5158_v62 = vadd.f32 -1.0, %v65_v57 }
 0x180   :  { %7780 = vst [vmem:[#allocation322_spill] sm:$0xff] %v5119_v17  ;;  %v5171_v17 = vmul.f32 %v5123_v25, %v5144_v45 }
 0x181   :  { %7781 = vst [vmem:[#allocation323_spill] sm:$0xff] %v5121_v13  ;;  %v72_v13 = vld [vmem:[%s7084_s0 + $0x1e0] sm:$0xff]  ;;  %v5186_v43 = vmul.f32 %v5158_v62, %v3436_v1 }
 0x182   :  { %7782 = vst [vmem:[#allocation324_spill] sm:$0xff] %v5123_v25  ;;  %v5190_v25 = vadd.f32 6.123234e-17, %v73_v21  ;;  %v5197_v63 = vadd.f32 1.0, %v72_v13 }
 0x183   :  { %138 = vst.msk [vmem:[#allocation2 + $0x3d8] sm:$0xff] %vm76_vm0, %v7705_v11 }
 0x184   :  { %7783 = vst [vmem:[#allocation325_spill] sm:$0xff] %v5128_v5  ;;  %v5146_v5 = vadd.f32 1.0, %v65_v57 }
 0x185   :  { %7784 = vst [vmem:[#allocation326_spill] sm:$0xff] %v5130_v29  ;;  %v5175_v29 = vadd.f32 1.0, %v73_v21 }
 0x186   :  { %139 = vst.msk [vmem:[#allocation2 + $0x3e8] sm:$0xff] %vm76_vm0, %v7705_v11 }
 0x187   :  { %7785 = vst [vmem:[#allocation327_spill] sm:$0xff] %v5140_v30 }
 0x188   :  { %7786 = vst [vmem:[#allocation328_spill] sm:$0xff] %v5144_v45  ;;  %v3444_v45 = vadd.f32 -0.70710677, %v73_v21 }
 0x189   :  { %7787 = vst [vmem:[#allocation329_spill] sm:$0xff] %v5146_v5 }
 0x18a   :  { %7788 = vst [vmem:[#allocation330_spill] sm:$0xff] %v5148_v32 }
 0x18b   :  { %140 = vst.msk [vmem:[#allocation2 + $0x3f8] sm:$0xff] %vm76_vm0, %v7705_v11  ;;  %v5166_v11 = vpop.permute.xlu0 %677 }
 0x18c   :  { %7789 = vst [vmem:[#allocation331_spill] sm:$0xff] %v5156_v9  ;;  %v5173_v9 = vadd.f32 6.123234e-17, %v65_v57  ;;  %v583_v57 = vmul.f32 %v3441_v24, %v5140_v30  ;;  %v5212_v24 = vadd.f32 -1.0, %v72_v13 }
 0x18d   :  { %7790 = vst [vmem:[#allocation332_spill] sm:$0xff] %v5158_v62  ;;  %v5206_v62 = vmul.f32 %v5188_v53, %v5175_v29 }
 0x18e   :  { %848 = vst.msk [vmem:[#allocation2 + $0x28] sm:$0xff] %vm845_vm1, %v4718_v46  ;;  %v5183_v46 = vmul.f32 %v5148_v32, %v5146_v5  ;;  %v68_v32 = vld [vmem:[%s7084_s0 + $0x1c0] sm:$0xff]  ;;  %v5208_v5 = vadd.f32 0.70710677, %v72_v13  ;;  %769 = vrot.lane.b32.xlu1 %v583_v57, %s3685_s23 }
 0x18f   :  { %7791 = vst [vmem:[#allocation333_spill] sm:$0xff] %v5175_v29  ;;  %v5241_v29 = vadd.f32 0.70710677, %v68_v32 }
 0x190   :  { %846 = vst.msk [vmem:[#allocation2 + $0x8] sm:$0xff] %vm845_vm1, %v4726_v42  ;;  %v5195_v42 = vadd.f32 -1.0, %v73_v21  ;;  %v582_v21 = vmul.f32 %v3440_v3, %v5171_v17  ;;  %v5233_v3 = vadd.f32 1.0, %v68_v32 }
 0x191   :  { %7792 = vst [vmem:[#allocation334_spill] sm:$0xff] %v5186_v43  ;;  %v3443_v43 = vadd.f32 -0.70710677, %v72_v13 }
 0x192   :  { %7793 = vst [vmem:[#allocation335_spill] sm:$0xff] %v5188_v53  ;;  %v5218_v30 = vmul.f32 %v5195_v42, %v3444_v45  ;;  %v5227_v53 = vmul.f32 %v5173_v9, %v5183_v46  ;;  %767 = vrot.lane.b32.xlu0 %v582_v21, %s3685_s23  ;;  %v5278_v21 = vmul.f32 %v5241_v29, %v5233_v3 }
 0x193   :  { %7794 = vst [vmem:[#allocation336_spill] sm:$0xff] %v5190_v25 }
 0x194   :  { %851 = vst.msk [vmem:[#allocation2 + $0x58] sm:$0xff] %vm845_vm1, %v4752_v6  ;;  %v5210_v6 = vadd.f32 6.123234e-17, %v72_v13  ;;  %v5239_v13 = vmul.f32 %v5212_v24, %v3443_v43 }
 0x195   :  { %7795 = vst [vmem:[#allocation337_spill] sm:$0xff] %v5195_v42 }
 0x196   :  { %7796 = vst [vmem:[#allocation338_spill] sm:$0xff] %v5197_v63 }
 0x197   :  { %849 = vst.msk [vmem:[#allocation2 + $0x38] sm:$0xff] %vm845_vm1, %v4817_v8  ;;  %v75_v8 = vld [vmem:[%s7084_s0 + $0x1f8] sm:$0xff] }
 0x198   :  { %7797 = vst [vmem:[#allocation339_spill] sm:$0xff] %v5206_v62  ;;  %v5256_v27 = vadd.f32 1.0, %v75_v8  ;;  %v5264_v57 = vadd.f32 0.70710677, %v75_v8  ;;  %v3446_v42 = vadd.f32 -0.70710677, %v75_v8 }
 0x199   :  { %7798 = vst [vmem:[#allocation340_spill] sm:$0xff] %v5208_v5 }
 0x19a   :  { %7799 = vst [vmem:[#allocation341_spill] sm:$0xff] %v5210_v6 }
 0x19b   :  { %7800 = vst [vmem:[#allocation342_spill] sm:$0xff] %v5212_v24  ;;  %v684_v24 = vpop.permute.xlu0 %683 }
 0x19c   :  { %847 = vst.msk [vmem:[#allocation2 + $0x18] sm:$0xff] %vm845_vm1, %v4830_v61  ;;  %v5231_v61 = vmul.f32 %v5208_v5, %v5197_v63  ;;  %v686_v5 = vpop.permute.xlu1 %685  ;;  %v5250_v63 = vmul.f32 %v5190_v25, %v5206_v62  ;;  %v5266_v62 = vadd.f32 -1.0, %v75_v8  ;;  %v694_v25 = vpop.permute.xlu2 %693 }
 0x19d   :  { %7801 = vst [vmem:[#allocation343_spill] sm:$0xff] %v5218_v30  ;;  %v5243_v30 = vadd.f32 -1.0, %v68_v32 }
 0x19e   :  { %854 = vst.msk [vmem:[#allocation2 + $0x88] sm:$0xff] %vm845_vm1, %v4853_v56  ;;  %v3439_v56 = vadd.f32 -0.70710677, %v68_v32 }
 0x19f   :  { %7802 = vst [vmem:[#allocation344_spill] sm:$0xff] %v5231_v61 }
 0x1a0   :  { %853 = vst.msk [vmem:[#allocation2 + $0x78] sm:$0xff] %vm845_vm1, %v4937_v23  ;;  %v5254_v23 = vmul.f32 %v5210_v6, %v5231_v61  ;;  %v578_v6 = vmul.f32 %v3436_v1, %v5227_v53  ;;  %v5283_v61 = vmul.f32 %v5266_v62, %v3446_v42  ;;  %v586_v1 = vmul.f32 %v3444_v45, %v5250_v63  ;;  %v74_v45 = vld [vmem:[%s7084_s0 + $0x1f0] sm:$0xff] }
 0x1a1   :  { %7803 = vst [vmem:[#allocation345_spill] sm:$0xff] %v5239_v13  ;;  %v5280_v13 = vadd.f32 6.123234e-17, %v68_v32  ;;  %v5295_v32 = vmul.f32 %v5264_v57, %v5256_v27 }
 0x1a2   :  { %7804 = vst [vmem:[#allocation346_spill] sm:$0xff] %v5241_v29  ;;  %v5297_v29 = vadd.f32 6.123234e-17, %v75_v8  ;;  %759 = vrot.lane.b32.xlu2 %v578_v6, %s3685_s23  ;;  %v5318_v8 = vadd.f32 -1.0, %v74_v45  ;;  %775 = vrot.lane.b32.xlu1 %v586_v1, %s3685_s23 }
 0x1a3   :  { %852 = vst.msk [vmem:[#allocation2 + $0x68] sm:$0xff] %vm845_vm1, %v4952_v14  ;;  %v5262_v14 = vmul.f32 %v5243_v30, %v3439_v56  ;;  %v690_v6 = vpop.permute.xlu0 %689 }
 0x1a4   :  { %7805 = vst [vmem:[#allocation347_spill] sm:$0xff] %v5250_v63  ;;  %v7853_v63 = vld [vmem:[#allocation246_spill] sm:$0xff] }
 0x1a5   :  { %7806 = vst [vmem:[#allocation348_spill] sm:$0xff] %v5254_v23 }
 0x1a6   :  { %7807 = vst [vmem:[#allocation349_spill] sm:$0xff] %v5256_v27 }
 0x1a7   :  { %857 = vst.msk [vmem:[#allocation2 + $0xb8] sm:$0xff] %vm845_vm1, %v4972_v36  ;;  %v71_v36 = vld [vmem:[%s7084_s0 + $0x1d8] sm:$0xff] }
 0x1a8   :  { %7808 = vst [vmem:[#allocation350_spill] sm:$0xff] %v5262_v14  ;;  %v3442_v14 = vadd.f32 -0.70710677, %v71_v36  ;;  %v5343_v1 = vadd.f32 6.123234e-17, %v71_v36 }
 0x1a9   :  { %7809 = vst [vmem:[#allocation351_spill] sm:$0xff] %v5264_v57  ;;  %v3615_v57 = vld [vmem:[%s7084_s0] sm:$0xff] }
 0x1aa   :  { %7810 = vst [vmem:[#allocation352_spill] sm:$0xff] %v5266_v62  ;;  %v5323_v27 = vadd.f32 -1.0, %v3615_v57  ;;  %v5331_v62 = vmul.f32 %v5297_v29, %v5295_v32  ;;  %v700_v57 = vpop.permute.xlu2 %699 }
 0x1ab   :  { %856 = vst.msk [vmem:[#allocation2 + $0xa8] sm:$0xff] %vm845_vm1, %v5050_v33  ;;  %v5285_v33 = vadd.f32 -1.0, %v71_v36 }
 0x1ac   :  { %855 = vst.msk [vmem:[#allocation2 + $0x98] sm:$0xff] %vm845_vm1, %v5063_v0  ;;  %v585_v0 = vmul.f32 %v3443_v43, %v5254_v23  ;;  %v5316_v43 = vadd.f32 0.70710677, %v71_v36 }
 0x1ad   :  { %7811 = vst [vmem:[#allocation353_spill] sm:$0xff] %v5278_v21 }
 0x1ae   :  { %7812 = vst [vmem:[#allocation354_spill] sm:$0xff] %v5283_v61  ;;  %v5301_v61 = vadd.f32 1.0, %v71_v36  ;;  %773 = vrot.lane.b32.xlu0 %v585_v0, %s3685_s23  ;;  %v974_v0 = vmul.f32 %v5323_v27, %v3761_v20  ;;  %v3616_v20 = vld [vmem:[%s7084_s0 + $0x18] sm:$0xff] }
 0x1af   :  { %7813 = vst [vmem:[#allocation355_spill] sm:$0xff] %v5285_v33 }
 0x1b0   :  { %860 = vst.msk [vmem:[#allocation2 + $0xe8] sm:$0xff] %vm845_vm1, %v5078_v10  ;;  %v5304_v10 = vmul.f32 %v5285_v33, %v3442_v14  ;;  %1102 = vrot.lane.b32.xlu1 %v974_v0, %s3687_s4 }
 0x1b1   :  { %859 = vst.msk [vmem:[#allocation2 + $0xd8] sm:$0xff] %vm845_vm1, %v5153_v12  ;;  %v5314_v12 = vmul.f32 %v5280_v13, %v5278_v21 }
 0x1b2   :  { %7814 = vst [vmem:[#allocation356_spill] sm:$0xff] %v5295_v32  ;;  %v706_v0 = vpop.permute.xlu2 %705  ;;  %v5379_v32 = vadd.f32 6.123234e-17, %v74_v45 }
 0x1b3   :  { %7815 = vst [vmem:[#allocation357_spill] sm:$0xff] %v5297_v29  ;;  %v588_v29 = vmul.f32 %v3446_v42, %v5331_v62  ;;  %v5363_v42 = vadd.f32 -1.0, %v3616_v20 }
 0x1b4   :  { %858 = vst.msk [vmem:[#allocation2 + $0xc8] sm:$0xff] %vm845_vm1, %v5166_v11  ;;  %v3445_v11 = vadd.f32 -0.70710677, %v74_v45 }
 0x1b5   :  { %7816 = vst [vmem:[#allocation358_spill] sm:$0xff] %v5301_v61 }
 0x1b6   :  { %7817 = vst [vmem:[#allocation359_spill] sm:$0xff] %v5304_v10  ;;  %v5334_v23 = vmul.f32 %v5318_v8, %v3445_v11  ;;  %779 = vrot.lane.b32.xlu0 %v588_v29, %s3685_s23 }
 0x1b7   :  { %863 = vst.msk [vmem:[#allocation2 + $0x118] sm:$0xff] %vm845_vm1, %v5179_v18  ;;  %v692_v18 = vpop.permute.xlu1 %691 }
 0x1b8   :  { %7818 = vst [vmem:[#allocation360_spill] sm:$0xff] %v5316_v43 }
 0x1b9   :  { %7819 = vst [vmem:[#allocation361_spill] sm:$0xff] %v5318_v8  ;;  %v7845_v8 = vld [vmem:[#allocation216_spill] sm:$0xff] }
 0x1ba   :  { %862 = vst.msk [vmem:[#allocation2 + $0x108] sm:$0xff] %vm845_vm1, %v686_v5  ;;  %v581_v5 = vmul.f32 %v3439_v56, %v5314_v12  ;;  %v5355_v56 = vadd.f32 1.0, %v74_v45 }
 0x1bb   :  { %861 = vst.msk [vmem:[#allocation2 + $0xf8] sm:$0xff] %vm845_vm1, %v684_v24  ;;  %v5341_v24 = vmul.f32 %v5316_v43, %v5301_v61 }
 0x1bc   :  { %7820 = vst [vmem:[#allocation362_spill] sm:$0xff] %v5331_v62  ;;  %765 = vrot.lane.b32.xlu2 %v581_v5, %s3685_s23  ;;  %v696_v5 = vpop.permute.xlu0 %695  ;;  %v7849_v62 = vld [vmem:[#allocation226_spill] sm:$0xff] }
 0x1bd   :  { %7821 = vst [vmem:[#allocation363_spill] sm:$0xff] %v5334_v23 }
 0x1be   :  { %866 = vst.msk [vmem:[#allocation2 + $0x148] sm:$0xff] %vm845_vm1, %v694_v25  ;;  %v5353_v25 = vmul.f32 %v5343_v1, %v5341_v24 }
 0x1bf   :  { %865 = vst.msk [vmem:[#allocation2 + $0x138] sm:$0xff] %vm845_vm1, %v692_v18  ;;  %v5357_v18 = vadd.f32 0.70710677, %v74_v45  ;;  %v698_v36 = vpop.permute.xlu1 %697  ;;  %v3618_v45 = vld [vmem:[%s7084_s0 + $0x30] sm:$0xff] }
 0x1c0   :  { %7822 = vst [vmem:[#allocation364_spill] sm:$0xff] %v5341_v24  ;;  %v584_v43 = vmul.f32 %v3442_v14, %v5353_v25  ;;  %v7869_v24 = vld [vmem:[#allocation245_spill] sm:$0xff] }
 0x1c1   :  { %7823 = vst [vmem:[#allocation365_spill] sm:$0xff] %v5343_v1  ;;  %v5377_v20 = vmul.f32 %v5357_v18, %v5355_v56 }
 0x1c2   :  { %864 = vst.msk [vmem:[#allocation2 + $0x128] sm:$0xff] %vm845_vm1, %v690_v6  ;;  %v3617_v6 = vld [vmem:[%s7084_s0 + $0x10] sm:$0xff] }
 0x1c3   :  { %869 = vst.msk [vmem:[#allocation2 + $0x178] sm:$0xff] %vm845_vm1, %v700_v57  ;;  %v5368_v57 = vadd.f32 -1.0, %v3617_v6  ;;  %v977_v6 = vmul.f32 %v5363_v42, %v3792_v31  ;;  %v3619_v31 = vld [vmem:[%s7084_s0 + $0x28] sm:$0xff] }
 0x1c4   :  { %7824 = vst [vmem:[#allocation366_spill] sm:$0xff] %v5353_v25  ;;  %771 = vrot.lane.b32.xlu2 %v584_v43, %s3685_s23  ;;  %v5401_v43 = vadd.f32 -1.0, %v3619_v31  ;;  %v7856_v25 = vld [vmem:[#allocation275_spill] sm:$0xff] }
 0x1c5   :  { %7825 = vst [vmem:[#allocation367_spill] sm:$0xff] %v5355_v56  ;;  %v976_v29 = vmul.f32 %v5368_v57, %v3750_v16  ;;  %1108 = vrot.lane.b32.xlu1 %v977_v6, %s3687_s4  ;;  %v702_v16 = vpop.permute.xlu0 %701  ;;  %v7840_v56 = vld [vmem:[#allocation202_spill] sm:$0xff] }
 0x1c6   :  { %7826 = vst [vmem:[#allocation368_spill] sm:$0xff] %v5357_v18  ;;  %v7837_v18 = vld [vmem:[#allocation188_spill] sm:$0xff] }
 0x1c7   :  { %868 = vst.msk [vmem:[#allocation2 + $0x168] sm:$0xff] %vm845_vm1, %v698_v36  ;;  %v5388_v36 = vmul.f32 %v5379_v32, %v5377_v20  ;;  %v704_v14 = vpop.permute.xlu1 %703  ;;  %1106 = vrot.lane.b32.xlu0 %v976_v29, %s3687_s4  ;;  %v979_v29 = vmul.f32 %v5401_v43, %v3900_v26  ;;  %v3622_v26 = vld [vmem:[%s7084_s0 + $0x40] sm:$0xff] }
 0x1c8   :  { %867 = vst.msk [vmem:[#allocation2 + $0x158] sm:$0xff] %vm845_vm1, %v696_v5  ;;  %v5394_v5 = vadd.f32 -1.0, %v3618_v45 }
 0x1c9   :  { %872 = vst.msk [vmem:[#allocation2 + $0x1a8] sm:$0xff] %vm845_vm1, %v706_v0  ;;  %v712_v0 = vpop.permute.xlu2 %711  ;;  %v587_v6 = vmul.f32 %v3445_v11, %v5388_v36  ;;  %v3621_v11 = vld [vmem:[%s7084_s0 + $0x48] sm:$0xff] }
 0x1ca   :  { %7827 = vst [vmem:[#allocation369_spill] sm:$0xff] %v5377_v20  ;;  %v980_v45 = vmul.f32 %v5394_v5, %v3858_v55 }
 0x1cb   :  { %7828 = vst [vmem:[#allocation370_spill] sm:$0xff] %v5379_v32  ;;  %v7841_v32 = vld [vmem:[#allocation206_spill] sm:$0xff] }
 0x1cc   :  { %7829 = vst [vmem:[#allocation371_spill] sm:$0xff] %v5388_v36  ;;  %777 = vrot.lane.b32.xlu2 %v587_v6, %s3685_s23  ;;  %v5427_v6 = vadd.f32 -1.0, %v3622_v26  ;;  %v7846_v36 = vld [vmem:[#allocation242_spill] sm:$0xff] }
 0x1cd   :  { %871 = vst.msk [vmem:[#allocation2 + $0x198] sm:$0xff] %vm845_vm1, %v704_v14  ;;  %v3620_v14 = vld [vmem:[%s7084_s0 + $0x8] sm:$0xff]  ;;  %1114 = vrot.lane.b32.xlu1 %v980_v45, %s3687_s4  ;;  %v708_v55 = vpop.permute.xlu0 %707 }
 0x1ce   :  { %870 = vst.msk [vmem:[#allocation2 + $0x188] sm:$0xff] %vm845_vm1, %v702_v16  ;;  %v5414_v31 = vadd.f32 -1.0, %v3620_v14 }
 0x1cf   :  { %875 = vst.msk [vmem:[#allocation2 + $0x1d8] sm:$0xff] %vm845_vm1, %v712_v0  ;;  %v710_v16 = vpop.permute.xlu1 %709  ;;  %v5420_v0 = vadd.f32 -1.0, %v3621_v11  ;;  %1112 = vrot.lane.b32.xlu0 %v979_v29, %s3687_s4  ;;  %v3623_v11 = vld [vmem:[%s7084_s0 + $0x20] sm:$0xff] }
 0x1d0   :  { %874 = vst.msk [vmem:[#allocation2 + $0x1c8] sm:$0xff] %vm845_vm1, %v710_v16  ;;  %v975_v14 = vmul.f32 %v5414_v31, %v3803_v35  ;;  %v982_v16 = vmul.f32 %v5427_v6, %v3954_v47  ;;  %v5440_v26 = vadd.f32 -1.0, %v3623_v11  ;;  %v3624_v35 = vld [vmem:[%s7084_s0 + $0x60] sm:$0xff]  ;;  %v3625_v47 = vld [vmem:[%s7084_s0 + $0x58] sm:$0xff] }
 0x1d1   :  { %873 = vst.msk [vmem:[#allocation2 + $0x1b8] sm:$0xff] %vm845_vm1, %v708_v55  ;;  %v718_v45 = vpop.permute.xlu2 %717  ;;  %v983_v29 = vmul.f32 %v5420_v0, %v3943_v58  ;;  %v5454_v11 = vadd.f32 -1.0, %v3625_v47 }
 0x1d2   :  { %878 = vst.msk [vmem:[#allocation2 + $0x208] sm:$0xff] %vm845_vm1, %v718_v45  ;;  %v5447_v45 = vadd.f32 -1.0, %v3624_v35  ;;  %v3626_v35 = vld [vmem:[%s7084_s0 + $0x38] sm:$0xff] }
 0x1d3   :  { %v5468_v47 = vadd.f32 -1.0, %v3626_v35 }
 0x1d4   :  { %1104 = vrot.lane.b32.xlu2 %v975_v14, %s3687_s4 }
 0x1d5   :  { %1120 = vrot.lane.b32.xlu1 %v983_v29, %s3687_s4  ;;  %v714_v58 = vpop.permute.xlu0 %713  ;;  %v978_v29 = vmul.f32 %v5440_v26, %v3847_v52  ;;  %v3627_v52 = vld [vmem:[%s7084_s0 + $0x78] sm:$0xff] }
 0x1d6   :  { %876 = vst.msk [vmem:[#allocation2 + $0x1e8] sm:$0xff] %vm845_vm1, %v714_v58 }
 0x1d7   :  { %v716_v55 = vpop.permute.xlu1 %715  ;;  %1118 = vrot.lane.b32.xlu0 %v982_v16, %s3687_s4  ;;  %v986_v16 = vmul.f32 %v5447_v45, %v4009_v19 }
 0x1d8   :  { %877 = vst.msk [vmem:[#allocation2 + $0x1f8] sm:$0xff] %vm845_vm1, %v716_v55  ;;  %v985_v55 = vmul.f32 %v5454_v11, %v4020_v48  ;;  %v3628_v48 = vld [vmem:[%s7084_s0 + $0x70] sm:$0xff] }
 0x1d9   :  { %v724_v14 = vpop.permute.xlu2 %723 }
 0x1da   :  { %881 = vst.msk [vmem:[#allocation2 + $0x238] sm:$0xff] %vm845_vm1, %v724_v14  ;;  %v5474_v14 = vadd.f32 -1.0, %v3627_v52 }
 0x1dc   :  { %1110 = vrot.lane.b32.xlu2 %v978_v29, %s3687_s4  ;;  %v5481_v29 = vadd.f32 -1.0, %v3628_v48  ;;  %v989_v35 = vmul.f32 %v5474_v14, %v4075_v59 }
 0x1dd   :  { %1126 = vrot.lane.b32.xlu1 %v986_v16, %s3687_s4  ;;  %v720_v19 = vpop.permute.xlu0 %719  ;;  %v981_v16 = vmul.f32 %v5468_v47, %v3854_v54  ;;  %v3630_v54 = vld [vmem:[%s7084_s0 + $0x90] sm:$0xff] }
 0x1de   :  { %879 = vst.msk [vmem:[#allocation2 + $0x218] sm:$0xff] %vm845_vm1, %v720_v19  ;;  %v5500_v48 = vadd.f32 -1.0, %v3630_v54  ;;  %v3632_v54 = vld [vmem:[%s7084_s0 + $0x68] sm:$0xff] }
 0x1df   :  { %v722_v58 = vpop.permute.xlu1 %721  ;;  %1124 = vrot.lane.b32.xlu0 %v985_v55, %s3687_s4  ;;  %v988_v55 = vmul.f32 %v5481_v29, %v4086_v28 }
 0x1e0   :  { %880 = vst.msk [vmem:[#allocation2 + $0x228] sm:$0xff] %vm845_vm1, %v722_v58  ;;  %v3629_v58 = vld [vmem:[%s7084_s0 + $0x50] sm:$0xff] }
 0x1e1   :  { %v5494_v52 = vadd.f32 -1.0, %v3629_v58  ;;  %v730_v59 = vpop.permute.xlu2 %729 }
 0x1e2   :  { %884 = vst.msk [vmem:[#allocation2 + $0x268] sm:$0xff] %vm845_vm1, %v730_v59 }
 0x1e4   :  { %1116 = vrot.lane.b32.xlu2 %v981_v16, %s3687_s4  ;;  %v3631_v16 = vld [vmem:[%s7084_s0 + $0x88] sm:$0xff] }
 0x1e5   :  { %1132 = vrot.lane.b32.xlu1 %v989_v35, %s3687_s4  ;;  %v726_v28 = vpop.permute.xlu0 %725  ;;  %v5507_v58 = vadd.f32 -1.0, %v3631_v16  ;;  %v984_v35 = vmul.f32 %v5494_v52, %v3932_v39  ;;  %v5521_v16 = vadd.f32 -1.0, %v3632_v54  ;;  %v3633_v39 = vld [vmem:[%s7084_s0 + $0xa8] sm:$0xff] }
 0x1e6   :  { %882 = vst.msk [vmem:[#allocation2 + $0x248] sm:$0xff] %vm845_vm1, %v726_v28  ;;  %v5527_v28 = vadd.f32 -1.0, %v3633_v39  ;;  %v3635_v39 = vld [vmem:[%s7084_s0 + $0x80] sm:$0xff] }
 0x1e7   :  { %v728_v19 = vpop.permute.xlu1 %727  ;;  %1130 = vrot.lane.b32.xlu0 %v988_v55, %s3687_s4  ;;  %v992_v55 = vmul.f32 %v5500_v48, %v4141_v4 }
 0x1e8   :  { %883 = vst.msk [vmem:[#allocation2 + $0x258] sm:$0xff] %vm845_vm1, %v728_v19  ;;  %v991_v19 = vmul.f32 %v5507_v58, %v4152_v15 }
 0x1e9   :  { %v736_v4 = vpop.permute.xlu2 %735 }
 0x1ea   :  { %887 = vst.msk [vmem:[#allocation2 + $0x298] sm:$0xff] %vm845_vm1, %v736_v4 }
 0x1ec   :  { %1122 = vrot.lane.b32.xlu2 %v984_v35, %s3687_s4  ;;  %v3634_v35 = vld [vmem:[%s7084_s0 + $0xa0] sm:$0xff] }
 0x1ed   :  { %1138 = vrot.lane.b32.xlu1 %v992_v55, %s3687_s4  ;;  %v732_v15 = vpop.permute.xlu0 %731  ;;  %v5534_v54 = vadd.f32 -1.0, %v3634_v35  ;;  %v987_v55 = vmul.f32 %v5521_v16, %v3998_v7  ;;  %v5548_v35 = vadd.f32 -1.0, %v3635_v39  ;;  %v3636_v7 = vld [vmem:[%s7084_s0 + $0xc0] sm:$0xff] }
 0x1ee   :  { %885 = vst.msk [vmem:[#allocation2 + $0x278] sm:$0xff] %vm845_vm1, %v732_v15  ;;  %v5554_v15 = vadd.f32 -1.0, %v3636_v7 }
 0x1ef   :  { %v734_v59 = vpop.permute.xlu1 %733  ;;  %1136 = vrot.lane.b32.xlu0 %v991_v19, %s3687_s4  ;;  %v995_v19 = vmul.f32 %v5527_v28, %v4207_v44 }
 0x1f0   :  { %886 = vst.msk [vmem:[#allocation2 + $0x288] sm:$0xff] %vm845_vm1, %v734_v59  ;;  %v994_v59 = vmul.f32 %v5534_v54, %v4218_v37 }
 0x1f1   :  { %7830 = vst [vmem:[#allocation372_spill] sm:$0xff] %v5554_v15  ;;  %v742_v44 = vpop.permute.xlu2 %741 }
 0x1f2   :  { %890 = vst.msk [vmem:[#allocation2 + $0x2c8] sm:$0xff] %vm845_vm1, %v742_v44  ;;  %v3638_v44 = vld [vmem:[%s7084_s0 + $0x98] sm:$0xff] }
 0x1f4   :  { %1128 = vrot.lane.b32.xlu2 %v987_v55, %s3687_s4  ;;  %v3637_v55 = vld [vmem:[%s7084_s0 + $0xb8] sm:$0xff] }
 0x1f5   :  { %1144 = vrot.lane.b32.xlu1 %v995_v19, %s3687_s4  ;;  %v738_v37 = vpop.permute.xlu0 %737  ;;  %v5561_v39 = vadd.f32 -1.0, %v3637_v55  ;;  %v990_v19 = vmul.f32 %v5548_v35, %v4064_v22  ;;  %v3639_v22 = vld [vmem:[%s7084_s0 + $0xd8] sm:$0xff]  ;;  %v3640_v55 = vld [vmem:[%s7084_s0 + $0xd0] sm:$0xff] }
 0x1f6   :  { %888 = vst.msk [vmem:[#allocation2 + $0x2a8] sm:$0xff] %vm845_vm1, %v738_v37  ;;  %v5578_v37 = vadd.f32 -1.0, %v3638_v44 }
 0x1f7   :  { %v740_v4 = vpop.permute.xlu1 %739  ;;  %1142 = vrot.lane.b32.xlu0 %v994_v59, %s3687_s4  ;;  %v998_v59 = vmul.f32 %v5554_v15, %v4273_v49  ;;  %v997_v7 = vmul.f32 %v5561_v39, %v4284_v41  ;;  %v5584_v49 = vadd.f32 -1.0, %v3639_v22  ;;  %v7873_v15 = vld [vmem:[#allocation180_spill] sm:$0xff] }
 0x1f8   :  { %889 = vst.msk [vmem:[#allocation2 + $0x2b8] sm:$0xff] %vm845_vm1, %v740_v4  ;;  %v3590_v4 = vld [vmem:[%s7085_s1 + $0x78] sm:$0xff] }
 0x1f9   :  { %2940 = vmatpush.bf16.msra.mxu1 %v3590_v4  ;;  %3599 = vmatpush.bf16.msra.mxu3 %v3590_v4  ;;  %7831 = vst [vmem:[#allocation373_spill] sm:$0xff] %v5584_v49  ;;  %v748_v41 = vpop.permute.xlu2 %747  ;;  %v3589_v4 = vld [vmem:[%s7085_s1 + $0x70] sm:$0xff]  ;;  %v1001_v22 = vmul.f32 %v5584_v49, %v4339_v2 }
 0x1fa   :  { %893 = vst.msk [vmem:[#allocation2 + $0x2f8] sm:$0xff] %vm845_vm1, %v748_v41  ;;  %v3642_v2 = vld [vmem:[%s7084_s0 + $0xf0] sm:$0xff] }
 0x1fc   :  { %1134 = vrot.lane.b32.xlu2 %v990_v19, %s3687_s4  ;;  %v5590_v19 = vadd.f32 -1.0, %v3640_v55  ;;  %v3588_v55 = vld [vmem:[%s7085_s1 + $0x68] sm:$0xff] }
 0x1fd   :  { %1150 = vrot.lane.b32.xlu1 %v998_v59, %s3687_s4  ;;  %v744_v44 = vpop.permute.xlu0 %743  ;;  %2941 = vmatpush.bf16.msra.mxu1 %v3589_v4 }
 0x1fe   :  { %7832 = vst [vmem:[#allocation374_spill] sm:$0xff] %v5590_v19  ;;  %3600 = vmatpush.bf16.msra.mxu3 %v3589_v4  ;;  %v1000_v41 = vmul.f32 %v5590_v19, %v4350_v38  ;;  %v5617_v4 = vadd.f32 -1.0, %v3642_v2  ;;  %v7860_v19 = vld [vmem:[#allocation301_spill] sm:$0xff] }
 0x1ff   :  { %1148 = vrot.lane.b32.xlu0 %v997_v7, %s3687_s4  ;;  %v746_v59 = vpop.permute.xlu1 %745  ;;  %v993_v7 = vmul.f32 %v5578_v37, %v4130_v40  ;;  %891 = vst.msk [vmem:[#allocation2 + $0x2d8] sm:$0xff] %vm845_vm1, %v744_v44  ;;  %v3641_v40 = vld [vmem:[%s7084_s0 + $0xb0] sm:$0xff]  ;;  %v3643_v44 = vld [vmem:[%s7084_s0 + $0xe8] sm:$0xff] }
 0x200   :  { %892 = vst.msk [vmem:[#allocation2 + $0x2e8] sm:$0xff] %vm845_vm1, %v746_v59  ;;  %v5611_v59 = vadd.f32 -1.0, %v3641_v40 }
 0x201   :  { %2942 = vmatpush.bf16.msra.mxu1 %v3588_v55  ;;  %7833 = vst [vmem:[#allocation375_spill] sm:$0xff] %v5617_v4  ;;  %v754_v38 = vpop.permute.xlu2 %753 }
 0x202   :  { %3601 = vmatpush.bf16.msra.mxu3 %v3588_v55  ;;  %896 = vst.msk [vmem:[#allocation2 + $0x328] sm:$0xff] %vm845_vm1, %v754_v38  ;;  %v996_v55 = vmul.f32 %v5611_v59, %v4196_v50  ;;  %v3644_v50 = vld [vmem:[%s7084_s0 + $0xc8] sm:$0xff] }
 0x204   :  { %1140 = vrot.lane.b32.xlu2 %v993_v7, %s3687_s4  ;;  %v5623_v7 = vadd.f32 -1.0, %v3643_v44  ;;  %v3586_v44 = vld [vmem:[%s7085_s1 + $0x58] sm:$0xff] }
 0x205   :  { %1156 = vrot.lane.b32.xlu1 %v1001_v22, %s3687_s4  ;;  %v3587_v22 = vld [vmem:[%s7085_s1 + $0x60] sm:$0xff]  ;;  %v750_v2 = vpop.permute.xlu0 %749 }
 0x206   :  { %7834 = vst [vmem:[#allocation376_spill] sm:$0xff] %v5623_v7  ;;  %2943 = vmatpush.bf16.msra.mxu1 %v3587_v22  ;;  %3602 = vmatpush.bf16.msra.mxu3 %v3587_v22  ;;  %v1003_v38 = vmul.f32 %v5623_v7, %v4416_v60  ;;  %v3646_v22 = vld [vmem:[%s7084_s0 + $0x100] sm:$0xff]  ;;  %v7850_v7 = vld [vmem:[#allocation261_spill] sm:$0xff] }
 0x207   :  { %1154 = vrot.lane.b32.xlu0 %v1000_v41, %s3687_s4  ;;  %v752_v40 = vpop.permute.xlu1 %751  ;;  %894 = vst.msk [vmem:[#allocation2 + $0x308] sm:$0xff] %vm845_vm1, %v750_v2  ;;  %v1004_v41 = vmul.f32 %v5617_v4, %v4409_v34  ;;  %v3645_v34 = vld [vmem:[%s7084_s0 + $0x108] sm:$0xff]  ;;  %v7839_v4 = vld [vmem:[#allocation150_spill] sm:$0xff] }
 0x208   :  { %895 = vst.msk [vmem:[#allocation2 + $0x318] sm:$0xff] %vm845_vm1, %v752_v40  ;;  %v5644_v40 = vadd.f32 -1.0, %v3644_v50  ;;  %v5650_v2 = vadd.f32 -1.0, %v3645_v34 }
 0x209   :  { %v760_v60 = vpop.permute.xlu2 %759 }
 0x20a   :  { %7835 = vst [vmem:[#allocation377_spill] sm:$0xff] %v5644_v40  ;;  %2944 = vmatpush.bf16.msra.mxu1 %v3586_v44  ;;  %3603 = vmatpush.bf16.msra.mxu3 %v3586_v44  ;;  %v999_v44 = vmul.f32 %v5644_v40, %v4262_v51  ;;  %v3647_v51 = vld [vmem:[%s7084_s0 + $0xe0] sm:$0xff] }
 0x20b   :  { %899 = vst.msk [vmem:[#allocation2 + $0x358] sm:$0xff] %vm845_vm1, %v760_v60  ;;  %v3584_v60 = vld [vmem:[%s7085_s1 + $0x48] sm:$0xff] }
 0x20c   :  { %1146 = vrot.lane.b32.xlu2 %v996_v55, %s3687_s4  ;;  %v5656_v55 = vadd.f32 -1.0, %v3646_v22 }
 0x20d   :  { %1162 = vrot.lane.b32.xlu1 %v1004_v41, %s3687_s4  ;;  %v3585_v41 = vld [vmem:[%s7085_s1 + $0x50] sm:$0xff]  ;;  %v756_v34 = vpop.permute.xlu0 %755 }
 0x20e   :  { %2945 = vmatpush.bf16.msra.mxu1 %v3585_v41  ;;  %897 = vst.msk [vmem:[#allocation2 + $0x338] sm:$0xff] %vm845_vm1, %v756_v34  ;;  %3604 = vmatpush.bf16.msra.mxu3 %v3585_v41  ;;  %v1006_v20 = vmul.f32 %v5656_v55, %v7837_v18  ;;  %v3648_v41 = vld [vmem:[%s7084_s0 + $0x120] sm:$0xff] }
 0x20f   :  { %1160 = vrot.lane.b32.xlu0 %v1003_v38, %s3687_s4  ;;  %v758_v50 = vpop.permute.xlu1 %757  ;;  %v7836_v38 = vld [vmem:[#allocation183_spill] sm:$0xff]  ;;  %v5683_v34 = vadd.f32 -1.0, %v3648_v41 }
 0x210   :  { %898 = vst.msk [vmem:[#allocation2 + $0x348] sm:$0xff] %vm845_vm1, %v758_v50  ;;  %v1007_v22 = vmul.f32 %v5650_v2, %v7836_v38  ;;  %v5677_v50 = vadd.f32 -1.0, %v3647_v51 }
 0x212   :  { %7838 = vst [vmem:[#allocation183_spill] sm:$0xff] %v5677_v50  ;;  %2946 = vmatpush.bf16.msra.mxu1 %v3584_v60  ;;  %3605 = vmatpush.bf16.msra.mxu3 %v3584_v60  ;;  %v3650_v60 = vld [vmem:[%s7084_s0 + $0xf8] sm:$0xff] }
 0x214   :  { %1152 = vrot.lane.b32.xlu2 %v999_v44, %s3687_s4  ;;  %v3649_v44 = vld [vmem:[%s7084_s0 + $0x118] sm:$0xff] }
 0x215   :  { %1168 = vrot.lane.b32.xlu1 %v1007_v22, %s3687_s4  ;;  %v5689_v38 = vadd.f32 -1.0, %v3649_v44  ;;  %v3583_v22 = vld [vmem:[%s7085_s1 + $0x40] sm:$0xff]  ;;  %v762_v41 = vpop.permute.xlu0 %761  ;;  %v1010_v44 = vmul.f32 %v5683_v34, %v7840_v56 }
 0x216   :  { %v766_v18 = vpop.permute.xlu2 %765  ;;  %900 = vst.msk [vmem:[#allocation2 + $0x368] sm:$0xff] %vm845_vm1, %v762_v41  ;;  %2947 = vmatpush.bf16.msra.mxu1 %v3583_v22  ;;  %3606 = vmatpush.bf16.msra.mxu3 %v3583_v22  ;;  %v7843_v22 = vld [vmem:[#allocation228_spill] sm:$0xff] }
 0x217   :  { %1166 = vrot.lane.b32.xlu0 %v1006_v20, %s3687_s4  ;;  %902 = vst.msk [vmem:[#allocation2 + $0x388] sm:$0xff] %vm845_vm1, %v766_v18  ;;  %v764_v51 = vpop.permute.xlu1 %763  ;;  %v1002_v20 = vmul.f32 %v5677_v50, %v7839_v4  ;;  %v1009_v23 = vmul.f32 %v5689_v38, %v7841_v32  ;;  %v5707_v18 = vadd.f32 -1.0, %v3650_v60  ;;  %v3651_v4 = vld [vmem:[%s7084_s0 + $0x138] sm:$0xff]  ;;  %v7844_v60 = vld [vmem:[#allocation164_spill] sm:$0xff] }
 0x218   :  { %901 = vst.msk [vmem:[#allocation2 + $0x378] sm:$0xff] %vm845_vm1, %v764_v51  ;;  %v5713_v56 = vadd.f32 -1.0, %v3651_v4  ;;  %v5717_v51 = vadd.f32 -1.0, %v7843_v22 }
 0x219   :  { %7842 = vst [vmem:[#allocation188_spill] sm:$0xff] %v5707_v18 }
 0x21a   :  { %v1013_v4 = vmul.f32 %v5713_v56, %v7845_v8 }
 0x21c   :  { %1158 = vrot.lane.b32.xlu2 %v1002_v20, %s3687_s4 }
 0x21d   :  { %1174 = vrot.lane.b32.xlu1 %v1010_v44, %s3687_s4  ;;  %v768_v20 = vpop.permute.xlu0 %767  ;;  %v1005_v44 = vmul.f32 %v5707_v18, %v7844_v60  ;;  %v7848_v18 = vld [vmem:[#allocation182_spill] sm:$0xff] }
 0x21e   :  { %v772_v32 = vpop.permute.xlu2 %771  ;;  %903 = vst.msk [vmem:[#allocation2 + $0x398] sm:$0xff] %vm845_vm1, %v768_v20 }
 0x21f   :  { %1172 = vrot.lane.b32.xlu0 %v1009_v23, %s3687_s4  ;;  %905 = vst.msk [vmem:[#allocation2 + $0x3b8] sm:$0xff] %vm845_vm1, %v772_v32  ;;  %v770_v41 = vpop.permute.xlu1 %769  ;;  %v1012_v23 = vmul.f32 %v5717_v51, %v7846_v36  ;;  %v3652_v32 = vld [vmem:[%s7084_s0 + $0x110] sm:$0xff]  ;;  %v7847_v36 = vld [vmem:[#allocation247_spill] sm:$0xff] }
 0x220   :  { %904 = vst.msk [vmem:[#allocation2 + $0x3a8] sm:$0xff] %vm845_vm1, %v770_v41  ;;  %v5732_v22 = vadd.f32 -1.0, %v3652_v32  ;;  %v3653_v41 = vld [vmem:[%s7084_s0 + $0x150] sm:$0xff]  ;;  %v5742_v60 = vadd.f32 -1.0, %v7847_v36 }
 0x221   :  { %v5738_v20 = vadd.f32 -1.0, %v3653_v41 }
 0x223   :  { %v1016_v41 = vmul.f32 %v5738_v20, %v7849_v62 }
 0x224   :  { %1164 = vrot.lane.b32.xlu2 %v1005_v44, %s3687_s4 }
 0x225   :  { %1180 = vrot.lane.b32.xlu1 %v1013_v4, %s3687_s4  ;;  %v774_v32 = vpop.permute.xlu0 %773  ;;  %v1008_v4 = vmul.f32 %v5732_v22, %v7848_v18  ;;  %v3655_v18 = vld [vmem:[%s7084_s0 + $0x168] sm:$0xff] }
 0x226   :  { %v778_v8 = vpop.permute.xlu2 %777  ;;  %906 = vst.msk [vmem:[#allocation2 + $0x3c8] sm:$0xff] %vm845_vm1, %v774_v32  ;;  %v5763_v62 = vadd.f32 -1.0, %v3655_v18 }
 0x227   :  { %1178 = vrot.lane.b32.xlu0 %v1012_v23, %s3687_s4  ;;  %908 = vst.msk [vmem:[#allocation2 + $0x3e8] sm:$0xff] %vm845_vm1, %v778_v8  ;;  %v776_v44 = vpop.permute.xlu1 %775  ;;  %v1015_v23 = vmul.f32 %v5742_v60, %v7850_v7  ;;  %v3654_v8 = vld [vmem:[%s7084_s0 + $0x128] sm:$0xff] }
 0x228   :  { %907 = vst.msk [vmem:[#allocation2 + $0x3d8] sm:$0xff] %vm845_vm1, %v776_v44  ;;  %v5757_v36 = vadd.f32 -1.0, %v3654_v8  ;;  %v7851_v44 = vld [vmem:[#allocation264_spill] sm:$0xff]  ;;  %v1019_v18 = vmul.f32 %v5763_v62, %v7853_v63 }
 0x229   :  { %v5767_v32 = vadd.f32 -1.0, %v7851_v44 }
 0x22c   :  { %1170 = vrot.lane.b32.xlu2 %v1008_v4, %s3687_s4 }
 0x22d   :  { %1186 = vrot.lane.b32.xlu1 %v1016_v41, %s3687_s4  ;;  %v780_v8 = vpop.permute.xlu0 %779  ;;  %v7852_v41 = vld [vmem:[#allocation198_spill] sm:$0xff] }
 0x22e   :  { %v1105_v7 = vpop.permute.xlu2 %1104  ;;  %v1011_v50 = vmul.f32 %v5757_v36, %v7852_v41  ;;  %909 = vst.msk [vmem:[#allocation2 + $0x3f8] sm:$0xff] %vm845_vm1, %v780_v8  ;;  %v7855_v41 = vld [vmem:[#allocation189_spill] sm:$0xff] }
 0x22f   :  { %1184 = vrot.lane.b32.xlu0 %v1015_v23, %s3687_s4  ;;  %1298 = vst.msk [vmem:[#allocation2 + $0x10] sm:$0xff] %vm1294_vm2, %v1105_v7  ;;  %v1103_v4 = vpop.permute.xlu1 %1102  ;;  %v7854_v23 = vld [vmem:[#allocation279_spill] sm:$0xff]  ;;  %v1456_v63 = vmul.f32 %v5656_v55, %v7855_v41  ;;  %v7858_v55 = vld [vmem:[#allocation178_spill] sm:$0xff] }
 0x230   :  { %1299 = vst.msk [vmem:[#allocation2 + $0x18] sm:$0xff] %vm1296_vm3, %v1105_v7  ;;  %v1018_v44 = vmul.f32 %v5767_v32, %v7854_v23  ;;  %v3656_v7 = vld [vmem:[%s7084_s0 + $0x140] sm:$0xff]  ;;  %v5791_v23 = vadd.f32 -1.0, %v7856_v25 }
 0x231   :  { %1295 = vst.msk [vmem:[#allocation2] sm:$0xff] %vm1294_vm2, %v1103_v4  ;;  %v5784_v33 = vadd.f32 -1.0, %v3656_v7  ;;  %v7857_v7 = vld [vmem:[#allocation212_spill] sm:$0xff]  ;;  %v1520_v41 = vmul.f32 %v1456_v63, %v7858_v55 }
 0x232   :  { %1297 = vst.msk [vmem:[#allocation2 + $0x8] sm:$0xff] %vm1296_vm3, %v1103_v4  ;;  %v1021_v10 = vmul.f32 %v5791_v23, %v7860_v19  ;;  %v7863_v55 = vld [vmem:[#allocation224_spill] sm:$0xff] }
 0x233   :  { %v1014_v49 = vmul.f32 %v5784_v33, %v7857_v7 }
 0x234   :  { %1176 = vrot.lane.b32.xlu2 %v1011_v50, %s3687_s4 }
 0x235   :  { %1192 = vrot.lane.b32.xlu1 %v1019_v18, %s3687_s4 }
 0x236   :  { %v1111_v4 = vpop.permute.xlu2 %1110 }
 0x237   :  { %1190 = vrot.lane.b32.xlu0 %v1018_v44, %s3687_s4  ;;  %1304 = vst.msk [vmem:[#allocation2 + $0x40] sm:$0xff] %vm1294_vm2, %v1111_v4  ;;  %v1109_v50 = vpop.permute.xlu1 %1108  ;;  %v2454_v8 = vld [vmem:[#allocation2 + $0x18] sm:$0xff] }
 0x238   :  { %1305 = vst.msk [vmem:[#allocation2 + $0x48] sm:$0xff] %vm1296_vm3, %v1111_v4  ;;  %v7859_v44 = vld [vmem:[#allocation181_spill] sm:$0xff] }
 0x239   :  { %v1107_v61 = vpop.permute.xlu0 %1106  ;;  %1302 = vst.msk [vmem:[#allocation2 + $0x30] sm:$0xff] %vm1294_vm2, %v1109_v50  ;;  %v2452_v18 = vld [vmem:[#allocation2 + $0x8] sm:$0xff]  ;;  %v1457_v1 = vmul.f32 %v5650_v2, %v7859_v44  ;;  %v3657_v4 = vld [vmem:[%s7084_s0 + $0x158] sm:$0xff] }
 0x23a   :  { %1303 = vst.msk [vmem:[#allocation2 + $0x38] sm:$0xff] %vm1296_vm3, %v1109_v50  ;;  %v2580_v25 = vpack.c.bf16 %v2454_v8, %v2452_v18  ;;  %v5810_v7 = vadd.f32 -1.0, %v3657_v4  ;;  %v7861_v2 = vld [vmem:[#allocation177_spill] sm:$0xff]  ;;  %v7862_v8 = vld [vmem:[#allocation179_spill] sm:$0xff] }
 0x23b   :  { %1300 = vst.msk [vmem:[#allocation2 + $0x20] sm:$0xff] %vm1294_vm2, %v1107_v61  ;;  %v5814_v50 = vmul.f32 %v7861_v2, %v1457_v1 }
 0x23c   :  { %1301 = vst.msk [vmem:[#allocation2 + $0x28] sm:$0xff] %vm1296_vm3, %v1107_v61  ;;  %2948 = vmatmul.bf16.vlgmr.msra.gmra.mxu1 %v2580_v25  ;;  %1182 = vrot.lane.b32.xlu2 %v1014_v49, %s3687_s4  ;;  %v5818_v61 = vmul.f32 %v7862_v8, %v1456_v63  ;;  %v1017_v44 = vmul.f32 %v5810_v7, %v7863_v55  ;;  %v7864_v25 = vld [vmem:[#allocation16_spill] sm:$0xff]  ;;  %v7867_v8 = vld [vmem:[#allocation13_spill] sm:$0xff] }
 0x23d   :  { %1680 = vrot.lane.b32.xlu1 %v1520_v41, %s3688_s24  ;;  %v1424_v41 = vmul.f32 %v5323_v27, %v7864_v25  ;;  %v7866_v63 = vld [vmem:[#allocation172_spill] sm:$0xff]  ;;  %v7868_v25 = vld [vmem:[#allocation29_spill] sm:$0xff] }
 0x23e   :  { %v1117_v19 = vpop.permute.xlu2 %1116  ;;  %v1969_v2 = vmul.f32 %v7866_v63, %v5818_v61  ;;  %v3658_v27 = vld [vmem:[%s7084_s0 + $0x170] sm:$0xff] }
 0x23f   :  { %1196 = vrot.lane.b32.xlu0 %v1021_v10, %s3687_s4  ;;  %1310 = vst.msk [vmem:[#allocation2 + $0x70] sm:$0xff] %vm1294_vm2, %v1117_v19  ;;  %v1115_v49 = vpop.permute.xlu1 %1114  ;;  %v7865_v10 = vld [vmem:[#allocation168_spill] sm:$0xff] }
 0x240   :  { %1311 = vst.msk [vmem:[#allocation2 + $0x78] sm:$0xff] %vm1296_vm3, %v1117_v19  ;;  %v1970_v4 = vmul.f32 %v7865_v10, %v5814_v50  ;;  %v5838_v19 = vadd.f32 -1.0, %v3658_v27 }
 0x241   :  { %v1113_v18 = vpop.permute.xlu0 %1112  ;;  %1308 = vst.msk [vmem:[#allocation2 + $0x60] sm:$0xff] %vm1294_vm2, %v1115_v49  ;;  %v2458_v63 = vld [vmem:[#allocation2 + $0x38] sm:$0xff] }
 0x242   :  { %1309 = vst.msk [vmem:[#allocation2 + $0x68] sm:$0xff] %vm1296_vm3, %v1115_v49  ;;  %v5842_v49 = vmul.f32 %v7867_v8, %v1424_v41  ;;  %v7870_v8 = vld [vmem:[#allocation9_spill] sm:$0xff] }
 0x243   :  { %1306 = vst.msk [vmem:[#allocation2 + $0x50] sm:$0xff] %vm1294_vm2, %v1113_v18  ;;  %v2456_v10 = vld [vmem:[#allocation2 + $0x28] sm:$0xff] }
 0x244   :  { %1307 = vst.msk [vmem:[#allocation2 + $0x58] sm:$0xff] %vm1296_vm3, %v1113_v18  ;;  %1188 = vrot.lane.b32.xlu2 %v1017_v44, %s3687_s4  ;;  %v1425_v18 = vmul.f32 %v5414_v31, %v7868_v25  ;;  %v2582_v21 = vpack.c.bf16 %v2458_v63, %v2456_v10  ;;  %v7871_v31 = vld [vmem:[#allocation23_spill] sm:$0xff] }
 0x245   :  { %2131 = vrot.lane.b32.xlu1 %v1970_v4, %s3689_s27  ;;  %v1020_v4 = vmul.f32 %v5838_v19, %v7869_v24  ;;  %v7872_v24 = vld [vmem:[#allocation207_spill] sm:$0xff] }
 0x246   :  { %v1123_v55 = vpop.permute.xlu2 %1122  ;;  %v1489_v25 = vmul.f32 %v1425_v18, %v7871_v31 }
 0x247   :  { %2129 = vrot.lane.b32.xlu0 %v1969_v2, %s3689_s27  ;;  %1316 = vst.msk [vmem:[#allocation2 + $0xa0] sm:$0xff] %vm1294_vm2, %v1123_v55  ;;  %v1121_v44 = vpop.permute.xlu1 %1120  ;;  %v1937_v2 = vmul.f32 %v7870_v8, %v5842_v49 }
 0x248   :  { %1317 = vst.msk [vmem:[#allocation2 + $0xa8] sm:$0xff] %vm1296_vm3, %v1123_v55  ;;  %v1459_v55 = vmul.f32 %v5689_v38, %v7872_v24  ;;  %v7876_v38 = vld [vmem:[#allocation174_spill] sm:$0xff] }
 0x249   :  { %v1119_v27 = vpop.permute.xlu0 %1118  ;;  %1314 = vst.msk [vmem:[#allocation2 + $0x90] sm:$0xff] %vm1294_vm2, %v1121_v44 }
 0x24a   :  { %1315 = vst.msk [vmem:[#allocation2 + $0x98] sm:$0xff] %vm1296_vm3, %v1121_v44  ;;  %v1458_v44 = vmul.f32 %v5732_v22, %v7873_v15  ;;  %v7877_v15 = vld [vmem:[#allocation12_spill] sm:$0xff] }
 0x24b   :  { %1312 = vst.msk [vmem:[#allocation2 + $0x80] sm:$0xff] %vm1294_vm2, %v1119_v27  ;;  %v1426_v22 = vmul.f32 %v5368_v57, %v7877_v15  ;;  %v7880_v57 = vld [vmem:[#allocation11_spill] sm:$0xff]  ;;  %v7882_v15 = vld [vmem:[#allocation190_spill] sm:$0xff] }
 0x24c   :  { %1313 = vst.msk [vmem:[#allocation2 + $0x88] sm:$0xff] %vm1296_vm3, %v1119_v27  ;;  %2953 = vmatmul.bf16.gmra.mxu1 %v2582_v21  ;;  %1194 = vrot.lane.b32.xlu2 %v1020_v4, %s3687_s4  ;;  %v7874_v21 = vld [vmem:[#allocation176_spill] sm:$0xff]  ;;  %v1522_v31 = vmul.f32 %v1458_v44, %v7876_v38  ;;  %v7881_v38 = vld [vmem:[#allocation26_spill] sm:$0xff] }
 0x24d   :  { %2065 = vrot.lane.b32.xlu1 %v1937_v2, %s3689_s27  ;;  %v1521_v27 = vmul.f32 %v1457_v1, %v7874_v21  ;;  %v7875_v4 = vld [vmem:[#allocation196_spill] sm:$0xff]  ;;  %v2462_v21 = vld [vmem:[#allocation2 + $0x58] sm:$0xff] }
 0x24e   :  { %v1129_v8 = vpop.permute.xlu2 %1128  ;;  %v1523_v2 = vmul.f32 %v1459_v55, %v7875_v4 }
 0x24f   :  { %1618 = vrot.lane.b32.xlu0 %v1489_v25, %s3688_s24  ;;  %1322 = vst.msk [vmem:[#allocation2 + $0xd0] sm:$0xff] %vm1294_vm2, %v1129_v8  ;;  %v1127_v10 = vpop.permute.xlu1 %1126  ;;  %v7878_v25 = vld [vmem:[#allocation197_spill] sm:$0xff] }
 0x250   :  { %1323 = vst.msk [vmem:[#allocation2 + $0xd8] sm:$0xff] %vm1296_vm3, %v1129_v8  ;;  %v5880_v24 = vmul.f32 %v7878_v25, %v1459_v55 }
 0x251   :  { %v1125_v63 = vpop.permute.xlu0 %1124  ;;  %1320 = vst.msk [vmem:[#allocation2 + $0xc0] sm:$0xff] %vm1294_vm2, %v1127_v10 }
 0x252   :  { %1321 = vst.msk [vmem:[#allocation2 + $0xc8] sm:$0xff] %vm1296_vm3, %v1127_v10  ;;  %v2460_v10 = vld [vmem:[#allocation2 + $0x48] sm:$0xff]  ;;  %v1972_v25 = vmul.f32 %v7882_v15, %v5880_v24 }
 0x253   :  { %1318 = vst.msk [vmem:[#allocation2 + $0xb0] sm:$0xff] %vm1294_vm2, %v1125_v63  ;;  %v2584_v55 = vpack.c.bf16 %v2462_v21, %v2460_v10  ;;  %v7885_v10 = vld [vmem:[#allocation8_spill] sm:$0xff] }
 0x254   :  { %1319 = vst.msk [vmem:[#allocation2 + $0xb8] sm:$0xff] %vm1296_vm3, %v1125_v63  ;;  %1682 = vrot.lane.b32.xlu2 %v1521_v27, %s3688_s24  ;;  %v7879_v27 = vld [vmem:[#allocation15_spill] sm:$0xff]  ;;  %v5904_v21 = vmul.f32 %v7885_v10, %v1426_v22 }
 0x255   :  { %1686 = vrot.lane.b32.xlu1 %v1523_v2, %s3688_s24  ;;  %v1488_v4 = vmul.f32 %v1424_v41, %v7879_v27  ;;  %v1490_v2 = vmul.f32 %v1426_v22, %v7880_v57  ;;  %v7883_v41 = vld [vmem:[#allocation22_spill] sm:$0xff] }
 0x256   :  { %v1135_v1 = vpop.permute.xlu2 %1134  ;;  %v7884_v27 = vld [vmem:[#allocation18_spill] sm:$0xff] }
 0x257   :  { %1684 = vrot.lane.b32.xlu0 %v1522_v31, %s3688_s24  ;;  %1328 = vst.msk [vmem:[#allocation2 + $0x100] sm:$0xff] %vm1294_vm2, %v1135_v1  ;;  %v1133_v8 = vpop.permute.xlu1 %1132  ;;  %v1427_v31 = vmul.f32 %v5363_v42, %v7881_v38  ;;  %v7889_v22 = vld [vmem:[#allocation6_spill] sm:$0xff] }
 0x258   :  { %1329 = vst.msk [vmem:[#allocation2 + $0x108] sm:$0xff] %vm1296_vm3, %v1135_v1  ;;  %v5896_v1 = vmul.f32 %v7883_v41, %v1425_v18  ;;  %v7886_v18 = vld [vmem:[#allocation19_spill] sm:$0xff] }
 0x259   :  { %v1131_v63 = vpop.permute.xlu0 %1130  ;;  %1326 = vst.msk [vmem:[#allocation2 + $0xf0] sm:$0xff] %vm1294_vm2, %v1133_v8  ;;  %v5900_v42 = vmul.f32 %v7884_v27, %v1427_v31  ;;  %v7890_v41 = vld [vmem:[#allocation175_spill] sm:$0xff] }
 0x25a   :  { %1327 = vst.msk [vmem:[#allocation2 + $0xf8] sm:$0xff] %vm1296_vm3, %v1133_v8  ;;  %v1938_v57 = vmul.f32 %v7886_v18, %v5896_v1  ;;  %v5922_v27 = vmul.f32 %v7890_v41, %v1458_v44  ;;  %v2476_v40 = vld [vmem:[#allocation2 + $0xc8] sm:$0xff] }
 0x25b   :  { %1324 = vst.msk [vmem:[#allocation2 + $0xe0] sm:$0xff] %vm1294_vm2, %v1131_v63 }
 0x25c   :  { %1325 = vst.msk [vmem:[#allocation2 + $0xe8] sm:$0xff] %vm1296_vm3, %v1131_v63  ;;  %2958 = vmatmul.bf16.gmra.mxu1 %v2584_v55  ;;  %1616 = vrot.lane.b32.xlu2 %v1488_v4, %s3688_s24  ;;  %v7888_v55 = vld [vmem:[#allocation203_spill] sm:$0xff] }
 0x25d   :  { %1620 = vrot.lane.b32.xlu1 %v1490_v2, %s3688_s24  ;;  %v7887_v2 = vld [vmem:[#allocation14_spill] sm:$0xff]  ;;  %v1460_v15 = vmul.f32 %v5683_v34, %v7888_v55  ;;  %v2466_v55 = vld [vmem:[#allocation2 + $0x78] sm:$0xff] }
 0x25e   :  { %v1141_v8 = vpop.permute.xlu2 %1140  ;;  %v1940_v38 = vmul.f32 %v7887_v2, %v5900_v42 }
 0x25f   :  { %2135 = vrot.lane.b32.xlu0 %v1972_v25, %s3689_s27  ;;  %1334 = vst.msk [vmem:[#allocation2 + $0x130] sm:$0xff] %vm1294_vm2, %v1141_v8  ;;  %v1139_v63 = vpop.permute.xlu1 %1138  ;;  %v1939_v25 = vmul.f32 %v7889_v22, %v5904_v21  ;;  %v7894_v22 = vld [vmem:[#allocation186_spill] sm:$0xff] }
 0x260   :  { %1335 = vst.msk [vmem:[#allocation2 + $0x138] sm:$0xff] %vm1296_vm3, %v1141_v8  ;;  %v7891_v8 = vld [vmem:[#allocation195_spill] sm:$0xff] }
 0x261   :  { %v1137_v4 = vpop.permute.xlu0 %1136  ;;  %1332 = vst.msk [vmem:[#allocation2 + $0x120] sm:$0xff] %vm1294_vm2, %v1139_v63  ;;  %v5926_v10 = vmul.f32 %v7891_v8, %v1460_v15 }
 0x262   :  { %1333 = vst.msk [vmem:[#allocation2 + $0x128] sm:$0xff] %vm1296_vm3, %v1139_v63  ;;  %v7892_v63 = vld [vmem:[#allocation199_spill] sm:$0xff] }
 0x263   :  { %1330 = vst.msk [vmem:[#allocation2 + $0x110] sm:$0xff] %vm1294_vm2, %v1137_v4  ;;  %v1461_v18 = vmul.f32 %v5757_v36, %v7892_v63  ;;  %v7895_v36 = vld [vmem:[#allocation192_spill] sm:$0xff] }
 0x264   :  { %1331 = vst.msk [vmem:[#allocation2 + $0x118] sm:$0xff] %vm1296_vm3, %v1137_v4  ;;  %2067 = vrot.lane.b32.xlu2 %v1938_v57, %s3689_s27  ;;  %v2464_v4 = vld [vmem:[#allocation2 + $0x68] sm:$0xff]  ;;  %v7893_v57 = vld [vmem:[#allocation166_spill] sm:$0xff] }
 0x265   :  { %2071 = vrot.lane.b32.xlu1 %v1940_v38, %s3689_s27  ;;  %v1971_v38 = vmul.f32 %v7893_v57, %v5922_v27  ;;  %v2586_v41 = vpack.c.bf16 %v2466_v55, %v2464_v4  ;;  %v1525_v8 = vmul.f32 %v1461_v18, %v7895_v36  ;;  %v7897_v57 = vld [vmem:[#allocation38_spill] sm:$0xff] }
 0x266   :  { %v1147_v34 = vpop.permute.xlu2 %1146 }
 0x267   :  { %2069 = vrot.lane.b32.xlu0 %v1939_v25, %s3689_s27  ;;  %1340 = vst.msk [vmem:[#allocation2 + $0x160] sm:$0xff] %vm1294_vm2, %v1147_v34  ;;  %v1145_v2 = vpop.permute.xlu1 %1144  ;;  %v1973_v25 = vmul.f32 %v7894_v22, %v5926_v10  ;;  %v1428_v22 = vmul.f32 %v5440_v26, %v7897_v57  ;;  %v7901_v26 = vld [vmem:[#allocation238_spill] sm:$0xff] }
 0x268   :  { %1341 = vst.msk [vmem:[#allocation2 + $0x168] sm:$0xff] %vm1296_vm3, %v1147_v34  ;;  %v7896_v34 = vld [vmem:[#allocation49_spill] sm:$0xff] }
 0x269   :  { %v1143_v44 = vpop.permute.xlu0 %1142  ;;  %1338 = vst.msk [vmem:[#allocation2 + $0x150] sm:$0xff] %vm1294_vm2, %v1145_v2  ;;  %v1429_v63 = vmul.f32 %v5401_v43, %v7896_v34  ;;  %v7900_v43 = vld [vmem:[#allocation37_spill] sm:$0xff] }
 0x26a   :  { %1339 = vst.msk [vmem:[#allocation2 + $0x158] sm:$0xff] %vm1296_vm3, %v1145_v2  ;;  %v1492_v36 = vmul.f32 %v1428_v22, %v7900_v43  ;;  %v7902_v34 = vld [vmem:[#allocation45_spill] sm:$0xff] }
 0x26b   :  { %1336 = vst.msk [vmem:[#allocation2 + $0x140] sm:$0xff] %vm1294_vm2, %v1143_v44  ;;  %v5964_v57 = vmul.f32 %v7902_v34, %v1429_v63  ;;  %v7905_v43 = vld [vmem:[#allocation217_spill] sm:$0xff] }
 0x26c   :  { %1337 = vst.msk [vmem:[#allocation2 + $0x148] sm:$0xff] %vm1296_vm3, %v1143_v44  ;;  %2963 = vmatmul.bf16.gmra.mxu1 %v2586_v41  ;;  %2133 = vrot.lane.b32.xlu2 %v1971_v38, %s3689_s27  ;;  %v7898_v44 = vld [vmem:[#allocation20_spill] sm:$0xff] }
 0x26d   :  { %2137 = vrot.lane.b32.xlu1 %v1973_v25, %s3689_s27  ;;  %v1491_v41 = vmul.f32 %v1427_v31, %v7898_v44  ;;  %v7899_v38 = vld [vmem:[#allocation48_spill] sm:$0xff]  ;;  %v2470_v44 = vld [vmem:[#allocation2 + $0x98] sm:$0xff] }
 0x26e   :  { %v1153_v2 = vpop.permute.xlu2 %1152  ;;  %v1493_v25 = vmul.f32 %v1429_v63, %v7899_v38 }
 0x26f   :  { %1690 = vrot.lane.b32.xlu0 %v1525_v8, %s3688_s24  ;;  %1346 = vst.msk [vmem:[#allocation2 + $0x190] sm:$0xff] %vm1294_vm2, %v1153_v2  ;;  %v1151_v4 = vpop.permute.xlu1 %1150  ;;  %v1462_v8 = vmul.f32 %v5717_v51, %v7901_v26  ;;  %v7906_v26 = vld [vmem:[#allocation42_spill] sm:$0xff] }
 0x270   :  { %1347 = vst.msk [vmem:[#allocation2 + $0x198] sm:$0xff] %vm1296_vm3, %v1153_v2  ;;  %v1942_v34 = vmul.f32 %v7906_v26, %v5964_v57 }
 0x271   :  { %v1149_v55 = vpop.permute.xlu0 %1148  ;;  %1344 = vst.msk [vmem:[#allocation2 + $0x180] sm:$0xff] %vm1294_vm2, %v1151_v4 }
 0x272   :  { %1345 = vst.msk [vmem:[#allocation2 + $0x188] sm:$0xff] %vm1296_vm3, %v1151_v4  ;;  %v2468_v4 = vld [vmem:[#allocation2 + $0x88] sm:$0xff] }
 0x273   :  { %1342 = vst.msk [vmem:[#allocation2 + $0x170] sm:$0xff] %vm1294_vm2, %v1149_v55  ;;  %v2588_v63 = vpack.c.bf16 %v2470_v44, %v2468_v4  ;;  %v7909_v4 = vld [vmem:[#allocation236_spill] sm:$0xff] }
 0x274   :  { %1343 = vst.msk [vmem:[#allocation2 + $0x178] sm:$0xff] %vm1296_vm3, %v1149_v55  ;;  %1622 = vrot.lane.b32.xlu2 %v1491_v41, %s3688_s24  ;;  %v7903_v41 = vld [vmem:[#allocation194_spill] sm:$0xff]  ;;  %v5991_v44 = vmul.f32 %v7909_v4, %v1462_v8 }
 0x275   :  { %1626 = vrot.lane.b32.xlu1 %v1493_v25, %s3688_s24  ;;  %v1524_v38 = vmul.f32 %v1460_v15, %v7903_v41  ;;  %v7904_v25 = vld [vmem:[#allocation235_spill] sm:$0xff]  ;;  %v7907_v15 = vld [vmem:[#allocation193_spill] sm:$0xff] }
 0x276   :  { %v1159_v31 = vpop.permute.xlu2 %1158  ;;  %v1526_v51 = vmul.f32 %v1462_v8, %v7904_v25  ;;  %v7913_v8 = vld [vmem:[#allocation229_spill] sm:$0xff] }
 0x277   :  { %1624 = vrot.lane.b32.xlu0 %v1492_v36, %s3688_s24  ;;  %1352 = vst.msk [vmem:[#allocation2 + $0x1c0] sm:$0xff] %vm1294_vm2, %v1159_v31  ;;  %v1157_v2 = vpop.permute.xlu1 %1156  ;;  %v5973_v36 = vmul.f32 %v5713_v56, %v7905_v43  ;;  %v7908_v56 = vld [vmem:[#allocation211_spill] sm:$0xff] }
 0x278   :  { %1353 = vst.msk [vmem:[#allocation2 + $0x1c8] sm:$0xff] %vm1296_vm3, %v1159_v31  ;;  %v5982_v31 = vmul.f32 %v7907_v15, %v1461_v18  ;;  %v7910_v18 = vld [vmem:[#allocation184_spill] sm:$0xff] }
 0x279   :  { %v1155_v55 = vpop.permute.xlu0 %1154  ;;  %1350 = vst.msk [vmem:[#allocation2 + $0x1b0] sm:$0xff] %vm1294_vm2, %v1157_v2  ;;  %v5987_v41 = vmul.f32 %v7908_v56, %v5973_v36  ;;  %v7914_v15 = vld [vmem:[#allocation36_spill] sm:$0xff] }
 0x27a   :  { %1351 = vst.msk [vmem:[#allocation2 + $0x1b8] sm:$0xff] %vm1296_vm3, %v1157_v2  ;;  %v1974_v25 = vmul.f32 %v7910_v18, %v5982_v31  ;;  %v6011_v56 = vmul.f32 %v7914_v15, %v1428_v22 }
 0x27b   :  { %1348 = vst.msk [vmem:[#allocation2 + $0x1a0] sm:$0xff] %vm1294_vm2, %v1155_v55 }
 0x27c   :  { %1349 = vst.msk [vmem:[#allocation2 + $0x1a8] sm:$0xff] %vm1296_vm3, %v1155_v55  ;;  %2968 = vmatmul.bf16.gmra.mxu1 %v2588_v63  ;;  %1688 = vrot.lane.b32.xlu2 %v1524_v38, %s3688_s24  ;;  %v7912_v63 = vld [vmem:[#allocation40_spill] sm:$0xff] }
 0x27d   :  { %1692 = vrot.lane.b32.xlu1 %v1526_v51, %s3688_s24  ;;  %v7911_v51 = vld [vmem:[#allocation204_spill] sm:$0xff]  ;;  %v6002_v26 = vmul.f32 %v5394_v5, %v7912_v63  ;;  %v7917_v63 = vld [vmem:[#allocation31_spill] sm:$0xff] }
 0x27e   :  { %v1165_v2 = vpop.permute.xlu2 %1164  ;;  %v1976_v43 = vmul.f32 %v7911_v51, %v5987_v41  ;;  %v2474_v51 = vld [vmem:[#allocation2 + $0xb8] sm:$0xff] }
 0x27f   :  { %2075 = vrot.lane.b32.xlu0 %v1942_v34, %s3689_s27  ;;  %1358 = vst.msk [vmem:[#allocation2 + $0x1f0] sm:$0xff] %vm1294_vm2, %v1165_v2  ;;  %v1163_v55 = vpop.permute.xlu1 %1162  ;;  %v1975_v34 = vmul.f32 %v7913_v8, %v5991_v44  ;;  %v1941_v8 = vmul.f32 %v7917_v63, %v6011_v56 }
 0x280   :  { %1359 = vst.msk [vmem:[#allocation2 + $0x1f8] sm:$0xff] %vm1296_vm3, %v1165_v2  ;;  %v7915_v2 = vld [vmem:[#allocation35_spill] sm:$0xff] }
 0x281   :  { %v1161_v38 = vpop.permute.xlu0 %1160  ;;  %1356 = vst.msk [vmem:[#allocation2 + $0x1e0] sm:$0xff] %vm1294_vm2, %v1163_v55  ;;  %v6016_v5 = vmul.f32 %v7915_v2, %v6002_v26  ;;  %v7919_v2 = vld [vmem:[#allocation33_spill] sm:$0xff] }
 0x282   :  { %1357 = vst.msk [vmem:[#allocation2 + $0x1e8] sm:$0xff] %vm1296_vm3, %v1163_v55  ;;  %v7916_v55 = vld [vmem:[#allocation39_spill] sm:$0xff] }
 0x283   :  { %1354 = vst.msk [vmem:[#allocation2 + $0x1d0] sm:$0xff] %vm1294_vm2, %v1161_v38  ;;  %v6021_v18 = vmul.f32 %v5468_v47, %v7916_v55  ;;  %v7918_v47 = vld [vmem:[#allocation27_spill] sm:$0xff] }
 0x284   :  { %1355 = vst.msk [vmem:[#allocation2 + $0x1d8] sm:$0xff] %vm1296_vm3, %v1161_v38  ;;  %2139 = vrot.lane.b32.xlu2 %v1974_v25, %s3689_s27  ;;  %v3582_v38 = vld [vmem:[%s7085_s1 + $0x38] sm:$0xff]  ;;  %v2472_v25 = vld [vmem:[#allocation2 + $0xa8] sm:$0xff] }
 0x285   :  { %2143 = vrot.lane.b32.xlu1 %v1976_v43, %s3689_s27  ;;  %3591 = vmatpush.bf16.msra.mxu2 %v3582_v38  ;;  %v2590_v15 = vpack.c.bf16 %v2474_v51, %v2472_v25  ;;  %v1495_v55 = vmul.f32 %v6021_v18, %v7919_v2  ;;  %v7921_v51 = vld [vmem:[#allocation213_spill] sm:$0xff] }
 0x286   :  { %v1171_v4 = vpop.permute.xlu2 %1170  ;;  %2771 = vmatpush.bf16.msra.mxu0 %v3582_v38  ;;  %v7920_v38 = vld [vmem:[#allocation251_spill] sm:$0xff]  ;;  %v6048_v63 = vmul.f32 %v5784_v33, %v7921_v51  ;;  %v7923_v33 = vld [vmem:[#allocation254_spill] sm:$0xff]  ;;  %v7925_v51 = vld [vmem:[#allocation64_spill] sm:$0xff] }
 0x287   :  { %2141 = vrot.lane.b32.xlu0 %v1975_v34, %s3689_s27  ;;  %1364 = vst.msk [vmem:[#allocation2 + $0x220] sm:$0xff] %vm1294_vm2, %v1171_v4  ;;  %v1169_v22 = vpop.permute.xlu1 %1168  ;;  %v1943_v34 = vmul.f32 %v7918_v47, %v6016_v5 }
 0x288   :  { %1365 = vst.msk [vmem:[#allocation2 + $0x228] sm:$0xff] %vm1296_vm3, %v1171_v4  ;;  %v3581_v4 = vld [vmem:[%s7085_s1 + $0x30] sm:$0xff] }
 0x289   :  { %v1167_v43 = vpop.permute.xlu0 %1166  ;;  %1362 = vst.msk [vmem:[#allocation2 + $0x210] sm:$0xff] %vm1294_vm2, %v1169_v22  ;;  %3592 = vmatpush.bf16.msra.mxu2 %v3581_v4 }
 0x28a   :  { %1363 = vst.msk [vmem:[#allocation2 + $0x218] sm:$0xff] %vm1296_vm3, %v1169_v22  ;;  %v1465_v22 = vmul.f32 %v5742_v60, %v7920_v38  ;;  %2772 = vmatpush.bf16.msra.mxu0 %v3581_v4  ;;  %v7922_v60 = vld [vmem:[#allocation210_spill] sm:$0xff] }
 0x28b   :  { %1360 = vst.msk [vmem:[#allocation2 + $0x200] sm:$0xff] %vm1294_vm2, %v1167_v43 }
 0x28c   :  { %1361 = vst.msk [vmem:[#allocation2 + $0x208] sm:$0xff] %vm1296_vm3, %v1167_v43  ;;  %2973 = vmatmul.bf16.gmra.mxu1 %v2590_v15  ;;  %2073 = vrot.lane.b32.xlu2 %v1941_v8, %s3689_s27  ;;  %v3580_v43 = vld [vmem:[%s7085_s1 + $0x28] sm:$0xff]  ;;  %v1529_v2 = vmul.f32 %v1465_v22, %v7923_v33 }
 0x28d   :  { %2077 = vrot.lane.b32.xlu1 %v1943_v34, %s3689_s27  ;;  %v1527_v34 = vmul.f32 %v5973_v36, %v7922_v60  ;;  %3593 = vmatpush.bf16.msra.mxu2 %v3580_v43  ;;  %v7926_v60 = vld [vmem:[#allocation250_spill] sm:$0xff] }
 0x28e   :  { %v1177_v25 = vpop.permute.xlu2 %1176  ;;  %2773 = vmatpush.bf16.msra.mxu0 %v3580_v43  ;;  %v6072_v33 = vmul.f32 %v7926_v60, %v1465_v22  ;;  %v7930_v60 = vld [vmem:[#allocation248_spill] sm:$0xff] }
 0x28f   :  { %1630 = vrot.lane.b32.xlu0 %v1495_v55, %s3688_s24  ;;  %1370 = vst.msk [vmem:[#allocation2 + $0x250] sm:$0xff] %vm1294_vm2, %v1177_v25  ;;  %v1175_v8 = vpop.permute.xlu1 %1174  ;;  %v7924_v55 = vld [vmem:[#allocation208_spill] sm:$0xff] }
 0x290   :  { %1371 = vst.msk [vmem:[#allocation2 + $0x258] sm:$0xff] %vm1296_vm3, %v1177_v25  ;;  %v1528_v38 = vmul.f32 %v6048_v63, %v7924_v55  ;;  %v3579_v25 = vld [vmem:[%s7085_s1 + $0x20] sm:$0xff] }
 0x291   :  { %v1173_v47 = vpop.permute.xlu0 %1172  ;;  %1368 = vst.msk [vmem:[#allocation2 + $0x240] sm:$0xff] %vm1294_vm2, %v1175_v8  ;;  %v2518_v15 = vld [vmem:[#allocation2 + $0x218] sm:$0xff]  ;;  %3594 = vmatpush.bf16.msra.mxu2 %v3579_v25 }
 0x292   :  { %1369 = vst.msk [vmem:[#allocation2 + $0x248] sm:$0xff] %vm1296_vm3, %v1175_v8  ;;  %v1432_v8 = vmul.f32 %v5427_v6, %v7925_v51  ;;  %2774 = vmatpush.bf16.msra.mxu0 %v3579_v25  ;;  %v1978_v25 = vmul.f32 %v7930_v60, %v6072_v33 }
 0x293   :  { %1366 = vst.msk [vmem:[#allocation2 + $0x230] sm:$0xff] %vm1294_vm2, %v1173_v47  ;;  %v2516_v4 = vld [vmem:[#allocation2 + $0x208] sm:$0xff] }
 0x294   :  { %1367 = vst.msk [vmem:[#allocation2 + $0x238] sm:$0xff] %vm1296_vm3, %v1173_v47  ;;  %v2612_v36 = vpack.c.bf16 %v2518_v15, %v2516_v4  ;;  %1694 = vrot.lane.b32.xlu2 %v1527_v34, %s3688_s24  ;;  %v2478_v47 = vld [vmem:[#allocation2 + $0xd8] sm:$0xff]  ;;  %v7927_v15 = vld [vmem:[#allocation34_spill] sm:$0xff] }
 0x295   :  { %1698 = vrot.lane.b32.xlu1 %v1529_v2, %s3688_s24  ;;  %v3578_v34 = vld [vmem:[%s7085_s1 + $0x18] sm:$0xff]  ;;  %v1494_v22 = vmul.f32 %v6002_v26, %v7927_v15  ;;  %v2592_v51 = vpack.c.bf16 %v2478_v47, %v2476_v40  ;;  %v3577_v26 = vld [vmem:[%s7085_s1 + $0x10] sm:$0xff] }
 0x296   :  { %3028 = vmatmul.bf16.vlgmr.msra.gmra.mxu3 %v2612_v36  ;;  %v1183_v55 = vpop.permute.xlu2 %1182  ;;  %v7928_v2 = vld [vmem:[#allocation61_spill] sm:$0xff]  ;;  %3595 = vmatpush.bf16.msra.mxu2 %v3578_v34  ;;  %v7933_v15 = vld [vmem:[#allocation56_spill] sm:$0xff] }
 0x297   :  { %1696 = vrot.lane.b32.xlu0 %v1528_v38, %s3688_s24  ;;  %1376 = vst.msk [vmem:[#allocation2 + $0x280] sm:$0xff] %vm1294_vm2, %v1183_v55  ;;  %v1181_v43 = vpop.permute.xlu1 %1180  ;;  %v6084_v38 = vmul.f32 %v5420_v0, %v7928_v2  ;;  %v7929_v4 = vld [vmem:[#allocation57_spill] sm:$0xff]  ;;  %2775 = vmatpush.bf16.msra.mxu0 %v3578_v34  ;;  %v7931_v0 = vld [vmem:[#allocation30_spill] sm:$0xff]  ;;  %v6108_v34 = vmul.f32 %v7933_v15, %v1432_v8  ;;  %v7934_v2 = vld [vmem:[#allocation24_spill] sm:$0xff] }
 0x298   :  { %1377 = vst.msk [vmem:[#allocation2 + $0x288] sm:$0xff] %vm1296_vm3, %v1183_v55  ;;  %v1496_v36 = vmul.f32 %v1432_v8, %v7929_v4  ;;  %v6099_v55 = vmul.f32 %v7931_v0, %v6021_v18  ;;  %v7932_v40 = vld [vmem:[#allocation53_spill] sm:$0xff]  ;;  %v3576_v18 = vld [vmem:[%s7085_s1 + $0x8] sm:$0xff] }
 0x299   :  { %v1179_v6 = vpop.permute.xlu0 %1178  ;;  %1374 = vst.msk [vmem:[#allocation2 + $0x270] sm:$0xff] %vm1294_vm2, %v1181_v43  ;;  %v2520_v8 = vld [vmem:[#allocation2 + $0x228] sm:$0xff] }
 0x29a   :  { %1375 = vst.msk [vmem:[#allocation2 + $0x278] sm:$0xff] %vm1296_vm3, %v1181_v43  ;;  %v6104_v43 = vmul.f32 %v7932_v40, %v6084_v38  ;;  %3596 = vmatpush.bf16.msra.mxu2 %v3577_v26  ;;  %v1944_v4 = vmul.f32 %v7934_v2, %v6099_v55  ;;  %v7939_v2 = vld [vmem:[#allocation223_spill] sm:$0xff] }
 0x29b   :  { %1372 = vst.msk [vmem:[#allocation2 + $0x260] sm:$0xff] %vm1294_vm2, %v1179_v6  ;;  %2776 = vmatpush.bf16.msra.mxu0 %v3577_v26  ;;  %v2522_v60 = vld [vmem:[#allocation2 + $0x238] sm:$0xff]  ;;  %v7937_v26 = vld [vmem:[#allocation54_spill] sm:$0xff] }
 0x29c   :  { %1373 = vst.msk [vmem:[#allocation2 + $0x268] sm:$0xff] %vm1296_vm3, %v1179_v6  ;;  %2978 = vmatmul.bf16.gmra.mxu1 %v2592_v51  ;;  %1628 = vrot.lane.b32.xlu2 %v1494_v22, %s3688_s24  ;;  %v1945_v40 = vmul.f32 %v7937_v26, %v6108_v34 }
 0x29d   :  { %1632 = vrot.lane.b32.xlu1 %v1496_v36, %s3688_s24  ;;  %v7935_v36 = vld [vmem:[#allocation227_spill] sm:$0xff] }
 0x29e   :  { %v1189_v47 = vpop.permute.xlu2 %1188  ;;  %v6119_v51 = vmul.f32 %v5738_v20, %v7935_v36  ;;  %3597 = vmatpush.bf16.msra.mxu2 %v3576_v18  ;;  %v2614_v20 = vpack.c.bf16 %v2522_v60, %v2520_v8  ;;  %v2480_v8 = vld [vmem:[#allocation2 + $0xe8] sm:$0xff]  ;;  %v2482_v60 = vld [vmem:[#allocation2 + $0xf8] sm:$0xff] }
 0x29f   :  { %2147 = vrot.lane.b32.xlu0 %v1978_v25, %s3689_s27  ;;  %1382 = vst.msk [vmem:[#allocation2 + $0x2b0] sm:$0xff] %vm1294_vm2, %v1189_v47  ;;  %v1187_v6 = vpop.permute.xlu1 %1186  ;;  %v7936_v25 = vld [vmem:[#allocation46_spill] sm:$0xff]  ;;  %2777 = vmatpush.bf16.msra.mxu0 %v3576_v18  ;;  %v7940_v18 = vld [vmem:[#allocation225_spill] sm:$0xff] }
 0x2a0   :  { %1383 = vst.msk [vmem:[#allocation2 + $0x2b8] sm:$0xff] %vm1296_vm3, %v1189_v47  ;;  %v1946_v0 = vmul.f32 %v7936_v25, %v6104_v43  ;;  %v7938_v47 = vld [vmem:[#allocation209_spill] sm:$0xff]  ;;  %v6140_v36 = vmul.f32 %v7939_v2, %v6119_v51 }
 0x2a1   :  { %v1185_v22 = vpop.permute.xlu0 %1184  ;;  %1380 = vst.msk [vmem:[#allocation2 + $0x2a0] sm:$0xff] %vm1294_vm2, %v1187_v6  ;;  %v6132_v15 = vmul.f32 %v7938_v47, %v6048_v63  ;;  %v7943_v47 = vld [vmem:[#allocation220_spill] sm:$0xff] }
 0x2a2   :  { %1381 = vst.msk [vmem:[#allocation2 + $0x2a8] sm:$0xff] %vm1296_vm3, %v1187_v6  ;;  %v3575_v6 = vld [vmem:[%s7085_s1] sm:$0xff]  ;;  %s3690_s1 = smov [#allocation3]  }
 0x2a3   :  { %1378 = vst.msk [vmem:[#allocation2 + $0x290] sm:$0xff] %vm1294_vm2, %v1185_v22  ;;  %3598 = vmatpush.bf16.msra.mxu2 %v3575_v6  ;;  %2778 = vmatpush.bf16.msra.mxu0 %v3575_v6  ;;  %v7944_v6 = vld [vmem:[#allocation79_spill] sm:$0xff] }
 0x2a4   :  { %1379 = vst.msk [vmem:[#allocation2 + $0x298] sm:$0xff] %vm1296_vm3, %v1185_v22  ;;  %2079 = vrot.lane.b32.xlu2 %v1944_v4, %s3689_s27  ;;  %v6144_v22 = vmul.f32 %v5810_v7, %v7940_v18  ;;  %v7942_v7 = vld [vmem:[#allocation218_spill] sm:$0xff]  ;;  %v1435_v18 = vmul.f32 %v5454_v11, %v7944_v6  ;;  %v2524_v11 = vld [vmem:[#allocation2 + $0x248] sm:$0xff] }
 0x2a5   :  { %2083 = vrot.lane.b32.xlu1 %v1946_v0, %s3689_s27  ;;  %v7941_v0 = vld [vmem:[#allocation200_spill] sm:$0xff]  ;;  %v7949_v6 = vld [vmem:[#allocation271_spill] sm:$0xff] }
 0x2a6   :  { %3033 = vmatmul.bf16.gmra.mxu3 %v2614_v20  ;;  %v1195_v4 = vpop.permute.xlu2 %1194  ;;  %v1977_v26 = vmul.f32 %v7941_v0, %v6132_v15  ;;  %v1979_v20 = vmul.f32 %v7942_v7, %v6140_v36  ;;  %v1531_v2 = vmul.f32 %v6144_v22, %v7943_v47  ;;  %v7946_v0 = vld [vmem:[#allocation52_spill] sm:$0xff]  ;;  %v2526_v7 = vld [vmem:[#allocation2 + $0x258] sm:$0xff] }
 0x2a7   :  { %2081 = vrot.lane.b32.xlu0 %v1945_v40, %s3689_s27  ;;  %1388 = vst.msk [vmem:[#allocation2 + $0x2e0] sm:$0xff] %vm1294_vm2, %v1195_v4  ;;  %v1193_v63 = vpop.permute.xlu1 %1192  ;;  %v2594_v40 = vpack.c.bf16 %v2482_v60, %v2480_v8 }
 0x2a8   :  { %1389 = vst.msk [vmem:[#allocation2 + $0x2e8] sm:$0xff] %vm1296_vm3, %v1195_v4  ;;  %v7945_v4 = vld [vmem:[#allocation58_spill] sm:$0xff] }
 0x2a9   :  { %v1191_v25 = vpop.permute.xlu0 %1190  ;;  %1386 = vst.msk [vmem:[#allocation2 + $0x2d0] sm:$0xff] %vm1294_vm2, %v1193_v63 }
 0x2aa   :  { %1387 = vst.msk [vmem:[#allocation2 + $0x2d8] sm:$0xff] %vm1296_vm3, %v1193_v63  ;;  %v6165_v63 = vmul.f32 %v5494_v52, %v7945_v4  ;;  %v7948_v52 = vld [vmem:[#allocation50_spill] sm:$0xff]  ;;  %v1468_v4 = vmul.f32 %v5767_v32, %v7949_v6 }
 0x2ab   :  { %1384 = vst.msk [vmem:[#allocation2 + $0x2c0] sm:$0xff] %vm1294_vm2, %v1191_v25 }
 0x2ac   :  { %1385 = vst.msk [vmem:[#allocation2 + $0x2c8] sm:$0xff] %vm1296_vm3, %v1191_v25  ;;  %2983 = vmatmul.bf16.gmra.mxu1 %v2594_v40  ;;  %2145 = vrot.lane.b32.xlu2 %v1977_v26, %s3689_s27  ;;  %v1497_v26 = vmul.f32 %v6084_v38, %v7946_v0  ;;  %v1498_v47 = vmul.f32 %v6165_v63, %v7948_v52 }
 0x2ad   :  { %2149 = vrot.lane.b32.xlu1 %v1979_v20, %s3689_s27  ;;  %v7947_v20 = vld [vmem:[#allocation71_spill] sm:$0xff] }
 0x2ae   :  { %v1683_v8 = vpop.permute.xlu2 %1682  ;;  %v1499_v40 = vmul.f32 %v1435_v18, %v7947_v20  ;;  %v2486_v20 = vld [vmem:[#allocation2 + $0x118] sm:$0xff] }
 0x2af   :  { %1702 = vrot.lane.b32.xlu0 %v1531_v2, %s3688_s24  ;;  %1842 = vst.msk [vmem:[#allocation2 + $0x210] sm:$0xff] %vm1808_vm4, %v1683_v8  ;;  %v1681_v60 = vpop.permute.xlu1 %1680  ;;  %v2616_v2 = vpack.c.bf16 %v2526_v7, %v2524_v11  ;;  %v7950_v8 = vld [vmem:[#allocation169_spill] sm:$0xff]  ;;  %v2484_v7 = vld [vmem:[#allocation2 + $0x108] sm:$0xff] }
 0x2b0   :  { %1841 = vst.msk [vmem:[#allocation2 + $0x200] sm:$0xff] %vm1808_vm4, %v1681_v60  ;;  %v2355_v38 = vmul.f32 %v7950_v8, %v5814_v50  ;;  %v7952_v11 = vld [vmem:[#allocation173_spill] sm:$0xff] }
 0x2b1   :  { %v1197_v25 = vpop.permute.xlu0 %1196  ;;  %v7956_v8 = vld [vmem:[#allocation65_spill] sm:$0xff] }
 0x2b2   :  { %1390 = vst.msk [vmem:[#allocation2 + $0x2f0] sm:$0xff] %vm1294_vm2, %v1197_v25 }
 0x2b3   :  { %1391 = vst.msk [vmem:[#allocation2 + $0x2f8] sm:$0xff] %vm1296_vm3, %v1197_v25  ;;  %v7951_v25 = vld [vmem:[#allocation72_spill] sm:$0xff] }
 0x2b4   :  { %1634 = vrot.lane.b32.xlu2 %v1497_v26, %s3688_s24  ;;  %v6185_v0 = vmul.f32 %v7951_v25, %v1435_v18  ;;  %v2354_v26 = vmul.f32 %v7952_v11, %v5818_v61  ;;  %v7955_v18 = vld [vmem:[#allocation273_spill] sm:$0xff]  ;;  %v2596_v61 = vpack.c.bf16 %v2486_v20, %v2484_v7  ;;  %v7959_v11 = vld [vmem:[#allocation243_spill] sm:$0xff] }
 0x2b5   :  { %1638 = vrot.lane.b32.xlu1 %v1499_v40, %s3688_s24  ;;  %v7953_v40 = vld [vmem:[#allocation222_spill] sm:$0xff]  ;;  %v1532_v6 = vmul.f32 %v1468_v4, %v7955_v18 }
 0x2b6   :  { %3038 = vmatmul.bf16.gmra.mxu3 %v2616_v2  ;;  %v1617_v60 = vpop.permute.xlu2 %1616  ;;  %v1530_v52 = vmul.f32 %v6119_v51, %v7953_v40  ;;  %v7957_v51 = vld [vmem:[#allocation221_spill] sm:$0xff] }
 0x2b7   :  { %1636 = vrot.lane.b32.xlu0 %v1498_v47, %s3688_s24  ;;  %1809 = vst.msk [vmem:[#allocation2] sm:$0xff] %vm1808_vm4, %v1617_v60  ;;  %v2132_v32 = vpop.permute.xlu1 %2131  ;;  %v7954_v47 = vld [vmem:[#allocation244_spill] sm:$0xff]  ;;  %v1948_v60 = vmul.f32 %v7956_v8, %v6185_v0  ;;  %v6206_v25 = vmul.f32 %v7957_v51, %v6144_v22  ;;  %v7961_v40 = vld [vmem:[#allocation21_spill] sm:$0xff]  ;;  %v2528_v8 = vld [vmem:[#allocation2 + $0x268] sm:$0xff] }
 0x2b8   :  { %2291 = vst.msk [vmem:[#allocation2 + $0x210] sm:$0xff] %vm2257_vm5, %v2132_v32  ;;  %v6195_v2 = vmul.f32 %v5763_v62, %v7954_v47  ;;  %v7958_v62 = vld [vmem:[#allocation10_spill] sm:$0xff]  ;;  %v2323_v22 = vmul.f32 %v7961_v40, %v5896_v1 }
 0x2b9   :  { %v2130_v50 = vpop.permute.xlu0 %2129  ;;  %2420 = vst.msk [vmem:[#allocation2 + $0x210] sm:$0xff] %vm2386_vm6, %v2355_v38  ;;  %v2322_v38 = vmul.f32 %v7958_v62, %v5842_v49  ;;  %v7962_v47 = vld [vmem:[#allocation214_spill] sm:$0xff]  ;;  %v7965_v62 = vld [vmem:[#allocation267_spill] sm:$0xff] }
 0x2ba   :  { %2290 = vst.msk [vmem:[#allocation2 + $0x200] sm:$0xff] %vm2257_vm5, %v2130_v50  ;;  %v6213_v32 = vmul.f32 %v7959_v11, %v6195_v2  ;;  %v1980_v18 = vmul.f32 %v7962_v47, %v6206_v25  ;;  %v7967_v40 = vld [vmem:[#allocation70_spill] sm:$0xff]  ;;  %v7968_v47 = vld [vmem:[#allocation73_spill] sm:$0xff] }
 0x2bb   :  { %2419 = vst.msk [vmem:[#allocation2 + $0x200] sm:$0xff] %vm2386_vm6, %v2354_v26  ;;  %v7960_v26 = vld [vmem:[#allocation270_spill] sm:$0xff] }
 0x2bc   :  { %2988 = vmatmul.bf16.gmra.mxu1 %v2596_v61  ;;  %1700 = vrot.lane.b32.xlu2 %v1530_v52, %s3688_s24  ;;  %v6217_v20 = vmul.f32 %v7960_v26, %v1468_v4  ;;  %v2530_v4 = vld [vmem:[#allocation2 + $0x278] sm:$0xff] }
 0x2bd   :  { %1704 = vrot.lane.b32.xlu1 %v1532_v6, %s3688_s24  ;;  %v7963_v6 = vld [vmem:[#allocation76_spill] sm:$0xff] }
 0x2be   :  { %v2068_v7 = vpop.permute.xlu2 %2067  ;;  %v6226_v61 = vmul.f32 %v5447_v45, %v7963_v6  ;;  %v1981_v11 = vmul.f32 %v7965_v62, %v6217_v20  ;;  %v2618_v45 = vpack.c.bf16 %v2530_v4, %v2528_v8  ;;  %v2488_v6 = vld [vmem:[#allocation2 + $0x128] sm:$0xff]  ;;  %v2490_v8 = vld [vmem:[#allocation2 + $0x138] sm:$0xff] }
 0x2bf   :  { %2087 = vrot.lane.b32.xlu0 %v1948_v60, %s3689_s27  ;;  %v2066_v50 = vpop.permute.xlu1 %2065  ;;  %v7964_v60 = vld [vmem:[#allocation232_spill] sm:$0xff] }
 0x2c0   :  { %2258 = vst.msk [vmem:[#allocation2] sm:$0xff] %vm2257_vm5, %v2066_v50  ;;  %v2517_v49 = vld [vmem:[#allocation2 + $0x210] sm:$0xff]  ;;  %v1982_v51 = vmul.f32 %v7964_v60, %v6213_v32  ;;  %v7970_v60 = vld [vmem:[#allocation41_spill] sm:$0xff] }
 0x2c1   :  { %v1619_v52 = vpop.permute.xlu0 %1618  ;;  %2387 = vst.msk [vmem:[#allocation2] sm:$0xff] %vm2386_vm6, %v2322_v38  ;;  %v7966_v38 = vld [vmem:[#allocation51_spill] sm:$0xff] }
 0x2c2   :  { %1810 = vst.msk [vmem:[#allocation2 + $0x10] sm:$0xff] %vm1808_vm4, %v1619_v52  ;;  %v2515_v1 = vld [vmem:[#allocation2 + $0x200] sm:$0xff]  ;;  %v6239_v50 = vmul.f32 %v7966_v38, %v6165_v63  ;;  %v6244_v52 = vmul.f32 %v7967_v40, %v6226_v61  ;;  %v7973_v40 = vld [vmem:[#allocation292_spill] sm:$0xff] }
 0x2c3   :  { %2259 = vst.msk [vmem:[#allocation2 + $0x10] sm:$0xff] %vm2257_vm5, %v2068_v7  ;;  %v2611_v26 = vpack.c.bf16 %v2517_v49, %v2515_v1  ;;  %v6248_v7 = vmul.f32 %v5521_v16, %v7968_v47  ;;  %v7969_v49 = vld [vmem:[#allocation167_spill] sm:$0xff]  ;;  %v7971_v1 = vld [vmem:[#allocation62_spill] sm:$0xff]  ;;  %v1471_v47 = vmul.f32 %v5791_v23, %v7973_v40  ;;  %v7976_v23 = vld [vmem:[#allocation241_spill] sm:$0xff] }
 0x2c4   :  { %2388 = vst.msk [vmem:[#allocation2 + $0x10] sm:$0xff] %vm2386_vm6, %v2323_v22  ;;  %2151 = vrot.lane.b32.xlu2 %v1980_v18, %s3689_s27  ;;  %v2356_v18 = vmul.f32 %v7969_v49, %v5922_v27  ;;  %v1949_v62 = vmul.f32 %v7971_v1, %v6244_v52  ;;  %v7974_v49 = vld [vmem:[#allocation240_spill] sm:$0xff]  ;;  %v7981_v40 = vld [vmem:[#allocation290_spill] sm:$0xff] }
 0x2c5   :  { %2859 = vmatmul.bf16.vlgmr.msra.gmra.mxu2 %v2611_v26  ;;  %2155 = vrot.lane.b32.xlu1 %v1982_v51, %s3689_s27  ;;  %v1947_v51 = vmul.f32 %v7970_v60, %v6239_v50  ;;  %v7972_v26 = vld [vmem:[#allocation67_spill] sm:$0xff]  ;;  %v1533_v60 = vmul.f32 %v6195_v2, %v7976_v23 }
 0x2c6   :  { %3043 = vmatmul.bf16.gmra.mxu3 %v2618_v45  ;;  %v2134_v22 = vpop.permute.xlu2 %2133  ;;  %v1501_v27 = vmul.f32 %v6248_v7, %v7972_v26  ;;  %v7979_v26 = vld [vmem:[#allocation94_spill] sm:$0xff] }
 0x2c7   :  { %2153 = vrot.lane.b32.xlu0 %v1981_v11, %s3689_s27  ;;  %v1687_v63 = vpop.permute.xlu1 %1686  ;;  %v2598_v11 = vpack.c.bf16 %v2490_v8, %v2488_v6 }
 0x2c8   :  { %1844 = vst.msk [vmem:[#allocation2 + $0x230] sm:$0xff] %vm1808_vm4, %v1687_v63  ;;  %v2451_v16 = vld [vmem:[#allocation2] sm:$0xff]  ;;  %v6269_v63 = vmul.f32 %v5838_v19, %v7974_v49  ;;  %v2532_v19 = vld [vmem:[#allocation2 + $0x288] sm:$0xff]  ;;  %v6291_v49 = vmul.f32 %v7981_v40, %v1471_v47 }
 0x2c9   :  { %v1685_v4 = vpop.permute.xlu0 %1684 }
 0x2ca   :  { %1843 = vst.msk [vmem:[#allocation2 + $0x220] sm:$0xff] %vm1808_vm4, %v1685_v4 }
 0x2cb   :  { %2292 = vst.msk [vmem:[#allocation2 + $0x220] sm:$0xff] %vm2257_vm5, %v2134_v22  ;;  %v2453_v45 = vld [vmem:[#allocation2 + $0x10] sm:$0xff]  ;;  %v7975_v22 = vld [vmem:[#allocation191_spill] sm:$0xff] }
 0x2cc   :  { %2421 = vst.msk [vmem:[#allocation2 + $0x220] sm:$0xff] %vm2386_vm6, %v2356_v18  ;;  %2993 = vmatmul.bf16.gmra.mxu1 %v2598_v11  ;;  %v2579_v38 = vpack.c.bf16 %v2453_v45, %v2451_v16  ;;  %2085 = vrot.lane.b32.xlu2 %v1947_v51, %s3689_s27  ;;  %v2357_v6 = vmul.f32 %v7975_v22, %v5880_v24  ;;  %v2534_v51 = vld [vmem:[#allocation2 + $0x298] sm:$0xff]  ;;  %v7977_v16 = vld [vmem:[#allocation296_spill] sm:$0xff]  ;;  %v7978_v24 = vld [vmem:[#allocation239_spill] sm:$0xff] }
 0x2cd   :  { %2089 = vrot.lane.b32.xlu1 %v1949_v62, %s3689_s27  ;;  %v1535_v1 = vmul.f32 %v1471_v47, %v7977_v16  ;;  %v1534_v62 = vmul.f32 %v6269_v63, %v7978_v24  ;;  %v2620_v11 = vpack.c.bf16 %v2534_v51, %v2532_v19  ;;  %v7980_v45 = vld [vmem:[#allocation17_spill] sm:$0xff]  ;;  %v7982_v22 = vld [vmem:[#allocation7_spill] sm:$0xff]  ;;  %v7984_v47 = vld [vmem:[#allocation86_spill] sm:$0xff] }
 0x2ce   :  { %2779 = vmatmul.bf16.vlgmr.msra.gmra.mxu0 %v2579_v38  ;;  %v1623_v18 = vpop.permute.xlu2 %1622  ;;  %v2325_v2 = vmul.f32 %v7980_v45, %v5900_v42  ;;  %v7985_v16 = vld [vmem:[#allocation91_spill] sm:$0xff] }
 0x2cf   :  { %1642 = vrot.lane.b32.xlu0 %v1501_v27, %s3688_s24  ;;  %1812 = vst.msk [vmem:[#allocation2 + $0x30] sm:$0xff] %vm1808_vm4, %v1623_v18  ;;  %v1621_v8 = vpop.permute.xlu1 %1620  ;;  %v1438_v27 = vmul.f32 %v5481_v29, %v7979_v26  ;;  %v2494_v29 = vld [vmem:[#allocation2 + $0x158] sm:$0xff]  ;;  %v7987_v26 = vld [vmem:[#allocation187_spill] sm:$0xff] }
 0x2d0   :  { %1811 = vst.msk [vmem:[#allocation2 + $0x20] sm:$0xff] %vm1808_vm4, %v1621_v8  ;;  %v2492_v8 = vld [vmem:[#allocation2 + $0x148] sm:$0xff] }
 0x2d1   :  { %v2136_v4 = vpop.permute.xlu0 %2135  ;;  %v1502_v51 = vmul.f32 %v1438_v27, %v7984_v47 }
 0x2d2   :  { %2293 = vst.msk [vmem:[#allocation2 + $0x230] sm:$0xff] %vm2257_vm5, %v2136_v4 }
 0x2d3   :  { %2422 = vst.msk [vmem:[#allocation2 + $0x230] sm:$0xff] %vm2386_vm6, %v2357_v6  ;;  %v2324_v6 = vmul.f32 %v7982_v22, %v5904_v21  ;;  %v2519_v4 = vld [vmem:[#allocation2 + $0x220] sm:$0xff]  ;;  %v6303_v21 = vmul.f32 %v5474_v14, %v7985_v16  ;;  %v7988_v14 = vld [vmem:[#allocation68_spill] sm:$0xff] }
 0x2d4   :  { %1706 = vrot.lane.b32.xlu2 %v1533_v60, %s3688_s24  ;;  %v7983_v60 = vld [vmem:[#allocation69_spill] sm:$0xff]  ;;  %v6315_v45 = vmul.f32 %v7988_v14, %v6248_v7  ;;  %v2536_v7 = vld [vmem:[#allocation2 + $0x2a8] sm:$0xff] }
 0x2d5   :  { %1710 = vrot.lane.b32.xlu1 %v1535_v1, %s3688_s24  ;;  %v1500_v19 = vmul.f32 %v6226_v61, %v7983_v60  ;;  %v2600_v1 = vpack.c.bf16 %v2494_v29, %v2492_v8  ;;  %v2358_v61 = vmul.f32 %v7987_v26, %v5926_v10  ;;  %v7991_v10 = vld [vmem:[#allocation185_spill] sm:$0xff] }
 0x2d6   :  { %3048 = vmatmul.bf16.gmra.mxu3 %v2620_v11  ;;  %v1689_v38 = vpop.permute.xlu2 %1688  ;;  %v2359_v8 = vmul.f32 %v7991_v10, %v5982_v31  ;;  %v7997_v10 = vld [vmem:[#allocation231_spill] sm:$0xff] }
 0x2d7   :  { %1708 = vrot.lane.b32.xlu0 %v1534_v62, %s3688_s24  ;;  %1845 = vst.msk [vmem:[#allocation2 + $0x240] sm:$0xff] %vm1808_vm4, %v1689_v38  ;;  %v2072_v18 = vpop.permute.xlu1 %2071  ;;  %v7986_v62 = vld [vmem:[#allocation286_spill] sm:$0xff]  ;;  %v7989_v38 = vld [vmem:[#allocation85_spill] sm:$0xff] }
 0x2d8   :  { %2261 = vst.msk [vmem:[#allocation2 + $0x30] sm:$0xff] %vm2257_vm5, %v2072_v18  ;;  %v1984_v11 = vmul.f32 %v7986_v62, %v6291_v49  ;;  %v6320_v40 = vmul.f32 %v7989_v38, %v6303_v21  ;;  %v2496_v38 = vld [vmem:[#allocation2 + $0x168] sm:$0xff] }
 0x2d9   :  { %v2070_v42 = vpop.permute.xlu0 %2069  ;;  %2390 = vst.msk [vmem:[#allocation2 + $0x30] sm:$0xff] %vm2386_vm6, %v2325_v2 }
 0x2da   :  { %v2521_v23 = vld [vmem:[#allocation2 + $0x230] sm:$0xff]  ;;  %2260 = vst.msk [vmem:[#allocation2 + $0x20] sm:$0xff] %vm2257_vm5, %v2070_v42  ;;  %v2538_v42 = vld [vmem:[#allocation2 + $0x2b8] sm:$0xff] }
 0x2db   :  { %v2613_v24 = vpack.c.bf16 %v2521_v23, %v2519_v4  ;;  %2389 = vst.msk [vmem:[#allocation2 + $0x20] sm:$0xff] %vm2386_vm6, %v2324_v6  ;;  %v7990_v6 = vld [vmem:[#allocation87_spill] sm:$0xff] }
 0x2dc   :  { %2998 = vmatmul.bf16.gmra.mxu1 %v2600_v1  ;;  %1640 = vrot.lane.b32.xlu2 %v1500_v19, %s3688_s24  ;;  %v6323_v18 = vmul.f32 %v7990_v6, %v1438_v27  ;;  %v7992_v23 = vld [vmem:[#allocation59_spill] sm:$0xff]  ;;  %v7993_v27 = vld [vmem:[#allocation77_spill] sm:$0xff]  ;;  %v2622_v1 = vpack.c.bf16 %v2538_v42, %v2536_v7 }
 0x2dd   :  { %2864 = vmatmul.bf16.gmra.mxu2 %v2613_v24  ;;  %1644 = vrot.lane.b32.xlu1 %v1502_v51, %s3688_s24  ;;  %v1950_v60 = vmul.f32 %v7992_v23, %v6315_v45  ;;  %v1952_v47 = vmul.f32 %v7993_v27, %v6320_v40  ;;  %v7994_v51 = vld [vmem:[#allocation80_spill] sm:$0xff]  ;;  %v7995_v24 = vld [vmem:[#allocation237_spill] sm:$0xff] }
 0x2de   :  { %v2140_v2 = vpop.permute.xlu2 %2139  ;;  %v1951_v16 = vmul.f32 %v7994_v51, %v6323_v18  ;;  %v6341_v62 = vmul.f32 %v7995_v24, %v6269_v63  ;;  %v7999_v7 = vld [vmem:[#allocation269_spill] sm:$0xff] }
 0x2df   :  { %2159 = vrot.lane.b32.xlu0 %v1984_v11, %s3689_s27  ;;  %v2138_v22 = vpop.permute.xlu1 %2137  ;;  %v6343_v11 = vpop.f32.mrf.mxu1  ;;  %v8000_v23 = vld [vmem:[#allocation265_spill] sm:$0xff] }
 0x2e0   :  { %2294 = vst.msk [vmem:[#allocation2 + $0x240] sm:$0xff] %vm2257_vm5, %v2138_v22  ;;  %v2457_v4 = vld [vmem:[#allocation2 + $0x30] sm:$0xff]  ;;  %v2498_v22 = vld [vmem:[#allocation2 + $0x178] sm:$0xff] }
 0x2e1   :  { %v1691_v29 = vpop.permute.xlu0 %1690  ;;  %2423 = vst.msk [vmem:[#allocation2 + $0x240] sm:$0xff] %vm2386_vm6, %v2358_v61  ;;  %v7996_v61 = vld [vmem:[#allocation32_spill] sm:$0xff] }
 0x2e2   :  { %1846 = vst.msk [vmem:[#allocation2 + $0x250] sm:$0xff] %vm1808_vm4, %v1691_v29  ;;  %v2455_v19 = vld [vmem:[#allocation2 + $0x20] sm:$0xff]  ;;  %v2326_v14 = vmul.f32 %v7996_v61, %v6011_v56  ;;  %v2602_v29 = vpack.c.bf16 %v2498_v22, %v2496_v38  ;;  %v8005_v61 = vld [vmem:[#allocation260_spill] sm:$0xff]  ;;  %v2540_v38 = vld [vmem:[#allocation2 + $0x2c8] sm:$0xff] }
 0x2e3   :  { %2295 = vst.msk [vmem:[#allocation2 + $0x250] sm:$0xff] %vm2257_vm5, %v2140_v2  ;;  %v2581_v31 = vpack.c.bf16 %v2457_v4, %v2455_v19  ;;  %v7998_v4 = vld [vmem:[#allocation266_spill] sm:$0xff]  ;;  %v2542_v22 = vld [vmem:[#allocation2 + $0x2d8] sm:$0xff] }
 0x2e4   :  { %2424 = vst.msk [vmem:[#allocation2 + $0x250] sm:$0xff] %vm2386_vm6, %v2359_v8  ;;  %2091 = vrot.lane.b32.xlu2 %v1950_v60, %s3689_s27  ;;  %v1983_v8 = vmul.f32 %v7997_v10, %v6341_v62  ;;  %v1536_v56 = vmul.f32 %v7999_v7, %v7998_v4  ;;  %v8001_v60 = vld [vmem:[#allocation256_spill] sm:$0xff] }
 0x2e5   :  { %2784 = vmatmul.bf16.gmra.mxu0 %v2581_v31  ;;  %2095 = vrot.lane.b32.xlu1 %v1952_v47, %s3689_s27  ;;  %v1023_v19 = vmul.f32 %v8001_v60, %v8000_v23  ;;  %v8002_v47 = vld [vmem:[#allocation44_spill] sm:$0xff]  ;;  %v8010_v23 = vld [vmem:[#allocation205_spill] sm:$0xff] }
 0x2e6   :  { %3053 = vmatmul.bf16.gmra.mxu3 %v2622_v1  ;;  %v2074_v26 = vpop.permute.xlu2 %2073  ;;  %v2327_v31 = vmul.f32 %v8002_v47, %v5964_v57  ;;  %v8004_v1 = vld [vmem:[#allocation255_spill] sm:$0xff]  ;;  %v8007_v10 = vld [vmem:[#allocation88_spill] sm:$0xff]  ;;  %v2361_v60 = vmul.f32 %v8010_v23, %v5987_v41 }
 0x2e7   :  { %2093 = vrot.lane.b32.xlu0 %v1951_v16, %s3689_s27  ;;  %v1627_v2 = vpop.permute.xlu1 %1626  ;;  %v8003_v16 = vld [vmem:[#allocation262_spill] sm:$0xff] }
 0x2e8   :  { %1814 = vst.msk [vmem:[#allocation2 + $0x50] sm:$0xff] %vm1808_vm4, %v1627_v2  ;;  %v2523_v63 = vld [vmem:[#allocation2 + $0x240] sm:$0xff]  ;;  %v6365_v24 = vmul.f32 %v8004_v1, %v8003_v16  ;;  %v6373_v2 = vpop.f32.mrf.mxu1  ;;  %v2500_v1 = vld [vmem:[#allocation2 + $0x188] sm:$0xff] }
 0x2e9   :  { %v1625_v6 = vpop.permute.xlu0 %1624 }
 0x2ea   :  { %1813 = vst.msk [vmem:[#allocation2 + $0x40] sm:$0xff] %vm1808_vm4, %v1625_v6  ;;  %v8006_v6 = vld [vmem:[#allocation84_spill] sm:$0xff] }
 0x2eb   :  { %2262 = vst.msk [vmem:[#allocation2 + $0x40] sm:$0xff] %vm2257_vm5, %v2074_v26  ;;  %v2525_v42 = vld [vmem:[#allocation2 + $0x250] sm:$0xff] }
 0x2ec   :  { %2391 = vst.msk [vmem:[#allocation2 + $0x40] sm:$0xff] %vm2386_vm6, %v2326_v14  ;;  %3003 = vmatmul.bf16.gmra.mxu1 %v2602_v29  ;;  %v2615_v27 = vpack.c.bf16 %v2525_v42, %v2523_v63  ;;  %2157 = vrot.lane.b32.xlu2 %v1983_v8, %s3689_s27  ;;  %v6371_v14 = vmul.f32 %v8005_v61, %v7999_v7  ;;  %v8008_v29 = vld [vmem:[#allocation252_spill] sm:$0xff]  ;;  %v8009_v7 = vld [vmem:[#allocation258_spill] sm:$0xff] }
 0x2ed   :  { %1712 = vrot.lane.b32.xlu1 %v1536_v56, %s3688_s24  ;;  %v1503_v63 = vmul.f32 %v6303_v21, %v8006_v6  ;;  %v6381_v8 = vmul.f32 %v5548_v35, %v8007_v10  ;;  %v1986_v4 = vmul.f32 %v8008_v29, %v6365_v24  ;;  %v2624_v42 = vpack.c.bf16 %v2542_v22, %v2540_v38  ;;  %v8011_v35 = vld [vmem:[#allocation83_spill] sm:$0xff]  ;;  %v8014_v22 = vld [vmem:[#allocation272_spill] sm:$0xff]  ;;  %v8016_v29 = vld [vmem:[#allocation74_spill] sm:$0xff] }
 0x2ee   :  { %2869 = vmatmul.bf16.gmra.mxu2 %v2615_v27  ;;  %v1695_v51 = vpop.permute.xlu2 %1694  ;;  %v1985_v56 = vmul.f32 %v8009_v7, %v6371_v14  ;;  %v8012_v27 = vld [vmem:[#allocation109_spill] sm:$0xff] }
 0x2ef   :  { %1200 = vrot.lane.b32.xlu0 %v1023_v19, %s3687_s4  ;;  %1848 = vst.msk [vmem:[#allocation2 + $0x270] sm:$0xff] %vm1808_vm4, %v1695_v51  ;;  %v1693_v26 = vpop.permute.xlu1 %1692  ;;  %v6394_v19 = vmul.f32 %v8011_v35, %v6381_v8  ;;  %v6398_v47 = vmul.f32 %v5507_v58, %v8012_v27  ;;  %v8015_v58 = vld [vmem:[#allocation263_spill] sm:$0xff]  ;;  %v8017_v7 = vld [vmem:[#allocation101_spill] sm:$0xff] }
 0x2f0   :  { %1847 = vst.msk [vmem:[#allocation2 + $0x260] sm:$0xff] %vm1808_vm4, %v1693_v26  ;;  %v2502_v26 = vld [vmem:[#allocation2 + $0x198] sm:$0xff]  ;;  %v1022_v6 = vmul.f32 %v8015_v58, %v8014_v22  ;;  %v8023_v58 = vld [vmem:[#allocation319_spill] sm:$0xff] }
 0x2f1   :  { %v2076_v57 = vpop.permute.xlu0 %2075  ;;  %v8019_v35 = vld [vmem:[#allocation25_spill] sm:$0xff] }
 0x2f2   :  { %2263 = vst.msk [vmem:[#allocation2 + $0x50] sm:$0xff] %vm2257_vm5, %v2076_v57  ;;  %v2329_v27 = vmul.f32 %v8019_v35, %v6099_v55  ;;  %v2506_v35 = vld [vmem:[#allocation2 + $0x1b8] sm:$0xff] }
 0x2f3   :  { %2392 = vst.msk [vmem:[#allocation2 + $0x50] sm:$0xff] %vm2386_vm6, %v2327_v31  ;;  %v8013_v31 = vld [vmem:[#allocation230_spill] sm:$0xff] }
 0x2f4   :  { %1646 = vrot.lane.b32.xlu2 %v1503_v63, %s3688_s24  ;;  %v2360_v51 = vmul.f32 %v8013_v31, %v5991_v44  ;;  %v2459_v61 = vld [vmem:[#allocation2 + $0x40] sm:$0xff]  ;;  %v6408_v63 = vpop.f32.mrf.mxu1  ;;  %v2604_v44 = vpack.c.bf16 %v2502_v26, %v2500_v1  ;;  %v2546_v1 = vld [vmem:[#allocation2 + $0x2f8] sm:$0xff] }
 0x2f5   :  { %2163 = vrot.lane.b32.xlu1 %v1986_v4, %s3689_s27  ;;  %v1953_v4 = vmul.f32 %v8016_v29, %v6394_v19 }
 0x2f6   :  { %3058 = vmatmul.bf16.gmra.mxu3 %v2624_v42  ;;  %v1629_v21 = vpop.permute.xlu2 %1628  ;;  %v8018_v42 = vld [vmem:[#allocation28_spill] sm:$0xff] }
 0x2f7   :  { %2161 = vrot.lane.b32.xlu0 %v1985_v56, %s3689_s27  ;;  %1815 = vst.msk [vmem:[#allocation2 + $0x60] sm:$0xff] %vm1808_vm4, %v1629_v21  ;;  %v2144_v41 = vpop.permute.xlu1 %2143  ;;  %v1505_v56 = vmul.f32 %v6398_v47, %v8017_v7  ;;  %v2328_v23 = vmul.f32 %v8018_v42, %v6016_v5  ;;  %v8020_v5 = vld [vmem:[#allocation257_spill] sm:$0xff]  ;;  %v8026_v7 = vld [vmem:[#allocation311_spill] sm:$0xff] }
 0x2f8   :  { %2297 = vst.msk [vmem:[#allocation2 + $0x270] sm:$0xff] %vm2257_vm5, %v2144_v41  ;;  %v2544_v41 = vld [vmem:[#allocation2 + $0x2e8] sm:$0xff]  ;;  %v1537_v26 = vmul.f32 %v8003_v16, %v8020_v5  ;;  %v8027_v42 = vld [vmem:[#allocation201_spill] sm:$0xff]  ;;  %v8029_v5 = vld [vmem:[#allocation308_spill] sm:$0xff] }
 0x2f9   :  { %v2142_v57 = vpop.permute.xlu0 %2141  ;;  %2426 = vst.msk [vmem:[#allocation2 + $0x270] sm:$0xff] %vm2386_vm6, %v2361_v60  ;;  %v2626_v29 = vpack.c.bf16 %v2546_v1, %v2544_v41 }
 0x2fa   :  { %v2461_v38 = vld [vmem:[#allocation2 + $0x50] sm:$0xff]  ;;  %2296 = vst.msk [vmem:[#allocation2 + $0x260] sm:$0xff] %vm2257_vm5, %v2142_v57  ;;  %v8021_v57 = vld [vmem:[#allocation295_spill] sm:$0xff] }
 0x2fb   :  { %v2583_v10 = vpack.c.bf16 %v2461_v38, %v2459_v61  ;;  %2425 = vst.msk [vmem:[#allocation2 + $0x260] sm:$0xff] %vm2386_vm6, %v2360_v51  ;;  %v8022_v38 = vld [vmem:[#allocation284_spill] sm:$0xff] }
 0x2fc   :  { %3008 = vmatmul.bf16.gmra.mxu1 %v2604_v44  ;;  %1198 = vrot.lane.b32.xlu2 %v1022_v6, %s3687_s4  ;;  %v1025_v22 = vmul.f32 %v8022_v38, %v8021_v57  ;;  %v8024_v6 = vld [vmem:[#allocation314_spill] sm:$0xff]  ;;  %v8031_v57 = vld [vmem:[#allocation291_spill] sm:$0xff] }
 0x2fd   :  { %2789 = vmatmul.bf16.gmra.mxu0 %v2583_v10  ;;  %2097 = vrot.lane.b32.xlu1 %v1953_v4, %s3689_s27  ;;  %v1024_v44 = vmul.f32 %v8024_v6, %v8023_v58  ;;  %v6433_v10 = vpop.f32.mrf.mxu1  ;;  %v8025_v4 = vld [vmem:[#allocation320_spill] sm:$0xff] }
 0x2fe   :  { %v2080_v60 = vpop.permute.xlu2 %2079 }
 0x2ff   :  { %1650 = vrot.lane.b32.xlu0 %v1505_v56, %s3688_s24  ;;  %v2078_v21 = vpop.permute.xlu1 %2077  ;;  %v6440_v56 = vmul.f32 %v8026_v7, %v8025_v4 }
 0x300   :  { %2264 = vst.msk [vmem:[#allocation2 + $0x60] sm:$0xff] %vm2257_vm5, %v2078_v21  ;;  %v2529_v51 = vld [vmem:[#allocation2 + $0x270] sm:$0xff]  ;;  %v2504_v21 = vld [vmem:[#allocation2 + $0x1a8] sm:$0xff] }
 0x301   :  { %v1631_v31 = vpop.permute.xlu0 %1630  ;;  %2393 = vst.msk [vmem:[#allocation2 + $0x60] sm:$0xff] %vm2386_vm6, %v2328_v23  ;;  %v2362_v23 = vmul.f32 %v8027_v42, %v6132_v15  ;;  %v2606_v1 = vpack.c.bf16 %v2506_v35, %v2504_v21  ;;  %v1987_v15 = vmul.f32 %v8029_v5, %v6440_v56  ;;  %v8035_v42 = vld [vmem:[#allocation106_spill] sm:$0xff]  ;;  %v8037_v35 = vld [vmem:[#allocation97_spill] sm:$0xff]  ;;  %v8040_v5 = vld [vmem:[#allocation55_spill] sm:$0xff] }
 0x302   :  { %1816 = vst.msk [vmem:[#allocation2 + $0x70] sm:$0xff] %vm1808_vm4, %v1631_v31  ;;  %v2527_v61 = vld [vmem:[#allocation2 + $0x260] sm:$0xff] }
 0x303   :  { %2265 = vst.msk [vmem:[#allocation2 + $0x70] sm:$0xff] %vm2257_vm5, %v2080_v60  ;;  %v2617_v55 = vpack.c.bf16 %v2529_v51, %v2527_v61  ;;  %v8028_v51 = vld [vmem:[#allocation82_spill] sm:$0xff]  ;;  %v8030_v61 = vld [vmem:[#allocation288_spill] sm:$0xff] }
 0x304   :  { %2394 = vst.msk [vmem:[#allocation2 + $0x70] sm:$0xff] %vm2386_vm6, %v2329_v27  ;;  %1714 = vrot.lane.b32.xlu2 %v1537_v26, %s3688_s24  ;;  %v1504_v41 = vmul.f32 %v6381_v8, %v8028_v51  ;;  %v1539_v38 = vmul.f32 %v8031_v57, %v8030_v61  ;;  %v8033_v8 = vld [vmem:[#allocation103_spill] sm:$0xff]  ;;  %v2510_v61 = vld [vmem:[#allocation2 + $0x1d8] sm:$0xff] }
 0x305   :  { %2874 = vmatmul.bf16.gmra.mxu2 %v2617_v55  ;;  %1204 = vrot.lane.b32.xlu1 %v1025_v22, %s3687_s4  ;;  %v8032_v55 = vld [vmem:[#allocation102_spill] sm:$0xff]  ;;  %v1443_v6 = vmul.f32 %v5578_v37, %v8033_v8 }
 0x306   :  { %3063 = vmatmul.bf16.gmra.mxu3 %v2626_v29  ;;  %v2146_v16 = vpop.permute.xlu2 %2145  ;;  %v6458_v58 = vmul.f32 %v8032_v55, %v6398_v47 }
 0x307   :  { %1202 = vrot.lane.b32.xlu0 %v1024_v44, %s3687_s4  ;;  %v1699_v60 = vpop.permute.xlu1 %1698  ;;  %v6462_v44 = vpop.f32.mrf.mxu1 }
 0x308   :  { %1850 = vst.msk [vmem:[#allocation2 + $0x290] sm:$0xff] %vm1808_vm4, %v1699_v60  ;;  %v2463_v31 = vld [vmem:[#allocation2 + $0x60] sm:$0xff]  ;;  %v8036_v60 = vld [vmem:[#allocation95_spill] sm:$0xff] }
 0x309   :  { %v1697_v27 = vpop.permute.xlu0 %1696  ;;  %v1954_v21 = vmul.f32 %v8036_v60, %v6458_v58 }
 0x30a   :  { %1849 = vst.msk [vmem:[#allocation2 + $0x280] sm:$0xff] %vm1808_vm4, %v1697_v27  ;;  %v8038_v27 = vld [vmem:[#allocation99_spill] sm:$0xff] }
 0x30b   :  { %2298 = vst.msk [vmem:[#allocation2 + $0x280] sm:$0xff] %vm2257_vm5, %v2146_v16  ;;  %v2465_v26 = vld [vmem:[#allocation2 + $0x70] sm:$0xff]  ;;  %v8034_v16 = vld [vmem:[#allocation249_spill] sm:$0xff] }
 0x30c   :  { %2427 = vst.msk [vmem:[#allocation2 + $0x280] sm:$0xff] %vm2386_vm6, %v2362_v23  ;;  %3013 = vmatmul.bf16.gmra.mxu1 %v2606_v1  ;;  %v2585_v22 = vpack.c.bf16 %v2465_v26, %v2463_v31  ;;  %1648 = vrot.lane.b32.xlu2 %v1504_v41, %s3688_s24  ;;  %v2363_v7 = vmul.f32 %v8034_v16, %v6072_v33  ;;  %v2508_v26 = vld [vmem:[#allocation2 + $0x1c8] sm:$0xff]  ;;  %v8042_v16 = vld [vmem:[#allocation313_spill] sm:$0xff] }
 0x30d   :  { %2165 = vrot.lane.b32.xlu1 %v1987_v15, %s3689_s27  ;;  %v1442_v23 = vmul.f32 %v5500_v48, %v8035_v42  ;;  %v1507_v33 = vmul.f32 %v1443_v6, %v8037_v35  ;;  %v8039_v48 = vld [vmem:[#allocation47_spill] sm:$0xff]  ;;  %v2330_v15 = vmul.f32 %v8040_v5, %v6108_v34  ;;  %v2608_v34 = vpack.c.bf16 %v2510_v61, %v2508_v26  ;;  %v8050_v61 = vld [vmem:[#allocation334_spill] sm:$0xff] }
 0x30e   :  { %2794 = vmatmul.bf16.gmra.mxu0 %v2585_v22  ;;  %v1635_v29 = vpop.permute.xlu2 %1634  ;;  %v2331_v51 = vmul.f32 %v8039_v48, %v6104_v43  ;;  %v8041_v22 = vld [vmem:[#allocation98_spill] sm:$0xff]  ;;  %v8046_v35 = vld [vmem:[#allocation219_spill] sm:$0xff] }
 0x30f   :  { %1718 = vrot.lane.b32.xlu0 %v1539_v38, %s3688_s24  ;;  %1818 = vst.msk [vmem:[#allocation2 + $0x90] sm:$0xff] %vm1808_vm4, %v1635_v29  ;;  %v1633_v47 = vpop.permute.xlu1 %1632  ;;  %v1506_v31 = vmul.f32 %v1442_v23, %v8038_v27  ;;  %v6487_v55 = vmul.f32 %v8041_v22, %v1443_v6  ;;  %v6489_v8 = vpop.f32.mrf.mxu1  ;;  %v8045_v6 = vld [vmem:[#allocation89_spill] sm:$0xff] }
 0x310   :  { %1817 = vst.msk [vmem:[#allocation2 + $0x80] sm:$0xff] %vm1808_vm4, %v1633_v47  ;;  %v8043_v47 = vld [vmem:[#allocation287_spill] sm:$0xff] }
 0x311   :  { %v2148_v37 = vpop.permute.xlu0 %2147 }
 0x312   :  { %2299 = vst.msk [vmem:[#allocation2 + $0x290] sm:$0xff] %vm2257_vm5, %v2148_v37  ;;  %v8044_v37 = vld [vmem:[#allocation278_spill] sm:$0xff] }
 0x313   :  { %2428 = vst.msk [vmem:[#allocation2 + $0x290] sm:$0xff] %vm2386_vm6, %v2363_v7  ;;  %v2531_v38 = vld [vmem:[#allocation2 + $0x280] sm:$0xff]  ;;  %v1538_v7 = vmul.f32 %v8025_v4, %v8042_v16  ;;  %v1026_v60 = vmul.f32 %v8044_v37, %v8043_v47  ;;  %v8047_v4 = vld [vmem:[#allocation283_spill] sm:$0xff]  ;;  %v8053_v16 = vld [vmem:[#allocation100_spill] sm:$0xff] }
 0x314   :  { %2099 = vrot.lane.b32.xlu2 %v1954_v21, %s3689_s27  ;;  %v1956_v21 = vmul.f32 %v8045_v6, %v6487_v55  ;;  %v6506_v27 = vmul.f32 %v8047_v4, %v8031_v57  ;;  %v8055_v37 = vld [vmem:[#allocation43_spill] sm:$0xff] }
 0x315   :  { %1654 = vrot.lane.b32.xlu1 %v1507_v33, %s3688_s24  ;;  %v2364_v33 = vmul.f32 %v8046_v35, %v6140_v36  ;;  %v8049_v36 = vld [vmem:[#allocation280_spill] sm:$0xff]  ;;  %v2512_v6 = vld [vmem:[#allocation2 + $0x1e8] sm:$0xff]  ;;  %v6537_v35 = vmul.f32 %v5173_v9, %v8050_v61 }
 0x316   :  { %v1701_v41 = vpop.permute.xlu2 %1700 }
 0x317   :  { %1652 = vrot.lane.b32.xlu0 %v1506_v31, %s3688_s24  ;;  %1851 = vst.msk [vmem:[#allocation2 + $0x2a0] sm:$0xff] %vm1808_vm4, %v1701_v41  ;;  %v2084_v1 = vpop.permute.xlu1 %2083  ;;  %v6516_v57 = vpop.f32.mrf.mxu1 }
 0x318   :  { %2267 = vst.msk [vmem:[#allocation2 + $0x90] sm:$0xff] %vm2257_vm5, %v2084_v1 }
 0x319   :  { %v2082_v43 = vpop.permute.xlu0 %2081  ;;  %2396 = vst.msk [vmem:[#allocation2 + $0x90] sm:$0xff] %vm2386_vm6, %v2331_v51  ;;  %v8048_v51 = vld [vmem:[#allocation215_spill] sm:$0xff] }
 0x31a   :  { %v2533_v29 = vld [vmem:[#allocation2 + $0x290] sm:$0xff]  ;;  %2266 = vst.msk [vmem:[#allocation2 + $0x80] sm:$0xff] %vm2257_vm5, %v2082_v43  ;;  %v2365_v41 = vmul.f32 %v8048_v51, %v6206_v25  ;;  %v8051_v43 = vld [vmem:[#allocation281_spill] sm:$0xff] }
 0x31b   :  { %v2619_v42 = vpack.c.bf16 %v2533_v29, %v2531_v38  ;;  %2395 = vst.msk [vmem:[#allocation2 + $0x80] sm:$0xff] %vm2386_vm6, %v2330_v15  ;;  %v1988_v15 = vmul.f32 %v8049_v36, %v6506_v27  ;;  %v1541_v38 = vmul.f32 %v8050_v61, %v5183_v46  ;;  %v8052_v25 = vld [vmem:[#allocation285_spill] sm:$0xff]  ;;  %v8058_v51 = vld [vmem:[#allocation116_spill] sm:$0xff] }
 0x31c   :  { %3018 = vmatmul.bf16.gmra.mxu1 %v2608_v34  ;;  %1716 = vrot.lane.b32.xlu2 %v1538_v7, %s3688_s24  ;;  %v1540_v29 = vmul.f32 %v8052_v25, %v8051_v43  ;;  %v6527_v7 = vmul.f32 %v8053_v16, %v1442_v23  ;;  %v8054_v34 = vld [vmem:[#allocation124_spill] sm:$0xff] }
 0x31d   :  { %2879 = vmatmul.bf16.gmra.mxu2 %v2619_v42  ;;  %1206 = vrot.lane.b32.xlu1 %v1026_v60, %s3687_s4  ;;  %v1444_v42 = vmul.f32 %v5534_v54, %v8054_v34  ;;  %v2332_v60 = vmul.f32 %v8055_v37, %v6239_v50 }
 0x31e   :  { %v2152_v31 = vpop.permute.xlu2 %2151 }
 0x31f   :  { %2103 = vrot.lane.b32.xlu0 %v1956_v21, %s3689_s27  ;;  %v2150_v48 = vpop.permute.xlu1 %2149  ;;  %v2514_v21 = vld [vmem:[#allocation2 + $0x1f8] sm:$0xff]  ;;  %v6550_v36 = vpop.f32.mrf.mxu1 }
 0x320   :  { %2300 = vst.msk [vmem:[#allocation2 + $0x2a0] sm:$0xff] %vm2257_vm5, %v2150_v48  ;;  %v2469_v5 = vld [vmem:[#allocation2 + $0x90] sm:$0xff]  ;;  %v2610_v50 = vpack.c.bf16 %v2514_v21, %v2512_v6 }
 0x321   :  { %v1703_v1 = vpop.permute.xlu0 %1702  ;;  %2429 = vst.msk [vmem:[#allocation2 + $0x2a0] sm:$0xff] %vm2386_vm6, %v2364_v33  ;;  %v8056_v33 = vld [vmem:[#allocation92_spill] sm:$0xff] }
 0x322   :  { %1852 = vst.msk [vmem:[#allocation2 + $0x2b0] sm:$0xff] %vm1808_vm4, %v1703_v1  ;;  %v2467_v26 = vld [vmem:[#allocation2 + $0x80] sm:$0xff]  ;;  %v1955_v4 = vmul.f32 %v8056_v33, %v6527_v7  ;;  %v8059_v1 = vld [vmem:[#allocation329_spill] sm:$0xff] }
 0x323   :  { %2301 = vst.msk [vmem:[#allocation2 + $0x2b0] sm:$0xff] %vm2257_vm5, %v2152_v31  ;;  %v2587_v22 = vpack.c.bf16 %v2469_v5, %v2467_v26  ;;  %v8057_v31 = vld [vmem:[#allocation121_spill] sm:$0xff]  ;;  %v1990_v5 = vmul.f32 %v8059_v1, %v6537_v35  ;;  %v8060_v26 = vld [vmem:[#allocation66_spill] sm:$0xff]  ;;  %v8070_v1 = vld [vmem:[#allocation307_spill] sm:$0xff] }
 0x324   :  { %2430 = vst.msk [vmem:[#allocation2 + $0x2b0] sm:$0xff] %vm2386_vm6, %v2365_v41  ;;  %2167 = vrot.lane.b32.xlu2 %v1988_v15, %s3689_s27  ;;  %v1445_v48 = vmul.f32 %v5527_v28, %v8057_v31  ;;  %v1508_v41 = vmul.f32 %v1444_v42, %v8058_v51  ;;  %v2333_v61 = vmul.f32 %v8060_v26, %v6185_v0  ;;  %v8064_v0 = vld [vmem:[#allocation107_spill] sm:$0xff]  ;;  %v8068_v31 = vld [vmem:[#allocation268_spill] sm:$0xff] }
 0x325   :  { %2799 = vmatmul.bf16.gmra.mxu0 %v2587_v22  ;;  %1722 = vrot.lane.b32.xlu1 %v1541_v38, %s3688_s24  ;;  %v8061_v38 = vld [vmem:[#allocation115_spill] sm:$0xff] }
 0x326   :  { %v2086_v46 = vpop.permute.xlu2 %2085  ;;  %v6557_v22 = vmul.f32 %v8061_v38, %v1445_v48  ;;  %v8073_v26 = vld [vmem:[#allocation299_spill] sm:$0xff] }
 0x327   :  { %1720 = vrot.lane.b32.xlu0 %v1540_v29, %s3688_s24  ;;  %v1639_v47 = vpop.permute.xlu1 %1638  ;;  %v8062_v29 = vld [vmem:[#allocation117_spill] sm:$0xff] }
 0x328   :  { %1820 = vst.msk [vmem:[#allocation2 + $0xb0] sm:$0xff] %vm1808_vm4, %v1639_v47  ;;  %v2535_v54 = vld [vmem:[#allocation2 + $0x2a0] sm:$0xff]  ;;  %v6562_v16 = vmul.f32 %v8062_v29, %v1444_v42  ;;  %v1958_v37 = vmul.f32 %v8064_v0, %v6557_v22  ;;  %v8066_v42 = vld [vmem:[#allocation277_spill] sm:$0xff]  ;;  %v8077_v0 = vld [vmem:[#allocation303_spill] sm:$0xff] }
 0x329   :  { %v1637_v23 = vpop.permute.xlu0 %1636  ;;  %v6576_v21 = vmul.f32 %v8066_v42, %v8052_v25  ;;  %v8076_v29 = vld [vmem:[#allocation297_spill] sm:$0xff] }
 0x32a   :  { %1819 = vst.msk [vmem:[#allocation2 + $0xa0] sm:$0xff] %vm1808_vm4, %v1637_v23  ;;  %v8067_v23 = vld [vmem:[#allocation234_spill] sm:$0xff] }
 0x32b   :  { %2268 = vst.msk [vmem:[#allocation2 + $0xa0] sm:$0xff] %vm2257_vm5, %v2086_v46  ;;  %v2537_v9 = vld [vmem:[#allocation2 + $0x2b0] sm:$0xff] }
 0x32c   :  { %2397 = vst.msk [vmem:[#allocation2 + $0xa0] sm:$0xff] %vm2386_vm6, %v2332_v60  ;;  %3023 = vmatmul.bf16.gmra.mxu1 %v2610_v50  ;;  %v2621_v15 = vpack.c.bf16 %v2537_v9, %v2535_v54  ;;  %2101 = vrot.lane.b32.xlu2 %v1955_v4, %s3689_s27  ;;  %v8063_v46 = vld [vmem:[#allocation332_spill] sm:$0xff]  ;;  %v8065_v60 = vld [vmem:[#allocation110_spill] sm:$0xff]  ;;  %v2367_v54 = vmul.f32 %v8067_v23, %v6213_v32 }
 0x32d   :  { %1656 = vrot.lane.b32.xlu1 %v1508_v41, %s3688_s24  ;;  %v1027_v47 = vmul.f32 %v8063_v46, %v5227_v53  ;;  %v1957_v6 = vmul.f32 %v8065_v60, %v6562_v16  ;;  %v2366_v50 = vmul.f32 %v8068_v31, %v6217_v20  ;;  %v8069_v41 = vld [vmem:[#allocation274_spill] sm:$0xff]  ;;  %v8074_v20 = vld [vmem:[#allocation63_spill] sm:$0xff]  ;;  %v8078_v60 = vld [vmem:[#allocation60_spill] sm:$0xff] }
 0x32e   :  { %2884 = vmatmul.bf16.gmra.mxu2 %v2621_v15  ;;  %v1707_v28 = vpop.permute.xlu2 %1706  ;;  %v1989_v9 = vmul.f32 %v8069_v41, %v6576_v21  ;;  %v2334_v38 = vmul.f32 %v8074_v20, %v6244_v52  ;;  %v8079_v23 = vld [vmem:[#allocation114_spill] sm:$0xff] }
 0x32f   :  { %2171 = vrot.lane.b32.xlu0 %v1990_v5, %s3689_s27  ;;  %1854 = vst.msk [vmem:[#allocation2 + $0x2d0] sm:$0xff] %vm1808_vm4, %v1707_v28  ;;  %v1705_v43 = vpop.permute.xlu1 %1704  ;;  %v8071_v5 = vld [vmem:[#allocation310_spill] sm:$0xff]  ;;  %v8072_v28 = vld [vmem:[#allocation304_spill] sm:$0xff] }
 0x330   :  { %1853 = vst.msk [vmem:[#allocation2 + $0x2c0] sm:$0xff] %vm1808_vm4, %v1705_v43  ;;  %v1542_v15 = vmul.f32 %v8071_v5, %v8070_v1  ;;  %v8075_v43 = vld [vmem:[#allocation305_spill] sm:$0xff] }
 0x331   :  { %v2088_v34 = vpop.permute.xlu0 %2087 }
 0x332   :  { %2269 = vst.msk [vmem:[#allocation2 + $0xb0] sm:$0xff] %vm2257_vm5, %v2088_v34  ;;  %v6601_v34 = vmul.f32 %v8076_v29, %v8075_v43  ;;  %v8086_v29 = vld [vmem:[#allocation312_spill] sm:$0xff] }
 0x333   :  { %2398 = vst.msk [vmem:[#allocation2 + $0xb0] sm:$0xff] %vm2386_vm6, %v2333_v61  ;;  %v2471_v4 = vld [vmem:[#allocation2 + $0xa0] sm:$0xff]  ;;  %v1029_v61 = vmul.f32 %v8073_v26, %v8072_v28  ;;  %v8085_v28 = vld [vmem:[#allocation233_spill] sm:$0xff] }
 0x334   :  { %1208 = vrot.lane.b32.xlu2 %v1027_v47, %s3687_s4  ;;  %v2368_v26 = vmul.f32 %v8085_v28, %v6341_v62  ;;  %v8094_v28 = vld [vmem:[#allocation78_spill] sm:$0xff] }
 0x335   :  { %2107 = vrot.lane.b32.xlu1 %v1958_v37, %s3689_s27  ;;  %v6606_v37 = vmul.f32 %v8077_v0, %v8071_v5 }
 0x336   :  { %v1641_v53 = vpop.permute.xlu2 %1640 }
 0x337   :  { %2105 = vrot.lane.b32.xlu0 %v1957_v6, %s3689_s27  ;;  %v2156_v33 = vpop.permute.xlu1 %2155  ;;  %1821 = vst.msk [vmem:[#allocation2 + $0xc0] sm:$0xff] %vm1808_vm4, %v1641_v53  ;;  %v2335_v6 = vmul.f32 %v8078_v60, %v6315_v45  ;;  %v8080_v53 = vld [vmem:[#allocation118_spill] sm:$0xff]  ;;  %v8082_v45 = vld [vmem:[#allocation300_spill] sm:$0xff] }
 0x338   :  { %2303 = vst.msk [vmem:[#allocation2 + $0x2d0] sm:$0xff] %vm2257_vm5, %v2156_v33  ;;  %v6615_v33 = vmul.f32 %v5611_v59, %v8080_v53  ;;  %v8083_v59 = vld [vmem:[#allocation113_spill] sm:$0xff] }
 0x339   :  { %v2154_v51 = vpop.permute.xlu0 %2153  ;;  %2432 = vst.msk [vmem:[#allocation2 + $0x2d0] sm:$0xff] %vm2386_vm6, %v2367_v54  ;;  %v1509_v54 = vmul.f32 %v1445_v48, %v8079_v23 }
 0x33a   :  { %v2473_v25 = vld [vmem:[#allocation2 + $0xb0] sm:$0xff]  ;;  %2302 = vst.msk [vmem:[#allocation2 + $0x2c0] sm:$0xff] %vm2257_vm5, %v2154_v51  ;;  %v1991_v51 = vmul.f32 %v8082_v45, %v6606_v37  ;;  %v6628_v48 = vmul.f32 %v8083_v59, %v6615_v33  ;;  %v8092_v59 = vld [vmem:[#allocation326_spill] sm:$0xff] }
 0x33b   :  { %v2589_v32 = vpack.c.bf16 %v2473_v25, %v2471_v4  ;;  %2431 = vst.msk [vmem:[#allocation2 + $0x2c0] sm:$0xff] %vm2386_vm6, %v2366_v50  ;;  %v8081_v4 = vld [vmem:[#allocation293_spill] sm:$0xff]  ;;  %v3029_v25 = vpop.f32.mrf.mxu3 }
 0x33c   :  { %2169 = vrot.lane.b32.xlu2 %v1989_v9, %s3689_s27  ;;  %v1992_v31 = vmul.f32 %v8081_v4, %v6601_v34  ;;  %v8084_v9 = vld [vmem:[#allocation139_spill] sm:$0xff] }
 0x33d   :  { %2804 = vmatmul.bf16.gmra.mxu0 %v2589_v32  ;;  %1724 = vrot.lane.b32.xlu1 %v1542_v15, %s3688_s24  ;;  %v6632_v32 = vmul.f32 %v5561_v39, %v8084_v9  ;;  %v8088_v39 = vld [vmem:[#allocation104_spill] sm:$0xff]  ;;  %v1031_v9 = vmul.f32 %v8092_v59, %v5171_v17 }
 0x33e   :  { %v2092_v46 = vpop.permute.xlu2 %2091  ;;  %v1959_v0 = vmul.f32 %v8088_v39, %v6628_v48  ;;  %v8098_v39 = vld [vmem:[#allocation331_spill] sm:$0xff] }
 0x33f   :  { %1212 = vrot.lane.b32.xlu0 %v1029_v61, %s3687_s4  ;;  %v2090_v47 = vpop.permute.xlu1 %2089 }
 0x340   :  { %2270 = vst.msk [vmem:[#allocation2 + $0xc0] sm:$0xff] %vm2257_vm5, %v2090_v47  ;;  %v2541_v42 = vld [vmem:[#allocation2 + $0x2d0] sm:$0xff] }
 0x341   :  { %v1643_v52 = vpop.permute.xlu0 %1642  ;;  %2399 = vst.msk [vmem:[#allocation2 + $0xc0] sm:$0xff] %vm2386_vm6, %v2334_v38 }
 0x342   :  { %1822 = vst.msk [vmem:[#allocation2 + $0xd0] sm:$0xff] %vm1808_vm4, %v1643_v52  ;;  %v2539_v50 = vld [vmem:[#allocation2 + $0x2c0] sm:$0xff]  ;;  %v8089_v52 = vld [vmem:[#allocation131_spill] sm:$0xff] }
 0x343   :  { %2271 = vst.msk [vmem:[#allocation2 + $0xd0] sm:$0xff] %vm2257_vm5, %v2092_v46  ;;  %v2623_v41 = vpack.c.bf16 %v2541_v42, %v2539_v50  ;;  %v8087_v46 = vld [vmem:[#allocation306_spill] sm:$0xff]  ;;  %v1511_v42 = vmul.f32 %v6632_v32, %v8089_v52  ;;  %v8090_v50 = vld [vmem:[#allocation289_spill] sm:$0xff] }
 0x344   :  { %2400 = vst.msk [vmem:[#allocation2 + $0xd0] sm:$0xff] %vm2386_vm6, %v2335_v6  ;;  %1658 = vrot.lane.b32.xlu2 %v1509_v54, %s3688_s24  ;;  %v1028_v47 = vmul.f32 %v8087_v46, %v8086_v29  ;;  %v3031_v54 = vpop.f32.mrf.mxu3  ;;  %v2369_v45 = vmul.f32 %v8090_v50, %v6291_v49 }
 0x345   :  { %2889 = vmatmul.bf16.gmra.mxu2 %v2623_v41  ;;  %2175 = vrot.lane.b32.xlu1 %v1992_v31, %s3689_s27 }
 0x346   :  { %v2158_v1 = vpop.permute.xlu2 %2157 }
 0x347   :  { %2173 = vrot.lane.b32.xlu0 %v1991_v51, %s3689_s27  ;;  %v1711_v5 = vpop.permute.xlu1 %1710 }
 0x348   :  { %v2860_v15 = vpop.f32.mrf.mxu2  ;;  %1856 = vst.msk [vmem:[#allocation2 + $0x2f0] sm:$0xff] %vm1808_vm4, %v1711_v5  ;;  %v2475_v38 = vld [vmem:[#allocation2 + $0xc0] sm:$0xff]  ;;  %v1030_v5 = vmul.f32 %v5243_v30, %v5314_v12  ;;  %v8095_v12 = vld [vmem:[#allocation81_spill] sm:$0xff] }
 0x349   :  { %v1709_v61 = vpop.permute.xlu0 %1708  ;;  %v3030_v20 = vadd.f32 %v3029_v25, %v2860_v15  ;;  %v8091_v25 = vld [vmem:[#allocation298_spill] sm:$0xff] }
 0x34a   :  { %1855 = vst.msk [vmem:[#allocation2 + $0x2e0] sm:$0xff] %vm1808_vm4, %v1709_v61  ;;  %v1543_v41 = vmul.f32 %v8075_v43, %v8091_v25  ;;  %v8093_v43 = vld [vmem:[#allocation350_spill] sm:$0xff]  ;;  %v8105_v25 = vld [vmem:[#allocation127_spill] sm:$0xff] }
 0x34b   :  { %2304 = vst.msk [vmem:[#allocation2 + $0x2e0] sm:$0xff] %vm2257_vm5, %v2158_v1  ;;  %v2780_v60 = vpop.f32.mrf.mxu0  ;;  %v2477_v6 = vld [vmem:[#allocation2 + $0xd0] sm:$0xff]  ;;  %v6668_v15 = vmul.f32 %v5280_v13, %v8093_v43 }
 0x34c   :  { %3141 = vst [vmem:[#allocation3 + $0x100] sm:$0xff] %v3030_v20  ;;  %v2950_v62 = vadd.f32 %v6343_v11, %v2780_v60  ;;  %v2591_v23 = vpack.c.bf16 %v2477_v6, %v2475_v38  ;;  %1210 = vrot.lane.b32.xlu2 %v1028_v47, %s3687_s4  ;;  %v8096_v20 = vld [vmem:[#allocation112_spill] sm:$0xff]  ;;  %v3034_v46 = vpop.f32.mrf.mxu3  ;;  %v8100_v6 = vld [vmem:[#allocation133_spill] sm:$0xff] }
 0x34d   :  { %2433 = vst.msk [vmem:[#allocation2 + $0x2e0] sm:$0xff] %vm2386_vm6, %v2368_v26  ;;  %2109 = vrot.lane.b32.xlu1 %v1959_v0, %s3689_s27  ;;  %v2337_v26 = vmul.f32 %v8094_v28, %v6320_v40  ;;  %v1510_v38 = vmul.f32 %v6615_v33, %v8096_v20  ;;  %v1993_v29 = vmul.f32 %v5233_v3, %v6668_v15  ;;  %v8097_v47 = vld [vmem:[#allocation328_spill] sm:$0xff]  ;;  %v8101_v3 = vld [vmem:[#allocation377_spill] sm:$0xff] }
 0x34e   :  { %3109 = vst [vmem:[#allocation3] sm:$0xff] %v2950_v62  ;;  %2809 = vmatmul.bf16.gmra.mxu0 %v2591_v23  ;;  %v1647_v53 = vpop.permute.xlu2 %1646  ;;  %v1545_v0 = vmul.f32 %v8098_v39, %v8097_v47  ;;  %v8099_v33 = vld [vmem:[#allocation132_spill] sm:$0xff]  ;;  %v1449_v52 = vmul.f32 %v8101_v3, %v8100_v6 }
 0x34f   :  { %1662 = vrot.lane.b32.xlu0 %v1511_v42, %s3688_s24  ;;  %v1645_v4 = vpop.permute.xlu1 %1644  ;;  %1824 = vst.msk [vmem:[#allocation2 + $0xf0] sm:$0xff] %vm1808_vm4, %v1647_v53  ;;  %v6690_v60 = vmul.f32 %v8099_v33, %v6632_v32  ;;  %v8102_v42 = vld [vmem:[#allocation136_spill] sm:$0xff]  ;;  %v8104_v32 = vld [vmem:[#allocation125_spill] sm:$0xff] }
 0x350   :  { %v2862_v31 = vpop.f32.mrf.mxu2  ;;  %1823 = vst.msk [vmem:[#allocation2 + $0xe0] sm:$0xff] %vm1808_vm4, %v1645_v4  ;;  %v8103_v62 = vld [vmem:[#allocation372_spill] sm:$0xff] }
 0x351   :  { %v2160_v51 = vpop.permute.xlu0 %2159  ;;  %v3032_v11 = vadd.f32 %v3031_v54, %v2862_v31  ;;  %v6697_v23 = vmul.f32 %v8103_v62, %v8102_v42  ;;  %v1960_v50 = vmul.f32 %v8104_v32, %v6690_v60 }
 0x352   :  { %2305 = vst.msk [vmem:[#allocation2 + $0x2f0] sm:$0xff] %vm2257_vm5, %v2160_v51 }
 0x353   :  { %3142 = vst [vmem:[#allocation3 + $0x108] sm:$0xff] %v3032_v11  ;;  %v2782_v1 = vpop.f32.mrf.mxu0 }
 0x354   :  { %2434 = vst.msk [vmem:[#allocation2 + $0x2f0] sm:$0xff] %vm2386_vm6, %v2369_v45  ;;  %v2952_v49 = vadd.f32 %v6373_v2, %v2782_v1  ;;  %1726 = vrot.lane.b32.xlu2 %v1543_v41, %s3688_s24  ;;  %v2336_v2 = vmul.f32 %v8095_v12, %v6323_v18  ;;  %v2543_v61 = vld [vmem:[#allocation2 + $0x2e0] sm:$0xff]  ;;  %v1513_v41 = vmul.f32 %v1449_v52, %v8105_v25  ;;  %v8108_v12 = vld [vmem:[#allocation128_spill] sm:$0xff] }
 0x355   :  { %1216 = vrot.lane.b32.xlu1 %v1031_v9, %s3687_s4  ;;  %v8106_v9 = vld [vmem:[#allocation129_spill] sm:$0xff] }
 0x356   :  { %3110 = vst [vmem:[#allocation3 + $0x8] sm:$0xff] %v2952_v49  ;;  %v1199_v17 = vpop.permute.xlu2 %1198  ;;  %v1512_v1 = vmul.f32 %v6697_v23, %v8106_v9  ;;  %v3036_v49 = vpop.f32.mrf.mxu3 }
 0x357   :  { %1214 = vrot.lane.b32.xlu0 %v1030_v5, %s3687_s4  ;;  %1392 = vst.msk [vmem:[#allocation2 + $0x300] sm:$0xff] %vm1294_vm2, %v1199_v17  ;;  %v2096_v30 = vpop.permute.xlu1 %2095 }
 0x358   :  { %1393 = vst.msk [vmem:[#allocation2 + $0x308] sm:$0xff] %vm1296_vm3, %v1199_v17 }
 0x359   :  { %2273 = vst.msk [vmem:[#allocation2 + $0xf0] sm:$0xff] %vm2257_vm5, %v2096_v30  ;;  %v2094_v13 = vpop.permute.xlu0 %2093 }
 0x35a   :  { %2402 = vst.msk [vmem:[#allocation2 + $0xf0] sm:$0xff] %vm2386_vm6, %v2337_v26  ;;  %v8107_v26 = vld [vmem:[#allocation253_spill] sm:$0xff] }
 0x35b   :  { %v2545_v40 = vld [vmem:[#allocation2 + $0x2f0] sm:$0xff]  ;;  %2272 = vst.msk [vmem:[#allocation2 + $0xe0] sm:$0xff] %vm2257_vm5, %v2094_v13  ;;  %v2371_v30 = vmul.f32 %v8107_v26, %v6365_v24  ;;  %v8111_v24 = vld [vmem:[#allocation327_spill] sm:$0xff] }
 0x35c   :  { %v2625_v18 = vpack.c.bf16 %v2545_v40, %v2543_v61  ;;  %2401 = vst.msk [vmem:[#allocation2 + $0xe0] sm:$0xff] %vm2386_vm6, %v2336_v2  ;;  %1660 = vrot.lane.b32.xlu2 %v1510_v38, %s3688_s24  ;;  %v6716_v2 = vmul.f32 %v8108_v12, %v1449_v52  ;;  %v8109_v38 = vld [vmem:[#allocation259_spill] sm:$0xff] }
 0x35d   :  { %2177 = vrot.lane.b32.xlu1 %v1993_v29, %s3689_s27  ;;  %v2370_v13 = vmul.f32 %v8109_v38, %v6371_v14  ;;  %v8113_v52 = vld [vmem:[#allocation119_spill] sm:$0xff] }
 0x35e   :  { %2894 = vmatmul.bf16.gmra.mxu2 %v2625_v18  ;;  %v1715_v53 = vpop.permute.xlu2 %1714  ;;  %v8112_v18 = vld [vmem:[#allocation318_spill] sm:$0xff]  ;;  %v1962_v42 = vmul.f32 %v8113_v52, %v6716_v2  ;;  %v8123_v26 = vld [vmem:[#allocation155_spill] sm:$0xff] }
 0x35f   :  { %1730 = vrot.lane.b32.xlu0 %v1545_v0, %s3688_s24  ;;  %v1713_v31 = vpop.permute.xlu1 %1712  ;;  %v2548_v29 = vld [vmem:[#allocation2 + $0x308] sm:$0xff]  ;;  %v1032_v33 = vmul.f32 %v8112_v18, %v8111_v24 }
 0x360   :  { %v2865_v54 = vpop.f32.mrf.mxu2  ;;  %1857 = vst.msk [vmem:[#allocation2 + $0x300] sm:$0xff] %vm1808_vm4, %v1713_v31 }
 0x361   :  { %v3035_v4 = vadd.f32 %v3034_v46, %v2865_v54  ;;  %v1201_v45 = vpop.permute.xlu0 %1200  ;;  %v2481_v11 = vld [vmem:[#allocation2 + $0xf0] sm:$0xff]  ;;  %v8110_v46 = vld [vmem:[#allocation353_spill] sm:$0xff] }
 0x362   :  { %v2785_v51 = vpop.f32.mrf.mxu0  ;;  %1394 = vst.msk [vmem:[#allocation2 + $0x310] sm:$0xff] %vm1294_vm2, %v1201_v45  ;;  %v1544_v40 = vmul.f32 %v8093_v43, %v8110_v46  ;;  %v8114_v43 = vld [vmem:[#allocation324_spill] sm:$0xff]  ;;  %v8126_v46 = vld [vmem:[#allocation122_spill] sm:$0xff] }
 0x363   :  { %3143 = vst [vmem:[#allocation3 + $0x110] sm:$0xff] %v3035_v4  ;;  %v2955_v59 = vadd.f32 %v6408_v63, %v2785_v51  ;;  %v2479_v5 = vld [vmem:[#allocation2 + $0xe0] sm:$0xff]  ;;  %v6735_v62 = vmul.f32 %v8114_v43, %v8098_v39  ;;  %v8117_v51 = vld [vmem:[#allocation96_spill] sm:$0xff] }
 0x364   :  { %1395 = vst.msk [vmem:[#allocation2 + $0x318] sm:$0xff] %vm1296_vm3, %v1201_v45  ;;  %v2593_v17 = vpack.c.bf16 %v2481_v11, %v2479_v5  ;;  %2111 = vrot.lane.b32.xlu2 %v1960_v50, %s3689_s27  ;;  %v8116_v50 = vld [vmem:[#allocation322_spill] sm:$0xff]  ;;  %v2339_v11 = vmul.f32 %v8117_v51, %v6458_v58  ;;  %v8121_v5 = vld [vmem:[#allocation325_spill] sm:$0xff] }
 0x365   :  { %1858 = vst.msk [vmem:[#allocation2 + $0x310] sm:$0xff] %vm1808_vm4, %v1715_v53  ;;  %1666 = vrot.lane.b32.xlu1 %v1513_v41, %s3688_s24  ;;  %v3039_v53 = vpop.f32.mrf.mxu3  ;;  %v1994_v45 = vmul.f32 %v8116_v50, %v6735_v62 }
 0x366   :  { %3111 = vst [vmem:[#allocation3 + $0x10] sm:$0xff] %v2955_v59  ;;  %2814 = vmatmul.bf16.gmra.mxu0 %v2593_v17  ;;  %v1649_v63 = vpop.permute.xlu2 %1648  ;;  %v8119_v59 = vld [vmem:[#allocation359_spill] sm:$0xff] }
 0x367   :  { %1664 = vrot.lane.b32.xlu0 %v1512_v1, %s3688_s24  ;;  %1825 = vst.msk [vmem:[#allocation2 + $0x100] sm:$0xff] %vm1808_vm4, %v1649_v63  ;;  %v2164_v20 = vpop.permute.xlu1 %2163  ;;  %v8120_v1 = vld [vmem:[#allocation321_spill] sm:$0xff]  ;;  %v8122_v63 = vld [vmem:[#allocation130_spill] sm:$0xff] }
 0x368   :  { %v2867_v28 = vpop.f32.mrf.mxu2  ;;  %2307 = vst.msk [vmem:[#allocation2 + $0x310] sm:$0xff] %vm2257_vm5, %v2164_v20  ;;  %v6756_v58 = vmul.f32 %v8122_v63, %v6697_v23  ;;  %v8125_v20 = vld [vmem:[#allocation365_spill] sm:$0xff] }
 0x369   :  { %v3037_v61 = vadd.f32 %v3036_v49, %v2867_v28  ;;  %v2162_v47 = vpop.permute.xlu0 %2161  ;;  %2436 = vst.msk [vmem:[#allocation2 + $0x310] sm:$0xff] %vm2386_vm6, %v2371_v30  ;;  %v1546_v49 = vmul.f32 %v8121_v5, %v8120_v1  ;;  %v8124_v30 = vld [vmem:[#allocation374_spill] sm:$0xff]  ;;  %v6765_v38 = vmul.f32 %v8125_v20, %v8119_v59  ;;  %v8137_v1 = vld [vmem:[#allocation137_spill] sm:$0xff] }
 0x36a   :  { %v2787_v0 = vpop.f32.mrf.mxu0  ;;  %2306 = vst.msk [vmem:[#allocation2 + $0x300] sm:$0xff] %vm2257_vm5, %v2162_v47  ;;  %v1450_v12 = vmul.f32 %v8124_v30, %v8123_v26  ;;  %v8127_v47 = vld [vmem:[#allocation152_spill] sm:$0xff] }
 0x36b   :  { %3144 = vst [vmem:[#allocation3 + $0x118] sm:$0xff] %v3037_v61  ;;  %v2957_v6 = vadd.f32 %v6433_v10, %v2787_v0  ;;  %v2550_v3 = vld [vmem:[#allocation2 + $0x318] sm:$0xff]  ;;  %v8115_v10 = vld [vmem:[#allocation75_spill] sm:$0xff] }
 0x36c   :  { %v2628_v14 = vpack.c.bf16 %v2550_v3, %v2548_v29  ;;  %2435 = vst.msk [vmem:[#allocation2 + $0x300] sm:$0xff] %vm2386_vm6, %v2370_v13  ;;  %1728 = vrot.lane.b32.xlu2 %v1544_v40, %s3688_s24  ;;  %v2338_v54 = vmul.f32 %v8115_v10, %v6394_v19  ;;  %v8118_v19 = vld [vmem:[#allocation364_spill] sm:$0xff]  ;;  %v1961_v40 = vmul.f32 %v8126_v46, %v6756_v58  ;;  %v8128_v0 = vld [vmem:[#allocation373_spill] sm:$0xff]  ;;  %v8140_v46 = vld [vmem:[#allocation315_spill] sm:$0xff] }
 0x36d   :  { %3112 = vst [vmem:[#allocation3 + $0x18] sm:$0xff] %v2957_v6  ;;  %1218 = vrot.lane.b32.xlu1 %v1032_v33, %s3687_s4  ;;  %v1547_v9 = vmul.f32 %v8119_v59, %v8118_v19  ;;  %v3041_v29 = vpop.f32.mrf.mxu3  ;;  %v6772_v24 = vmul.f32 %v8128_v0, %v8127_v47  ;;  %v8129_v6 = vld [vmem:[#allocation146_spill] sm:$0xff]  ;;  %v8141_v47 = vld [vmem:[#allocation93_spill] sm:$0xff] }
 0x36e   :  { %3068 = vmatmul.bf16.gmra.mxu3 %v2628_v14  ;;  %v2100_v4 = vpop.permute.xlu2 %2099  ;;  %v1514_v3 = vmul.f32 %v1450_v12, %v8129_v6  ;;  %v8130_v14 = vld [vmem:[#allocation358_spill] sm:$0xff]  ;;  %v2340_v0 = vmul.f32 %v8141_v47, %v6527_v7  ;;  %v8143_v6 = vld [vmem:[#allocation345_spill] sm:$0xff]  ;;  %v8146_v7 = vld [vmem:[#allocation343_spill] sm:$0xff] }
 0x36f   :  { %2115 = vrot.lane.b32.xlu0 %v1962_v42, %s3689_s27  ;;  %v2098_v31 = vpop.permute.xlu1 %2097  ;;  %v1996_v43 = vmul.f32 %v8130_v14, %v6765_v38  ;;  %v8145_v14 = vld [vmem:[#allocation337_spill] sm:$0xff]  ;;  %v8159_v47 = vld [vmem:[#allocation348_spill] sm:$0xff] }
 0x370   :  { %2274 = vst.msk [vmem:[#allocation2 + $0x100] sm:$0xff] %vm2257_vm5, %v2098_v31  ;;  %v2549_v41 = vld [vmem:[#allocation2 + $0x310] sm:$0xff] }
 0x371   :  { %v2870_v32 = vpop.f32.mrf.mxu2  ;;  %2403 = vst.msk [vmem:[#allocation2 + $0x100] sm:$0xff] %vm2386_vm6, %v2338_v54  ;;  %v1651_v25 = vpop.permute.xlu0 %1650 }
 0x372   :  { %v3040_v39 = vadd.f32 %v3039_v53, %v2870_v32  ;;  %1826 = vst.msk [vmem:[#allocation2 + $0x110] sm:$0xff] %vm1808_vm4, %v1651_v25  ;;  %v8132_v32 = vld [vmem:[#allocation145_spill] sm:$0xff] }
 0x373   :  { %v2547_v17 = vld [vmem:[#allocation2 + $0x300] sm:$0xff]  ;;  %2275 = vst.msk [vmem:[#allocation2 + $0x110] sm:$0xff] %vm2257_vm5, %v2100_v4  ;;  %v8131_v4 = vld [vmem:[#allocation309_spill] sm:$0xff]  ;;  %v6788_v50 = vmul.f32 %v8132_v32, %v6772_v24 }
 0x374   :  { %3145 = vst [vmem:[#allocation3 + $0x120] sm:$0xff] %v3040_v39  ;;  %v2627_v28 = vpack.c.bf16 %v2549_v41, %v2547_v17  ;;  %2179 = vrot.lane.b32.xlu2 %v1994_v45, %s3689_s27  ;;  %v2372_v31 = vmul.f32 %v8131_v4, %v6440_v56  ;;  %v8133_v45 = vld [vmem:[#allocation147_spill] sm:$0xff]  ;;  %v8135_v41 = vld [vmem:[#allocation366_spill] sm:$0xff]  ;;  %v8147_v4 = vld [vmem:[#allocation336_spill] sm:$0xff] }
 0x375   :  { %2404 = vst.msk [vmem:[#allocation2 + $0x110] sm:$0xff] %vm2386_vm6, %v2339_v11  ;;  %1734 = vrot.lane.b32.xlu1 %v1547_v9, %s3688_s24  ;;  %v6792_v39 = vmul.f32 %v8133_v45, %v1450_v12  ;;  %v8134_v11 = vld [vmem:[#allocation282_spill] sm:$0xff]  ;;  %v8136_v56 = vld [vmem:[#allocation355_spill] sm:$0xff]  ;;  %v3044_v30 = vpop.f32.mrf.mxu3 }
 0x376   :  { %2899 = vmatmul.bf16.gmra.mxu2 %v2627_v28  ;;  %v1717_v61 = vpop.permute.xlu2 %1716  ;;  %v2373_v25 = vmul.f32 %v8134_v11, %v6506_v27  ;;  %v1033_v19 = vmul.f32 %v8136_v56, %v8135_v41  ;;  %v8138_v28 = vld [vmem:[#allocation140_spill] sm:$0xff] }
 0x377   :  { %1732 = vrot.lane.b32.xlu0 %v1546_v49, %s3688_s24  ;;  %v1205_v13 = vpop.permute.xlu1 %1204  ;;  %v1964_v49 = vmul.f32 %v8137_v1, %v6788_v50  ;;  %v1963_v63 = vmul.f32 %v8138_v28, %v6792_v39  ;;  %v8149_v41 = vld [vmem:[#allocation144_spill] sm:$0xff]  ;;  %v8152_v1 = vld [vmem:[#allocation90_spill] sm:$0xff]  ;;  %v8153_v28 = vld [vmem:[#allocation333_spill] sm:$0xff] }
 0x378   :  { %1398 = vst.msk [vmem:[#allocation2 + $0x330] sm:$0xff] %vm1294_vm2, %v1205_v13  ;;  %v2483_v42 = vld [vmem:[#allocation2 + $0x100] sm:$0xff]  ;;  %v1515_v56 = vmul.f32 %v6772_v24, %v8149_v41 }
 0x379   :  { %v2872_v23 = vpop.f32.mrf.mxu2  ;;  %1399 = vst.msk [vmem:[#allocation2 + $0x338] sm:$0xff] %vm1296_vm3, %v1205_v13  ;;  %v1203_v33 = vpop.permute.xlu0 %1202 }
 0x37a   :  { %v3042_v18 = vadd.f32 %v3041_v29, %v2872_v23  ;;  %1396 = vst.msk [vmem:[#allocation2 + $0x320] sm:$0xff] %vm1294_vm2, %v1203_v33  ;;  %v2790_v52 = vpop.f32.mrf.mxu0 }
 0x37b   :  { %v2960_v10 = vadd.f32 %v6462_v44, %v2790_v52  ;;  %1397 = vst.msk [vmem:[#allocation2 + $0x328] sm:$0xff] %vm1296_vm3, %v1203_v33  ;;  %v8142_v33 = vld [vmem:[#allocation344_spill] sm:$0xff] }
 0x37c   :  { %3146 = vst [vmem:[#allocation3 + $0x128] sm:$0xff] %v3042_v18  ;;  %v2485_v54 = vld [vmem:[#allocation2 + $0x110] sm:$0xff]  ;;  %2113 = vrot.lane.b32.xlu2 %v1961_v40, %s3689_s27 }
 0x37d   :  { %1859 = vst.msk [vmem:[#allocation2 + $0x320] sm:$0xff] %vm1808_vm4, %v1717_v61  ;;  %v2595_v53 = vpack.c.bf16 %v2485_v54, %v2483_v42  ;;  %1668 = vrot.lane.b32.xlu1 %v1514_v3, %s3688_s24  ;;  %v8139_v61 = vld [vmem:[#allocation317_spill] sm:$0xff]  ;;  %v1548_v3 = vmul.f32 %v8143_v6, %v8142_v33  ;;  %v8144_v42 = vld [vmem:[#allocation347_spill] sm:$0xff]  ;;  %v3046_v32 = vpop.f32.mrf.mxu3 }
 0x37e   :  { %3113 = vst [vmem:[#allocation3 + $0x20] sm:$0xff] %v2960_v10  ;;  %v2168_v44 = vpop.permute.xlu2 %2167  ;;  %v6811_v20 = vmul.f32 %v8139_v61, %v8121_v5  ;;  %v8156_v61 = vld [vmem:[#allocation171_spill] sm:$0xff] }
 0x37f   :  { %2183 = vrot.lane.b32.xlu0 %v1996_v43, %s3689_s27  ;;  %2819 = vmatmul.bf16.gmra.mxu0 %v2595_v53  ;;  %v2166_v51 = vpop.permute.xlu1 %2165  ;;  %v1035_v43 = vmul.f32 %v8145_v14, %v8144_v42  ;;  %v8162_v14 = vld [vmem:[#allocation162_spill] sm:$0xff] }
 0x380   :  { %2308 = vst.msk [vmem:[#allocation2 + $0x320] sm:$0xff] %vm2257_vm5, %v2166_v51  ;;  %v2554_v9 = vld [vmem:[#allocation2 + $0x338] sm:$0xff]  ;;  %v1995_v40 = vmul.f32 %v8140_v46, %v6811_v20 }
 0x381   :  { %2437 = vst.msk [vmem:[#allocation2 + $0x320] sm:$0xff] %vm2386_vm6, %v2372_v31  ;;  %v1719_v59 = vpop.permute.xlu0 %1718  ;;  %v6832_v31 = vmul.f32 %v8147_v4, %v8146_v7 }
 0x382   :  { %1860 = vst.msk [vmem:[#allocation2 + $0x330] sm:$0xff] %vm1808_vm4, %v1719_v59  ;;  %v2792_v17 = vpop.f32.mrf.mxu0  ;;  %v2552_v26 = vld [vmem:[#allocation2 + $0x328] sm:$0xff] }
 0x383   :  { %2309 = vst.msk [vmem:[#allocation2 + $0x330] sm:$0xff] %vm2257_vm5, %v2168_v44  ;;  %v2962_v27 = vadd.f32 %v6489_v8, %v2792_v17  ;;  %v2630_v12 = vpack.c.bf16 %v2554_v9, %v2552_v26  ;;  %v8148_v44 = vld [vmem:[#allocation341_spill] sm:$0xff]  ;;  %v8151_v59 = vld [vmem:[#allocation183_spill] sm:$0xff]  ;;  %v8154_v26 = vld [vmem:[#allocation338_spill] sm:$0xff] }
 0x384   :  { %2438 = vst.msk [vmem:[#allocation2 + $0x330] sm:$0xff] %vm2386_vm6, %v2373_v25  ;;  %1220 = vrot.lane.b32.xlu2 %v1033_v19, %s3687_s4  ;;  %v6837_v45 = vmul.f32 %v8148_v44, %v8143_v6  ;;  %v8150_v19 = vld [vmem:[#allocation151_spill] sm:$0xff]  ;;  %v8161_v6 = vld [vmem:[#allocation134_spill] sm:$0xff] }
 0x385   :  { %3114 = vst [vmem:[#allocation3 + $0x28] sm:$0xff] %v2962_v27  ;;  %2119 = vrot.lane.b32.xlu1 %v1964_v49, %s3689_s27  ;;  %3073 = vmatmul.bf16.gmra.mxu3 %v2630_v12  ;;  %v6845_v9 = vmul.f32 %v8151_v59, %v8150_v19  ;;  %v2341_v49 = vmul.f32 %v8152_v1, %v6487_v55  ;;  %v8155_v55 = vld [vmem:[#allocation143_spill] sm:$0xff]  ;;  %v8163_v44 = vld [vmem:[#allocation330_spill] sm:$0xff]  ;;  %v8166_v59 = vld [vmem:[#allocation352_spill] sm:$0xff] }
 0x386   :  { %v2102_v13 = vpop.permute.xlu2 %2101  ;;  %v8165_v19 = vld [vmem:[#allocation362_spill] sm:$0xff] }
 0x387   :  { %2117 = vrot.lane.b32.xlu0 %v1963_v63, %s3689_s27  ;;  %v1655_v8 = vpop.permute.xlu1 %1654  ;;  %v1998_v63 = vmul.f32 %v8153_v28, %v6832_v31  ;;  %v6862_v12 = vmul.f32 %v8155_v55, %v6845_v9  ;;  %v1037_v1 = vmul.f32 %v8166_v59, %v8165_v19  ;;  %v8168_v28 = vld [vmem:[#allocation361_spill] sm:$0xff]  ;;  %v8183_v59 = vld [vmem:[#allocation158_spill] sm:$0xff] }
 0x388   :  { %v2875_v29 = vpop.f32.mrf.mxu2  ;;  %1828 = vst.msk [vmem:[#allocation2 + $0x130] sm:$0xff] %vm1808_vm4, %v1655_v8  ;;  %v2551_v18 = vld [vmem:[#allocation2 + $0x320] sm:$0xff] }
 0x389   :  { %v3045_v23 = vadd.f32 %v3044_v30, %v2875_v29  ;;  %v1653_v5 = vpop.permute.xlu0 %1652  ;;  %v1997_v30 = vmul.f32 %v8154_v26, %v6837_v45  ;;  %v8170_v26 = vld [vmem:[#allocation370_spill] sm:$0xff] }
 0x38a   :  { %1827 = vst.msk [vmem:[#allocation2 + $0x120] sm:$0xff] %vm1808_vm4, %v1653_v5 }
 0x38b   :  { %3147 = vst [vmem:[#allocation3 + $0x130] sm:$0xff] %v3045_v23  ;;  %v2795_v52 = vpop.f32.mrf.mxu0  ;;  %v2553_v54 = vld [vmem:[#allocation2 + $0x330] sm:$0xff] }
 0x38c   :  { %v2965_v10 = vadd.f32 %v6516_v57, %v2795_v52  ;;  %2276 = vst.msk [vmem:[#allocation2 + $0x120] sm:$0xff] %vm2257_vm5, %v2102_v13  ;;  %v2629_v53 = vpack.c.bf16 %v2553_v54, %v2551_v18  ;;  %2181 = vrot.lane.b32.xlu2 %v1995_v40, %s3689_s27  ;;  %v8157_v13 = vld [vmem:[#allocation376_spill] sm:$0xff]  ;;  %v3049_v18 = vpop.f32.mrf.mxu3 }
 0x38d   :  { %2405 = vst.msk [vmem:[#allocation2 + $0x120] sm:$0xff] %vm2386_vm6, %v2340_v0  ;;  %1736 = vrot.lane.b32.xlu1 %v1548_v3, %s3688_s24  ;;  %v6866_v29 = vmul.f32 %v8157_v13, %v8156_v61  ;;  %v8158_v23 = vld [vmem:[#allocation276_spill] sm:$0xff]  ;;  %v8160_v0 = vld [vmem:[#allocation342_spill] sm:$0xff]  ;;  %v1965_v3 = vmul.f32 %v8161_v6, %v6862_v12 }
 0x38e   :  { %3115 = vst [vmem:[#allocation3 + $0x30] sm:$0xff] %v2965_v10  ;;  %2904 = vmatmul.bf16.gmra.mxu2 %v2629_v53  ;;  %v1209_v57 = vpop.permute.xlu2 %1208  ;;  %v2374_v46 = vmul.f32 %v8158_v23, %v6576_v21  ;;  %v1034_v5 = vmul.f32 %v8160_v0, %v8159_v47  ;;  %v8171_v13 = vld [vmem:[#allocation108_spill] sm:$0xff]  ;;  %v8173_v47 = vld [vmem:[#allocation111_spill] sm:$0xff] }
 0x38f   :  { %1224 = vrot.lane.b32.xlu0 %v1035_v43, %s3687_s4  ;;  %1402 = vst.msk [vmem:[#allocation2 + $0x350] sm:$0xff] %vm1294_vm2, %v1209_v57  ;;  %v1207_v11 = vpop.permute.xlu1 %1206  ;;  %v1517_v43 = vmul.f32 %v6866_v29, %v8162_v14  ;;  %v2342_v0 = vmul.f32 %v8173_v47, %v6562_v16  ;;  %v8177_v16 = vld [vmem:[#allocation163_spill] sm:$0xff]  ;;  %v8188_v47 = vld [vmem:[#allocation369_spill] sm:$0xff] }
 0x390   :  { %v2877_v51 = vpop.f32.mrf.mxu2  ;;  %1403 = vst.msk [vmem:[#allocation2 + $0x358] sm:$0xff] %vm1296_vm3, %v1209_v57 }
 0x391   :  { %v3047_v25 = vadd.f32 %v3046_v32, %v2877_v51  ;;  %1400 = vst.msk [vmem:[#allocation2 + $0x340] sm:$0xff] %vm1294_vm2, %v1207_v11  ;;  %v2104_v17 = vpop.permute.xlu0 %2103  ;;  %v2375_v51 = vmul.f32 %v8163_v44, %v6537_v35 }
 0x392   :  { %1401 = vst.msk [vmem:[#allocation2 + $0x348] sm:$0xff] %vm1296_vm3, %v1207_v11  ;;  %v2969_v11 = vpop.f32.mrf.mxu1 }
 0x393   :  { %3148 = vst [vmem:[#allocation3 + $0x138] sm:$0xff] %v3047_v25  ;;  %v2797_v27 = vpop.f32.mrf.mxu0  ;;  %v8164_v25 = vld [vmem:[#allocation339_spill] sm:$0xff] }
 0x394   :  { %v2967_v24 = vadd.f32 %v6550_v36, %v2797_v27  ;;  %2277 = vst.msk [vmem:[#allocation2 + $0x130] sm:$0xff] %vm2257_vm5, %v2104_v17  ;;  %1670 = vrot.lane.b32.xlu2 %v1515_v56, %s3688_s24  ;;  %v2487_v42 = vld [vmem:[#allocation2 + $0x120] sm:$0xff]  ;;  %v1549_v41 = vmul.f32 %v8146_v7, %v8164_v25  ;;  %v8167_v17 = vld [vmem:[#allocation371_spill] sm:$0xff]  ;;  %v3051_v27 = vpop.f32.mrf.mxu3  ;;  %v8182_v25 = vld [vmem:[#allocation156_spill] sm:$0xff] }
 0x395   :  { %2406 = vst.msk [vmem:[#allocation2 + $0x130] sm:$0xff] %vm2386_vm6, %v2341_v49  ;;  %2187 = vrot.lane.b32.xlu1 %v1998_v63, %s3689_s27  ;;  %v1036_v63 = vmul.f32 %v8168_v28, %v8167_v17  ;;  %v8169_v7 = vld [vmem:[#allocation363_spill] sm:$0xff]  ;;  %v8184_v17 = vld [vmem:[#allocation160_spill] sm:$0xff] }
 0x396   :  { %3116 = vst [vmem:[#allocation3 + $0x38] sm:$0xff] %v2967_v24  ;;  %v2170_v36 = vpop.permute.xlu2 %2169 }
 0x397   :  { %2185 = vrot.lane.b32.xlu0 %v1997_v30, %s3689_s27  ;;  %v1723_v8 = vpop.permute.xlu1 %1722  ;;  %v2558_v40 = vld [vmem:[#allocation2 + $0x358] sm:$0xff]  ;;  %v6900_v30 = vmul.f32 %v8170_v26, %v8169_v7  ;;  %v8185_v26 = vld [vmem:[#allocation294_spill] sm:$0xff] }
 0x398   :  { %1862 = vst.msk [vmem:[#allocation2 + $0x350] sm:$0xff] %vm1808_vm4, %v1723_v8 }
 0x399   :  { %v1721_v33 = vpop.permute.xlu0 %1720  ;;  %v2556_v52 = vld [vmem:[#allocation2 + $0x348] sm:$0xff] }
 0x39a   :  { %1861 = vst.msk [vmem:[#allocation2 + $0x340] sm:$0xff] %vm1808_vm4, %v1721_v33  ;;  %v2632_v10 = vpack.c.bf16 %v2558_v40, %v2556_v52  ;;  %v2971_v6 = vpop.f32.mrf.mxu1  ;;  %v8175_v52 = vld [vmem:[#allocation356_spill] sm:$0xff] }
 0x39b   :  { %2310 = vst.msk [vmem:[#allocation2 + $0x340] sm:$0xff] %vm2257_vm5, %v2170_v36  ;;  %v2343_v36 = vmul.f32 %v8171_v13, %v6557_v22 }
 0x39c   :  { %2439 = vst.msk [vmem:[#allocation2 + $0x340] sm:$0xff] %vm2386_vm6, %v2374_v46  ;;  %v2489_v21 = vld [vmem:[#allocation2 + $0x130] sm:$0xff]  ;;  %1222 = vrot.lane.b32.xlu2 %v1034_v5, %s3687_s4  ;;  %3078 = vmatmul.bf16.gmra.mxu3 %v2632_v10  ;;  %v8172_v46 = vld [vmem:[#allocation142_spill] sm:$0xff]  ;;  %v6921_v10 = vmul.f32 %v8177_v16, %v6866_v29 }
 0x39d   :  { %v2597_v54 = vpack.c.bf16 %v2489_v21, %v2487_v42  ;;  %2121 = vrot.lane.b32.xlu1 %v1965_v3, %s3689_s27  ;;  %v1516_v40 = vmul.f32 %v6845_v9, %v8172_v46  ;;  %v8176_v42 = vld [vmem:[#allocation354_spill] sm:$0xff]  ;;  %v8178_v21 = vld [vmem:[#allocation165_spill] sm:$0xff] }
 0x39e   :  { %v1659_v4 = vpop.permute.xlu2 %1658  ;;  %v1551_v14 = vmul.f32 %v8176_v42, %v8175_v52  ;;  %v8187_v46 = vld [vmem:[#allocation302_spill] sm:$0xff] }
 0x39f   :  { %1674 = vrot.lane.b32.xlu0 %v1517_v43, %s3688_s24  ;;  %2824 = vmatmul.bf16.gmra.mxu0 %v2597_v54  ;;  %1830 = vst.msk [vmem:[#allocation2 + $0x150] sm:$0xff] %vm1808_vm4, %v1659_v4  ;;  %v1657_v57 = vpop.permute.xlu1 %1656  ;;  %v8179_v54 = vld [vmem:[#allocation188_spill] sm:$0xff]  ;;  %v3054_v4 = vpop.f32.mrf.mxu3 }
 0x3a0   :  { %v2880_v53 = vpop.f32.mrf.mxu2  ;;  %1829 = vst.msk [vmem:[#allocation2 + $0x140] sm:$0xff] %vm1808_vm4, %v1657_v57  ;;  %v8181_v57 = vld [vmem:[#allocation375_spill] sm:$0xff] }
 0x3a1   :  { %v3050_v32 = vadd.f32 %v3049_v18, %v2880_v53  ;;  %v2172_v56 = vpop.permute.xlu0 %2171  ;;  %v8174_v18 = vld [vmem:[#allocation367_spill] sm:$0xff]  ;;  %v1455_v53 = vmul.f32 %v8179_v54, %v8178_v21 }
 0x3a2   :  { %2311 = vst.msk [vmem:[#allocation2 + $0x350] sm:$0xff] %vm2257_vm5, %v2172_v56  ;;  %v2800_v49 = vpop.f32.mrf.mxu0  ;;  %v1999_v33 = vmul.f32 %v8174_v18, %v6900_v30 }
 0x3a3   :  { %3149 = vst [vmem:[#allocation3 + $0x140] sm:$0xff] %v3050_v32  ;;  %v2970_v35 = vadd.f32 %v2969_v11, %v2800_v49  ;;  %v2555_v23 = vld [vmem:[#allocation2 + $0x340] sm:$0xff] }
 0x3a4   :  { %2440 = vst.msk [vmem:[#allocation2 + $0x350] sm:$0xff] %vm2386_vm6, %v2375_v51  ;;  %1738 = vrot.lane.b32.xlu2 %v1549_v41, %s3688_s24  ;;  %v8180_v32 = vld [vmem:[#allocation170_spill] sm:$0xff]  ;;  %v1966_v41 = vmul.f32 %v8182_v25, %v6921_v10 }
 0x3a5   :  { %3117 = vst [vmem:[#allocation3 + $0x40] sm:$0xff] %v2970_v35  ;;  %1228 = vrot.lane.b32.xlu1 %v1037_v1, %s3687_s4  ;;  %v6929_v44 = vmul.f32 %v8181_v57, %v8180_v32  ;;  %v1519_v1 = vmul.f32 %v1455_v53, %v8183_v59  ;;  %v8193_v57 = vld [vmem:[#allocation349_spill] sm:$0xff] }
 0x3a6   :  { %v1211_v55 = vpop.permute.xlu2 %1210 }
 0x3a7   :  { %1226 = vrot.lane.b32.xlu0 %v1036_v63, %s3687_s4  ;;  %1404 = vst.msk [vmem:[#allocation2 + $0x360] sm:$0xff] %vm1294_vm2, %v1211_v55  ;;  %v2108_v8 = vpop.permute.xlu1 %2107  ;;  %v1518_v28 = vmul.f32 %v6929_v44, %v8184_v17  ;;  %v2974_v63 = vpop.f32.mrf.mxu1  ;;  %v8195_v17 = vld [vmem:[#allocation153_spill] sm:$0xff]  ;;  %s3177_s4 = sshll.u32 %s3690_s1, 4  ;;  %s3178_s4 = int_to_ptr.vmem [resolvable:$true] %s3177_s4 }
 0x3a8   :  { %v2882_v24 = vpop.f32.mrf.mxu2  ;;  %1405 = vst.msk [vmem:[#allocation2 + $0x368] sm:$0xff] %vm1296_vm3, %v1211_v55 }
 0x3a9   :  { %v3052_v61 = vadd.f32 %v3051_v27, %v2882_v24  ;;  %v2106_v5 = vpop.permute.xlu0 %2105  ;;  %2279 = vst.msk [vmem:[#allocation2 + $0x150] sm:$0xff] %vm2257_vm5, %v2108_v8  ;;  %v2377_v24 = vmul.f32 %v8185_v26, %v6601_v34 }
 0x3aa   :  { %v2802_v3 = vpop.f32.mrf.mxu0  ;;  %2408 = vst.msk [vmem:[#allocation2 + $0x150] sm:$0xff] %vm2386_vm6, %v2343_v36  ;;  %v3056_v36 = vpop.f32.mrf.mxu3 }
 0x3ab   :  { %3150 = vst [vmem:[#allocation3 + $0x148] sm:$0xff] %v3052_v61  ;;  %v2557_v22 = vld [vmem:[#allocation2 + $0x350] sm:$0xff]  ;;  %v2972_v43 = vadd.f32 %v2971_v6, %v2802_v3  ;;  %v8186_v61 = vld [vmem:[#allocation159_spill] sm:$0xff] }
 0x3ac   :  { %v2631_v9 = vpack.c.bf16 %v2557_v22, %v2555_v23  ;;  %2278 = vst.msk [vmem:[#allocation2 + $0x140] sm:$0xff] %vm2257_vm5, %v2106_v5  ;;  %1672 = vrot.lane.b32.xlu2 %v1516_v40, %s3688_s24  ;;  %v6947_v13 = vmul.f32 %v8186_v61, %v1455_v53  ;;  %v2376_v40 = vmul.f32 %v8187_v46, %v6606_v37  ;;  %v8189_v3 = vld [vmem:[#allocation148_spill] sm:$0xff]  ;;  %v8192_v53 = vld [vmem:[#allocation126_spill] sm:$0xff] }
 0x3ad   :  { %2407 = vst.msk [vmem:[#allocation2 + $0x140] sm:$0xff] %vm2386_vm6, %v2342_v0  ;;  %2189 = vrot.lane.b32.xlu1 %v1999_v33, %s3689_s27  ;;  %v1550_v0 = vmul.f32 %v8169_v7, %v8188_v47  ;;  %v8190_v7 = vld [vmem:[#allocation357_spill] sm:$0xff]  ;;  %v8196_v61 = vld [vmem:[#allocation346_spill] sm:$0xff]  ;;  %v8197_v47 = vld [vmem:[#allocation323_spill] sm:$0xff] }
 0x3ae   :  { %2909 = vmatmul.bf16.gmra.mxu2 %v2631_v9  ;;  %3118 = vst [vmem:[#allocation3 + $0x48] sm:$0xff] %v2972_v43  ;;  %v1727_v51 = vpop.permute.xlu2 %1726  ;;  %v1968_v22 = vmul.f32 %v8189_v3, %v6947_v13  ;;  %v8191_v43 = vld [vmem:[#allocation105_spill] sm:$0xff] }
 0x3af   :  { %1742 = vrot.lane.b32.xlu0 %v1551_v14, %s3688_s24  ;;  %v1725_v11 = vpop.permute.xlu1 %1724  ;;  %v2560_v6 = vld [vmem:[#allocation2 + $0x368] sm:$0xff]  ;;  %v6963_v14 = vmul.f32 %v8190_v7, %v8176_v42  ;;  %v2344_v9 = vmul.f32 %v8191_v43, %v6628_v48  ;;  %v2976_v16 = vpop.f32.mrf.mxu1 }
 0x3b0   :  { %1863 = vst.msk [vmem:[#allocation2 + $0x360] sm:$0xff] %vm1808_vm4, %v1725_v11 }
 0x3b1   :  { %v2885_v29 = vpop.f32.mrf.mxu2  ;;  %v1213_v19 = vpop.permute.xlu0 %1212  ;;  %v2493_v49 = vld [vmem:[#allocation2 + $0x150] sm:$0xff]  ;;  %v2000_v42 = vmul.f32 %v8193_v57, %v6963_v14 }
 0x3b2   :  { %v3055_v56 = vadd.f32 %v3054_v4, %v2885_v29  ;;  %1406 = vst.msk [vmem:[#allocation2 + $0x370] sm:$0xff] %vm1294_vm2, %v1213_v19  ;;  %v2345_v4 = vmul.f32 %v8192_v53, %v6690_v60  ;;  %v8194_v60 = vld [vmem:[#allocation161_spill] sm:$0xff] }
 0x3b3   :  { %1407 = vst.msk [vmem:[#allocation2 + $0x378] sm:$0xff] %vm1296_vm3, %v1213_v19 }
 0x3b4   :  { %3151 = vst [vmem:[#allocation3 + $0x150] sm:$0xff] %v3055_v56  ;;  %v2491_v27 = vld [vmem:[#allocation2 + $0x140] sm:$0xff]  ;;  %2123 = vrot.lane.b32.xlu2 %v1966_v41, %s3689_s27  ;;  %v6980_v41 = vmul.f32 %v8194_v60, %v6929_v44  ;;  %v3059_v56 = vpop.f32.mrf.mxu3 }
 0x3b5   :  { %1864 = vst.msk [vmem:[#allocation2 + $0x370] sm:$0xff] %vm1808_vm4, %v1727_v51  ;;  %v2599_v35 = vpack.c.bf16 %v2493_v49, %v2491_v27  ;;  %1678 = vrot.lane.b32.xlu1 %v1519_v1, %s3688_s24 }
 0x3b6   :  { %v1661_v55 = vpop.permute.xlu2 %1660 }
 0x3b7   :  { %1676 = vrot.lane.b32.xlu0 %v1518_v28, %s3688_s24  ;;  %2829 = vmatmul.bf16.gmra.mxu0 %v2599_v35  ;;  %1831 = vst.msk [vmem:[#allocation2 + $0x160] sm:$0xff] %vm1808_vm4, %v1661_v55  ;;  %v2176_v8 = vpop.permute.xlu1 %2175  ;;  %v2979_v1 = vpop.f32.mrf.mxu1  ;;  %v1967_v28 = vmul.f32 %v8195_v17, %v6980_v41 }
 0x3b8   :  { %2313 = vst.msk [vmem:[#allocation2 + $0x370] sm:$0xff] %vm2257_vm5, %v2176_v8 }
 0x3b9   :  { %v2887_v23 = vpop.f32.mrf.mxu2  ;;  %2442 = vst.msk [vmem:[#allocation2 + $0x370] sm:$0xff] %vm2386_vm6, %v2377_v24  ;;  %v2174_v18 = vpop.permute.xlu0 %2173 }
 0x3ba   :  { %v2805_v34 = vpop.f32.mrf.mxu0  ;;  %v3057_v5 = vadd.f32 %v3056_v36, %v2887_v23  ;;  %2312 = vst.msk [vmem:[#allocation2 + $0x360] sm:$0xff] %vm2257_vm5, %v2174_v18  ;;  %v2562_v52 = vld [vmem:[#allocation2 + $0x378] sm:$0xff]  ;;  %v2378_v36 = vmul.f32 %v8196_v61, %v6668_v15 }
 0x3bb   :  { %v2975_v33 = vadd.f32 %v2974_v63, %v2805_v34  ;;  %2441 = vst.msk [vmem:[#allocation2 + $0x360] sm:$0xff] %vm2386_vm6, %v2376_v40  ;;  %v2634_v37 = vpack.c.bf16 %v2562_v52, %v2560_v6 }
 0x3bc   :  { %3152 = vst [vmem:[#allocation3 + $0x158] sm:$0xff] %v3057_v5  ;;  %1740 = vrot.lane.b32.xlu2 %v1550_v0, %s3688_s24  ;;  %v3061_v46 = vpop.f32.mrf.mxu3  ;;  %v2379_v0 = vmul.f32 %v8197_v47, %v6735_v62  ;;  %v8198_v62 = vld [vmem:[#allocation123_spill] sm:$0xff] }
 0x3bd   :  { %3119 = vst [vmem:[#allocation3 + $0x50] sm:$0xff] %v2975_v33  ;;  %3083 = vmatmul.bf16.gmra.mxu3 %v2634_v37  ;;  %v2346_v7 = vmul.f32 %v8198_v62, %v6756_v58 }
 0x3be   :  { %v2112_v21 = vpop.permute.xlu2 %2111 }
 0x3bf   :  { %2127 = vrot.lane.b32.xlu0 %v1968_v22, %s3689_s27  ;;  %v2110_v54 = vpop.permute.xlu1 %2109  ;;  %v2981_v33 = vpop.f32.mrf.mxu1 }
 0x3c0   :  { %2280 = vst.msk [vmem:[#allocation2 + $0x160] sm:$0xff] %vm2257_vm5, %v2110_v54  ;;  %v2561_v48 = vld [vmem:[#allocation2 + $0x370] sm:$0xff] }
 0x3c1   :  { %2409 = vst.msk [vmem:[#allocation2 + $0x160] sm:$0xff] %vm2386_vm6, %v2344_v9  ;;  %v1663_v51 = vpop.permute.xlu0 %1662 }
 0x3c2   :  { %v2807_v32 = vpop.f32.mrf.mxu0  ;;  %1832 = vst.msk [vmem:[#allocation2 + $0x170] sm:$0xff] %vm1808_vm4, %v1663_v51  ;;  %v2559_v29 = vld [vmem:[#allocation2 + $0x360] sm:$0xff] }
 0x3c3   :  { %v2977_v11 = vadd.f32 %v2976_v16, %v2807_v32  ;;  %2281 = vst.msk [vmem:[#allocation2 + $0x170] sm:$0xff] %vm2257_vm5, %v2112_v21  ;;  %v2633_v25 = vpack.c.bf16 %v2561_v48, %v2559_v29 }
 0x3c4   :  { %2410 = vst.msk [vmem:[#allocation2 + $0x170] sm:$0xff] %vm2386_vm6, %v2345_v4  ;;  %2191 = vrot.lane.b32.xlu2 %v2000_v42, %s3689_s27  ;;  %v3064_v54 = vpop.f32.mrf.mxu3  ;;  %v8199_v42 = vld [vmem:[#allocation120_spill] sm:$0xff] }
 0x3c5   :  { %3120 = vst [vmem:[#allocation3 + $0x58] sm:$0xff] %v2977_v11  ;;  %2914 = vmatmul.bf16.gmra.mxu2 %v2633_v25  ;;  %v2347_v51 = vmul.f32 %v8199_v42, %v6716_v2 }
 0x3c6   :  { %v1729_v19 = vpop.permute.xlu2 %1728 }
 0x3c7   :  { %v1217_v59 = vpop.permute.xlu1 %1216  ;;  %v2984_v58 = vpop.f32.mrf.mxu1 }
 0x3c8   :  { %v2890_v49 = vpop.f32.mrf.mxu2  ;;  %1410 = vst.msk [vmem:[#allocation2 + $0x390] sm:$0xff] %vm1294_vm2, %v1217_v59  ;;  %v2495_v35 = vld [vmem:[#allocation2 + $0x160] sm:$0xff] }
 0x3c9   :  { %v3060_v63 = vadd.f32 %v3059_v56, %v2890_v49  ;;  %1411 = vst.msk [vmem:[#allocation2 + $0x398] sm:$0xff] %vm1296_vm3, %v1217_v59  ;;  %v1215_v27 = vpop.permute.xlu0 %1214  ;;  %v8200_v49 = vld [vmem:[#allocation316_spill] sm:$0xff] }
 0x3ca   :  { %1408 = vst.msk [vmem:[#allocation2 + $0x380] sm:$0xff] %vm1294_vm2, %v1215_v27  ;;  %v2380_v17 = vmul.f32 %v8200_v49, %v6811_v20 }
 0x3cb   :  { %v2810_v44 = vpop.f32.mrf.mxu0  ;;  %3153 = vst [vmem:[#allocation3 + $0x160] sm:$0xff] %v3060_v63  ;;  %v2497_v24 = vld [vmem:[#allocation2 + $0x170] sm:$0xff] }
 0x3cc   :  { %v2980_v26 = vadd.f32 %v2979_v1, %v2810_v44  ;;  %1409 = vst.msk [vmem:[#allocation2 + $0x388] sm:$0xff] %vm1296_vm3, %v1215_v27  ;;  %v2601_v55 = vpack.c.bf16 %v2497_v24, %v2495_v35  ;;  %2125 = vrot.lane.b32.xlu2 %v1967_v28, %s3689_s27 }
 0x3cd   :  { %1865 = vst.msk [vmem:[#allocation2 + $0x380] sm:$0xff] %vm1808_vm4, %v1729_v19  ;;  %v3066_v19 = vpop.f32.mrf.mxu3 }
 0x3ce   :  { %3121 = vst [vmem:[#allocation3 + $0x60] sm:$0xff] %v2980_v26  ;;  %2834 = vmatmul.bf16.gmra.mxu0 %v2601_v55  ;;  %v2180_v8 = vpop.permute.xlu2 %2179 }
 0x3cf   :  { %v2178_v23 = vpop.permute.xlu1 %2177  ;;  %v2986_v35 = vpop.f32.mrf.mxu1 }
 0x3d0   :  { %v2892_v40 = vpop.f32.mrf.mxu2  ;;  %2314 = vst.msk [vmem:[#allocation2 + $0x380] sm:$0xff] %vm2257_vm5, %v2178_v23  ;;  %v2566_v18 = vld [vmem:[#allocation2 + $0x398] sm:$0xff] }
 0x3d1   :  { %v3062_v34 = vadd.f32 %v3061_v46, %v2892_v40  ;;  %2443 = vst.msk [vmem:[#allocation2 + $0x380] sm:$0xff] %vm2386_vm6, %v2378_v36  ;;  %v1731_v5 = vpop.permute.xlu0 %1730  ;;  %v8201_v36 = vld [vmem:[#allocation360_spill] sm:$0xff]  ;;  %v8202_v46 = vld [vmem:[#allocation138_spill] sm:$0xff] }
 0x3d2   :  { %1866 = vst.msk [vmem:[#allocation2 + $0x390] sm:$0xff] %vm1808_vm4, %v1731_v5  ;;  %v2349_v40 = vmul.f32 %v8202_v46, %v6788_v50  ;;  %v8203_v5 = vld [vmem:[#allocation141_spill] sm:$0xff] }
 0x3d3   :  { %v2812_v15 = vpop.f32.mrf.mxu0  ;;  %3154 = vst [vmem:[#allocation3 + $0x168] sm:$0xff] %v3062_v34  ;;  %v2564_v3 = vld [vmem:[#allocation2 + $0x388] sm:$0xff] }
 0x3d4   :  { %v2982_v6 = vadd.f32 %v2981_v33, %v2812_v15  ;;  %2315 = vst.msk [vmem:[#allocation2 + $0x390] sm:$0xff] %vm2257_vm5, %v2180_v8  ;;  %v2636_v22 = vpack.c.bf16 %v2566_v18, %v2564_v3  ;;  %v2381_v8 = vmul.f32 %v8201_v36, %v6765_v38  ;;  %v2348_v18 = vmul.f32 %v8203_v5, %v6792_v39 }
 0x3d5   :  { %2444 = vst.msk [vmem:[#allocation2 + $0x390] sm:$0xff] %vm2386_vm6, %v2379_v0 }
 0x3d6   :  { %3122 = vst [vmem:[#allocation3 + $0x68] sm:$0xff] %v2982_v6  ;;  %3088 = vmatmul.bf16.gmra.mxu3 %v2636_v22  ;;  %v2114_v52 = vpop.permute.xlu2 %2113 }
 0x3d7   :  { %v1667_v37 = vpop.permute.xlu1 %1666  ;;  %v2989_v6 = vpop.f32.mrf.mxu1 }
 0x3d8   :  { %1834 = vst.msk [vmem:[#allocation2 + $0x190] sm:$0xff] %vm1808_vm4, %v1667_v37  ;;  %v2563_v9 = vld [vmem:[#allocation2 + $0x380] sm:$0xff] }
 0x3d9   :  { %v1665_v43 = vpop.permute.xlu0 %1664 }
 0x3da   :  { %1833 = vst.msk [vmem:[#allocation2 + $0x180] sm:$0xff] %vm1808_vm4, %v1665_v43 }
 0x3db   :  { %2282 = vst.msk [vmem:[#allocation2 + $0x180] sm:$0xff] %vm2257_vm5, %v2114_v52 }
 0x3dc   :  { %2411 = vst.msk [vmem:[#allocation2 + $0x180] sm:$0xff] %vm2386_vm6, %v2346_v7  ;;  %v2565_v16 = vld [vmem:[#allocation2 + $0x390] sm:$0xff] }
 0x3dd   :  { %v2635_v21 = vpack.c.bf16 %v2565_v16, %v2563_v9 }
 0x3de   :  { %v1221_v53 = vpop.permute.xlu2 %1220 }
 0x3df   :  { %2919 = vmatmul.bf16.gmra.mxu2 %v2635_v21  ;;  %1414 = vst.msk [vmem:[#allocation2 + $0x3b0] sm:$0xff] %vm1294_vm2, %v1221_v53  ;;  %v1219_v4 = vpop.permute.xlu1 %1218 }
 0x3e0   :  { %1415 = vst.msk [vmem:[#allocation2 + $0x3b8] sm:$0xff] %vm1296_vm3, %v1221_v53 }
 0x3e1   :  { %v2895_v32 = vpop.f32.mrf.mxu2  ;;  %1412 = vst.msk [vmem:[#allocation2 + $0x3a0] sm:$0xff] %vm1294_vm2, %v1219_v4  ;;  %v2116_v11 = vpop.permute.xlu0 %2115 }
 0x3e2   :  { %v3065_v57 = vadd.f32 %v3064_v54, %v2895_v32  ;;  %1413 = vst.msk [vmem:[#allocation2 + $0x3a8] sm:$0xff] %vm1296_vm3, %v1219_v4  ;;  %v2991_v4 = vpop.f32.mrf.mxu1 }
 0x3e3   :  { %v2815_v48 = vpop.f32.mrf.mxu0  ;;  %2283 = vst.msk [vmem:[#allocation2 + $0x190] sm:$0xff] %vm2257_vm5, %v2116_v11  ;;  %v2499_v27 = vld [vmem:[#allocation2 + $0x180] sm:$0xff] }
 0x3e4   :  { %3155 = vst [vmem:[#allocation3 + $0x170] sm:$0xff] %v3065_v57  ;;  %v2985_v29 = vadd.f32 %v2984_v58, %v2815_v48  ;;  %v8204_v57 = vld [vmem:[#allocation335_spill] sm:$0xff]  ;;  %v8205_v48 = vld [vmem:[#allocation340_spill] sm:$0xff] }
 0x3e5   :  { %2412 = vst.msk [vmem:[#allocation2 + $0x190] sm:$0xff] %vm2386_vm6, %v2347_v51  ;;  %v2383_v42 = vmul.f32 %v8204_v57, %v6832_v31  ;;  %v8206_v31 = vld [vmem:[#allocation135_spill] sm:$0xff] }
 0x3e6   :  { %3123 = vst [vmem:[#allocation3 + $0x70] sm:$0xff] %v2985_v29  ;;  %v2182_v25 = vpop.permute.xlu2 %2181  ;;  %v2382_v29 = vmul.f32 %v8205_v48, %v6837_v45 }
 0x3e7   :  { %v1735_v60 = vpop.permute.xlu1 %1734  ;;  %v2570_v56 = vld [vmem:[#allocation2 + $0x3b8] sm:$0xff] }
 0x3e8   :  { %1868 = vst.msk [vmem:[#allocation2 + $0x3b0] sm:$0xff] %vm1808_vm4, %v1735_v60 }
 0x3e9   :  { %v2897_v59 = vpop.f32.mrf.mxu2  ;;  %v1733_v2 = vpop.permute.xlu0 %1732  ;;  %v2568_v28 = vld [vmem:[#allocation2 + $0x3a8] sm:$0xff] }
 0x3ea   :  { %v3067_v1 = vadd.f32 %v3066_v19, %v2897_v59  ;;  %1867 = vst.msk [vmem:[#allocation2 + $0x3a0] sm:$0xff] %vm1808_vm4, %v1733_v2  ;;  %v2638_v63 = vpack.c.bf16 %v2570_v56, %v2568_v28  ;;  %v2350_v59 = vmul.f32 %v8206_v31, %v6862_v12 }
 0x3eb   :  { %v2817_v44 = vpop.f32.mrf.mxu0  ;;  %2316 = vst.msk [vmem:[#allocation2 + $0x3a0] sm:$0xff] %vm2257_vm5, %v2182_v25 }
 0x3ec   :  { %3156 = vst [vmem:[#allocation3 + $0x178] sm:$0xff] %v3067_v1  ;;  %v2987_v26 = vadd.f32 %v2986_v35, %v2817_v44  ;;  %3093 = vmatmul.bf16.gmra.mxu3 %v2638_v63  ;;  %v2501_v24 = vld [vmem:[#allocation2 + $0x190] sm:$0xff] }
 0x3ed   :  { %2445 = vst.msk [vmem:[#allocation2 + $0x3a0] sm:$0xff] %vm2386_vm6, %v2380_v17  ;;  %v2603_v55 = vpack.c.bf16 %v2501_v24, %v2499_v27  ;;  %v8207_v27 = vld [vmem:[#allocation157_spill] sm:$0xff] }
 0x3ee   :  { %3124 = vst [vmem:[#allocation3 + $0x78] sm:$0xff] %v2987_v26  ;;  %v1671_v61 = vpop.permute.xlu2 %1670  ;;  %v2351_v35 = vmul.f32 %v8207_v27, %v6921_v10 }
 0x3ef   :  { %2839 = vmatmul.bf16.gmra.mxu0 %v2603_v55  ;;  %v1669_v20 = vpop.permute.xlu1 %1668  ;;  %1836 = vst.msk [vmem:[#allocation2 + $0x1b0] sm:$0xff] %vm1808_vm4, %v1671_v61 }
 0x3f0   :  { %1835 = vst.msk [vmem:[#allocation2 + $0x1a0] sm:$0xff] %vm1808_vm4, %v1669_v20  ;;  %v2994_v20 = vpop.f32.mrf.mxu1 }
 0x3f1   :  { %v2184_v23 = vpop.permute.xlu0 %2183  ;;  %v3069_v34 = vpop.f32.mrf.mxu3 }
 0x3f2   :  { %2317 = vst.msk [vmem:[#allocation2 + $0x3b0] sm:$0xff] %vm2257_vm5, %v2184_v23 }
 0x3f3   :  { %2446 = vst.msk [vmem:[#allocation2 + $0x3b0] sm:$0xff] %vm2386_vm6, %v2381_v8 }
 0x3f4   :  { %v2567_v38 = vld [vmem:[#allocation2 + $0x3a0] sm:$0xff] }
 0x3f6   :  { %v1223_v47 = vpop.permute.xlu2 %1222 }
 0x3f7   :  { %v2120_v0 = vpop.permute.xlu1 %2119  ;;  %1416 = vst.msk [vmem:[#allocation2 + $0x3c0] sm:$0xff] %vm1294_vm2, %v1223_v47 }
 0x3f8   :  { %2285 = vst.msk [vmem:[#allocation2 + $0x1b0] sm:$0xff] %vm2257_vm5, %v2120_v0 }
 0x3f9   :  { %v2900_v33 = vpop.f32.mrf.mxu2  ;;  %2414 = vst.msk [vmem:[#allocation2 + $0x1b0] sm:$0xff] %vm2386_vm6, %v2349_v40  ;;  %v2118_v15 = vpop.permute.xlu0 %2117 }
 0x3fa   :  { %v3070_v3 = vadd.f32 %v3069_v34, %v2900_v33  ;;  %2284 = vst.msk [vmem:[#allocation2 + $0x1a0] sm:$0xff] %vm2257_vm5, %v2118_v15  ;;  %v2569_v50 = vld [vmem:[#allocation2 + $0x3b0] sm:$0xff]  ;;  %v3071_v7 = vpop.f32.mrf.mxu3 }
 0x3fb   :  { %2413 = vst.msk [vmem:[#allocation2 + $0x1a0] sm:$0xff] %vm2386_vm6, %v2348_v18  ;;  %v2637_v22 = vpack.c.bf16 %v2569_v50, %v2567_v38  ;;  %v8208_v34 = vld [vmem:[#allocation368_spill] sm:$0xff]  ;;  %v8209_v18 = vld [vmem:[#allocation351_spill] sm:$0xff] }
 0x3fc   :  { %3157 = vst [vmem:[#allocation3 + $0x180] sm:$0xff] %v3070_v3  ;;  %v2820_v52 = vpop.f32.mrf.mxu0  ;;  %v2385_v38 = vmul.f32 %v8209_v18, %v6963_v14  ;;  %v2996_v3 = vpop.f32.mrf.mxu1  ;;  %v8210_v14 = vld [vmem:[#allocation154_spill] sm:$0xff] }
 0x3fd   :  { %1417 = vst.msk [vmem:[#allocation2 + $0x3c8] sm:$0xff] %vm1296_vm3, %v1223_v47  ;;  %v2990_v39 = vadd.f32 %v2989_v6, %v2820_v52  ;;  %2924 = vmatmul.bf16.gmra.mxu2 %v2637_v22  ;;  %v2384_v47 = vmul.f32 %v8208_v34, %v6900_v30 }
 0x3fe   :  { %v1739_v37 = vpop.permute.xlu2 %1738 }
 0x3ff   :  { %3125 = vst [vmem:[#allocation3 + $0x80] sm:$0xff] %v2990_v39  ;;  %v1737_v62 = vpop.permute.xlu1 %1736 }
 0x400   :  { %1869 = vst.msk [vmem:[#allocation2 + $0x3c0] sm:$0xff] %vm1808_vm4, %v1737_v62  ;;  %v2505_v43 = vld [vmem:[#allocation2 + $0x1b0] sm:$0xff] }
 0x401   :  { %v2902_v9 = vpop.f32.mrf.mxu2  ;;  %v1225_v16 = vpop.permute.xlu0 %1224 }
 0x402   :  { %v3072_v21 = vadd.f32 %v3071_v7, %v2902_v9  ;;  %1418 = vst.msk [vmem:[#allocation2 + $0x3d0] sm:$0xff] %vm1294_vm2, %v1225_v16  ;;  %v2503_v54 = vld [vmem:[#allocation2 + $0x1a0] sm:$0xff] }
 0x403   :  { %1419 = vst.msk [vmem:[#allocation2 + $0x3d8] sm:$0xff] %vm1296_vm3, %v1225_v16  ;;  %v2605_v53 = vpack.c.bf16 %v2505_v43, %v2503_v54 }
 0x404   :  { %3158 = vst [vmem:[#allocation3 + $0x188] sm:$0xff] %v3072_v21  ;;  %v2822_v32 = vpop.f32.mrf.mxu0  ;;  %v2572_v25 = vld [vmem:[#allocation2 + $0x3c8] sm:$0xff] }
 0x405   :  { %1870 = vst.msk [vmem:[#allocation2 + $0x3d0] sm:$0xff] %vm1808_vm4, %v1739_v37  ;;  %v2992_v58 = vadd.f32 %v2991_v4, %v2822_v32  ;;  %2844 = vmatmul.bf16.gmra.mxu0 %v2605_v53  ;;  %v2352_v37 = vmul.f32 %v8210_v14, %v6980_v41  ;;  %v8211_v4 = vld [vmem:[#allocation149_spill] sm:$0xff] }
 0x406   :  { %v1673_v51 = vpop.permute.xlu2 %1672  ;;  %v2353_v32 = vmul.f32 %v8211_v4, %v6947_v13 }
 0x407   :  { %3126 = vst [vmem:[#allocation3 + $0x88] sm:$0xff] %v2992_v58  ;;  %v2188_v11 = vpop.permute.xlu1 %2187  ;;  %v2999_v58 = vpop.f32.mrf.mxu1 }
 0x408   :  { %2319 = vst.msk [vmem:[#allocation2 + $0x3d0] sm:$0xff] %vm2257_vm5, %v2188_v11  ;;  %v3074_v45 = vpop.f32.mrf.mxu3 }
 0x409   :  { %2448 = vst.msk [vmem:[#allocation2 + $0x3d0] sm:$0xff] %vm2386_vm6, %v2383_v42  ;;  %v2186_v60 = vpop.permute.xlu0 %2185 }
 0x40a   :  { %2318 = vst.msk [vmem:[#allocation2 + $0x3c0] sm:$0xff] %vm2257_vm5, %v2186_v60  ;;  %v2574_v56 = vld [vmem:[#allocation2 + $0x3d8] sm:$0xff] }
 0x40b   :  { %2447 = vst.msk [vmem:[#allocation2 + $0x3c0] sm:$0xff] %vm2386_vm6, %v2382_v29  ;;  %v2640_v19 = vpack.c.bf16 %v2574_v56, %v2572_v25 }
 0x40c   :  { %1837 = vst.msk [vmem:[#allocation2 + $0x1c0] sm:$0xff] %vm1808_vm4, %v1673_v51 }
 0x40d   :  { %3098 = vmatmul.bf16.gmra.mxu3 %v2640_v19 }
 0x40e   :  { %v2124_v1 = vpop.permute.xlu2 %2123 }
 0x40f   :  { %v2122_v2 = vpop.permute.xlu1 %2121  ;;  %v3001_v25 = vpop.f32.mrf.mxu1 }
 0x410   :  { %2286 = vst.msk [vmem:[#allocation2 + $0x1c0] sm:$0xff] %vm2257_vm5, %v2122_v2  ;;  %v2573_v49 = vld [vmem:[#allocation2 + $0x3d0] sm:$0xff]  ;;  %v3076_v55 = vpop.f32.mrf.mxu3 }
 0x411   :  { %2415 = vst.msk [vmem:[#allocation2 + $0x1c0] sm:$0xff] %vm2386_vm6, %v2350_v59  ;;  %v2905_v17 = vpop.f32.mrf.mxu2  ;;  %v1675_v63 = vpop.permute.xlu0 %1674 }
 0x412   :  { %v3075_v28 = vadd.f32 %v3074_v45, %v2905_v17  ;;  %v2571_v44 = vld [vmem:[#allocation2 + $0x3c0] sm:$0xff]  ;;  %1838 = vst.msk [vmem:[#allocation2 + $0x1d0] sm:$0xff] %vm1808_vm4, %v1675_v63 }
 0x413   :  { %v2639_v26 = vpack.c.bf16 %v2573_v49, %v2571_v44  ;;  %2287 = vst.msk [vmem:[#allocation2 + $0x1d0] sm:$0xff] %vm2257_vm5, %v2124_v1 }
 0x414   :  { %3159 = vst [vmem:[#allocation3 + $0x190] sm:$0xff] %v3075_v28 }
 0x415   :  { %2929 = vmatmul.bf16.gmra.mxu2 %v2639_v26  ;;  %2416 = vst.msk [vmem:[#allocation2 + $0x1d0] sm:$0xff] %vm2386_vm6, %v2351_v35 }
 0x416   :  { %v1741_v24 = vpop.permute.xlu2 %1740 }
 0x417   :  { %v1229_v12 = vpop.permute.xlu1 %1228  ;;  %v3004_v59 = vpop.f32.mrf.mxu1 }
 0x418   :  { %1422 = vst.msk [vmem:[#allocation2 + $0x3f0] sm:$0xff] %vm1294_vm2, %v1229_v12  ;;  %v2507_v8 = vld [vmem:[#allocation2 + $0x1c0] sm:$0xff] }
 0x419   :  { %1423 = vst.msk [vmem:[#allocation2 + $0x3f8] sm:$0xff] %vm1296_vm3, %v1229_v12  ;;  %v2907_v61 = vpop.f32.mrf.mxu2  ;;  %v1227_v36 = vpop.permute.xlu0 %1226 }
 0x41a   :  { %v3077_v10 = vadd.f32 %v3076_v55, %v2907_v61  ;;  %1420 = vst.msk [vmem:[#allocation2 + $0x3e0] sm:$0xff] %vm1294_vm2, %v1227_v36 }
 0x41b   :  { %1421 = vst.msk [vmem:[#allocation2 + $0x3e8] sm:$0xff] %vm1296_vm3, %v1227_v36 }
 0x41c   :  { %3160 = vst [vmem:[#allocation3 + $0x198] sm:$0xff] %v3077_v10  ;;  %v2825_v23 = vpop.f32.mrf.mxu0  ;;  %v2509_v40 = vld [vmem:[#allocation2 + $0x1d0] sm:$0xff] }
 0x41d   :  { %v2995_v46 = vadd.f32 %v2994_v20, %v2825_v23  ;;  %1871 = vst.msk [vmem:[#allocation2 + $0x3e0] sm:$0xff] %vm1808_vm4, %v1741_v24  ;;  %v2607_v0 = vpack.c.bf16 %v2509_v40, %v2507_v8 }
 0x41e   :  { %v2192_v33 = vpop.permute.xlu2 %2191 }
 0x41f   :  { %3127 = vst [vmem:[#allocation3 + $0x90] sm:$0xff] %v2995_v46  ;;  %v2190_v5 = vpop.permute.xlu1 %2189  ;;  %2849 = vmatmul.bf16.gmra.mxu0 %v2607_v0  ;;  %v3079_v21 = vpop.f32.mrf.mxu3 }
 0x420   :  { %2320 = vst.msk [vmem:[#allocation2 + $0x3e0] sm:$0xff] %vm2257_vm5, %v2190_v5  ;;  %v2578_v6 = vld [vmem:[#allocation2 + $0x3f8] sm:$0xff]  ;;  %v3006_v27 = vpop.f32.mrf.mxu1 }
 0x421   :  { %2449 = vst.msk [vmem:[#allocation2 + $0x3e0] sm:$0xff] %vm2386_vm6, %v2384_v47  ;;  %v1743_v15 = vpop.permute.xlu0 %1742 }
 0x422   :  { %1872 = vst.msk [vmem:[#allocation2 + $0x3f0] sm:$0xff] %vm1808_vm4, %v1743_v15  ;;  %v2576_v50 = vld [vmem:[#allocation2 + $0x3e8] sm:$0xff] }
 0x423   :  { %2321 = vst.msk [vmem:[#allocation2 + $0x3f0] sm:$0xff] %vm2257_vm5, %v2192_v33  ;;  %v2642_v52 = vpack.c.bf16 %v2578_v6, %v2576_v50 }
 0x424   :  { %v2827_v30 = vpop.f32.mrf.mxu0  ;;  %2450 = vst.msk [vmem:[#allocation2 + $0x3f0] sm:$0xff] %vm2386_vm6, %v2385_v38 }
 0x425   :  { %v2997_v22 = vadd.f32 %v2996_v3, %v2827_v30  ;;  %3103 = vmatmul.bf16.gmra.mxu3 %v2642_v52 }
 0x426   :  { %v2126_v62 = vpop.permute.xlu2 %2125 }
 0x427   :  { %3128 = vst [vmem:[#allocation3 + $0x98] sm:$0xff] %v2997_v22  ;;  %v1679_v39 = vpop.permute.xlu1 %1678  ;;  %v3081_v51 = vpop.f32.mrf.mxu3 }
 0x428   :  { %1840 = vst.msk [vmem:[#allocation2 + $0x1f0] sm:$0xff] %vm1808_vm4, %v1679_v39  ;;  %v2575_v43 = vld [vmem:[#allocation2 + $0x3e0] sm:$0xff]  ;;  %v3009_v55 = vpop.f32.mrf.mxu1 }
 0x429   :  { %v1677_v7 = vpop.permute.xlu0 %1676 }
 0x42a   :  { %1839 = vst.msk [vmem:[#allocation2 + $0x1e0] sm:$0xff] %vm1808_vm4, %v1677_v7 }
 0x42b   :  { %v2577_v9 = vld [vmem:[#allocation2 + $0x3f0] sm:$0xff]  ;;  %2288 = vst.msk [vmem:[#allocation2 + $0x1e0] sm:$0xff] %vm2257_vm5, %v2126_v62 }
 0x42c   :  { %v2641_v16 = vpack.c.bf16 %v2577_v9, %v2575_v43  ;;  %2417 = vst.msk [vmem:[#allocation2 + $0x1e0] sm:$0xff] %vm2386_vm6, %v2352_v37 }
 0x42e   :  { %2934 = vmatmul.bf16.gmra.mxu2 %v2641_v16 }
 0x430   :  { %v3011_v23 = vpop.f32.mrf.mxu1 }
 0x431   :  { %v2910_v54 = vpop.f32.mrf.mxu2  ;;  %v2128_v41 = vpop.permute.xlu0 %2127 }
 0x432   :  { %v3080_v53 = vadd.f32 %v3079_v21, %v2910_v54  ;;  %2289 = vst.msk [vmem:[#allocation2 + $0x1f0] sm:$0xff] %vm2257_vm5, %v2128_v41 }
 0x433   :  { %2418 = vst.msk [vmem:[#allocation2 + $0x1f0] sm:$0xff] %vm2386_vm6, %v2353_v32  ;;  %v2511_v29 = vld [vmem:[#allocation2 + $0x1e0] sm:$0xff] }
 0x434   :  { %3161 = vst [vmem:[#allocation3 + $0x1a0] sm:$0xff] %v3080_v53  ;;  %v2830_v57 = vpop.f32.mrf.mxu0 }
 0x435   :  { %v3000_v42 = vadd.f32 %v2999_v58, %v2830_v57 }
 0x437   :  { %3129 = vst [vmem:[#allocation3 + $0xa0] sm:$0xff] %v3000_v42 }
 0x438   :  { %v3014_v47 = vpop.f32.mrf.mxu1 }
 0x439   :  { %v2912_v11 = vpop.f32.mrf.mxu2 }
 0x43a   :  { %v3082_v48 = vadd.f32 %v3081_v51, %v2912_v11  ;;  %v2513_v56 = vld [vmem:[#allocation2 + $0x1f0] sm:$0xff] }
 0x43b   :  { %v2609_v13 = vpack.c.bf16 %v2513_v56, %v2511_v29 }
 0x43c   :  { %3162 = vst [vmem:[#allocation3 + $0x1a8] sm:$0xff] %v3082_v48  ;;  %v2832_v60 = vpop.f32.mrf.mxu0 }
 0x43d   :  { %v3002_v19 = vadd.f32 %v3001_v25, %v2832_v60  ;;  %2854 = vmatmul.bf16.gmra.mxu0 %v2609_v13 }
 0x43f   :  { %3130 = vst [vmem:[#allocation3 + $0xa8] sm:$0xff] %v3002_v19 }
 0x440   :  { %v3084_v31 = vpop.f32.mrf.mxu3  ;;  %v3016_v3 = vpop.f32.mrf.mxu1 }
 0x448   :  { %v2915_v1 = vpop.f32.mrf.mxu2  ;;  %v3086_v17 = vpop.f32.mrf.mxu3 }
 0x449   :  { %v3085_v45 = vadd.f32 %v3084_v31, %v2915_v1  ;;  %v3019_v14 = vpop.f32.mrf.mxu1 }
 0x44b   :  { %v2835_v2 = vpop.f32.mrf.mxu0  ;;  %3163 = vst [vmem:[#allocation3 + $0x1b0] sm:$0xff] %v3085_v45 }
 0x44c   :  { %v3005_v49 = vadd.f32 %v3004_v59, %v2835_v2 }
 0x44e   :  { %3131 = vst [vmem:[#allocation3 + $0xb0] sm:$0xff] %v3005_v49 }
 0x450   :  { %v2917_v28 = vpop.f32.mrf.mxu2 }
 0x451   :  { %v3087_v63 = vadd.f32 %v3086_v17, %v2917_v28  ;;  %v3021_v16 = vpop.f32.mrf.mxu1 }
 0x453   :  { %v2837_v35 = vpop.f32.mrf.mxu0  ;;  %3164 = vst [vmem:[#allocation3 + $0x1b8] sm:$0xff] %v3087_v63 }
 0x454   :  { %v3007_v44 = vadd.f32 %v3006_v27, %v2837_v35 }
 0x456   :  { %3132 = vst [vmem:[#allocation3 + $0xb8] sm:$0xff] %v3007_v44 }
 0x459   :  { %v3089_v26 = vpop.f32.mrf.mxu3  ;;  %v3024_v58 = vpop.f32.mrf.mxu1 }
 0x461   :  { %v3091_v61 = vpop.f32.mrf.mxu3  ;;  %v3026_v48 = vpop.f32.mrf.mxu1 }
 0x462   :  { %v2920_v12 = vpop.f32.mrf.mxu2 }
 0x463   :  { %v3090_v24 = vadd.f32 %v3089_v26, %v2920_v12 }
 0x465   :  { %3165 = vst [vmem:[#allocation3 + $0x1c0] sm:$0xff] %v3090_v24 }
 0x46a   :  { %v2922_v20 = vpop.f32.mrf.mxu2 }
 0x46b   :  { %v3092_v10 = vadd.f32 %v3091_v61, %v2922_v20 }
 0x46c   :  { %v2840_v36 = vpop.f32.mrf.mxu0 }
 0x46d   :  { %3166 = vst [vmem:[#allocation3 + $0x1c8] sm:$0xff] %v3092_v10  ;;  %v3010_v8 = vadd.f32 %v3009_v55, %v2840_v36 }
 0x46f   :  { %3133 = vst [vmem:[#allocation3 + $0xc0] sm:$0xff] %v3010_v8  ;;  %v3094_v34 = vpop.f32.mrf.mxu3 }
 0x474   :  { %v2842_v46 = vpop.f32.mrf.mxu0 }
 0x475   :  { %v3012_v40 = vadd.f32 %v3011_v23, %v2842_v46 }
 0x477   :  { %3134 = vst [vmem:[#allocation3 + $0xc8] sm:$0xff] %v3012_v40  ;;  %v3096_v33 = vpop.f32.mrf.mxu3 }
 0x480   :  { %v2925_v0 = vpop.f32.mrf.mxu2 }
 0x481   :  { %v3095_v5 = vadd.f32 %v3094_v34, %v2925_v0 }
 0x482   :  { %v2845_v18 = vpop.f32.mrf.mxu0 }
 0x483   :  { %3167 = vst [vmem:[#allocation3 + $0x1d0] sm:$0xff] %v3095_v5  ;;  %v3015_v38 = vadd.f32 %v3014_v47, %v2845_v18 }
 0x485   :  { %3135 = vst [vmem:[#allocation3 + $0xd0] sm:$0xff] %v3015_v38 }
 0x488   :  { %v2927_v15 = vpop.f32.mrf.mxu2 }
 0x489   :  { %v3097_v6 = vadd.f32 %v3096_v33, %v2927_v15 }
 0x48a   :  { %v2847_v30 = vpop.f32.mrf.mxu0 }
 0x48b   :  { %3168 = vst [vmem:[#allocation3 + $0x1d8] sm:$0xff] %v3097_v6  ;;  %v3017_v50 = vadd.f32 %v3016_v3, %v2847_v30 }
 0x48d   :  { %3136 = vst [vmem:[#allocation3 + $0xd8] sm:$0xff] %v3017_v50 }
 0x490   :  { %v3099_v22 = vpop.f32.mrf.mxu3 }
 0x498   :  { %v2930_v52 = vpop.f32.mrf.mxu2  ;;  %v3101_v7 = vpop.f32.mrf.mxu3 }
 0x499   :  { %v3100_v39 = vadd.f32 %v3099_v22, %v2930_v52 }
 0x49b   :  { %3169 = vst [vmem:[#allocation3 + $0x1e0] sm:$0xff] %v3100_v39 }
 0x49c   :  { %v2850_v37 = vpop.f32.mrf.mxu0 }
 0x49d   :  { %v3020_v62 = vadd.f32 %v3019_v14, %v2850_v37 }
 0x49f   :  { %3137 = vst [vmem:[#allocation3 + $0xe0] sm:$0xff] %v3020_v62 }
 0x4a0   :  { %v2932_v43 = vpop.f32.mrf.mxu2 }
 0x4a1   :  { %v3102_v9 = vadd.f32 %v3101_v7, %v2932_v43 }
 0x4a3   :  { %3170 = vst [vmem:[#allocation3 + $0x1e8] sm:$0xff] %v3102_v9 }
 0x4a4   :  { %v2852_v21 = vpop.f32.mrf.mxu0 }
 0x4a5   :  { %v3022_v54 = vadd.f32 %v3021_v16, %v2852_v21 }
 0x4a7   :  { %3138 = vst [vmem:[#allocation3 + $0xe8] sm:$0xff] %v3022_v54 }
 0x4a8   :  { %v3104_v53 = vpop.f32.mrf.mxu3 }
 0x4b0   :  { %v3106_v41 = vpop.f32.mrf.mxu3 }
 0x4b1   :  { %v2935_v4 = vpop.f32.mrf.mxu2 }
 0x4b2   :  { %v3105_v32 = vadd.f32 %v3104_v53, %v2935_v4 }
 0x4b4   :  { %3171 = vst [vmem:[#allocation3 + $0x1f0] sm:$0xff] %v3105_v32 }
 0x4b9   :  { %v2937_v57 = vpop.f32.mrf.mxu2 }
 0x4ba   :  { %v3107_v42 = vadd.f32 %v3106_v41, %v2937_v57  ;;  %v2855_v51 = vpop.f32.mrf.mxu0 }
 0x4bb   :  { %v3025_v11 = vadd.f32 %v3024_v58, %v2855_v51 }
 0x4bc   :  { %3172 = vst [vmem:[#allocation3 + $0x1f8] sm:$0xff] %v3107_v42 }
 0x4bd   :  { %3139 = vst [vmem:[#allocation3 + $0xf0] sm:$0xff] %v3025_v11 }
 0x4c2   :  { %v2857_v29 = vpop.f32.mrf.mxu0 }
 0x4c3   :  { %v3027_v25 = vadd.f32 %v3026_v48, %v2857_v29 }
 0x4c5   :  { %3140 = vst [vmem:[#allocation3 + $0xf8] sm:$0xff] %v3027_v25 }
 0x4c6   :  { %3185 = dma.vmem_to_hbm [thread:$0]  %s3178_s4, 8192, %s3180_s17, [#allocation4], %s3691_s18, %s3691_s18, %s3692_s19  }
 0x4c7   :  { %3683 = dma.done.wait [#allocation4], 8192  }
 0x4c8   :  { %3684 = vsyncadd [#allocation4], 4294959104 }
 0x4c9   :  { %3190 = vsyncpa [#allocation4], 1 }

</bundles_post_ra>
